<compile_context>
chip_gen: v7x
topology: tpu7x:2x2x1
jax: 0.10.0
libtpu: 0.0.40
codegen_flags: <defaults>
</compile_context>

<pallas_src>
import math

import jax
import jax.numpy as jnp
from jax import lax
from jax.experimental import pallas as pl
from jax.experimental.pallas import tpu as pltpu

# ----------------------------- model config (small) -----------------------------
B = 2            # batch
C = 3            # image channels
IMG = 16         # image height/width
PATCH = 8        # patch size -> 2x2 = 4 patches
N_PATCH = (IMG // PATCH) ** 2
S_ENC = N_PATCH + 1          # +CLS  (= 5)
S_PAD = 8                    # encoder sequence padded to a sublane multiple
PDIM = C * PATCH * PATCH     # 192
D = 32           # hidden size
H = 4            # attention heads
DH = D // H      # head dim
FF = 64          # MLP hidden
N_ENC_LAYERS = 2
N_DEC_LAYERS = 2
VOCAB = 64
VOCAB_PAD = 128              # lane-dense LM-head / CE width
T_DEC = 8        # decoder / labels sequence length
PAD_ID = 0
START_ID = 1
EPS = 1e-5
NEG = -1e9
LANES = 128      # slab lane width


# ----------------------------- weight-slab layout ---------------------------------
# Every parameter tensor lives in one flat (ROWS, 128) f32 slab; each block's
# row offset is 8-aligned and each block starts at lane 0, so in-kernel static
# slices never need lane rotations.

def _align8(n):
    return (n + 7) & ~7


def _build_layout():
    entries = [("patch_w", PDIM, D), ("enc_bias", S_PAD, D)]
    for l in range(N_ENC_LAYERS):
        entries += [
            (f"enc{l}_qkv_w", D, 3 * D), (f"enc{l}_qkv_b", 1, 3 * D),
            (f"enc{l}_o_w", D, D), (f"enc{l}_o_b", 1, D),
            (f"enc{l}_ln", 4, D),
            (f"enc{l}_fc1_w", D, FF), (f"enc{l}_fc1_b", 1, FF),
            (f"enc{l}_fc2_w", FF, D), (f"enc{l}_fc2_b", 1, D),
        ]
    entries += [
        ("enc_lnf", 2, D), ("dec_lnemb", 2, D),
        ("dec_cross_kv_w", D, N_DEC_LAYERS * 2 * D),   # [L0 K | L0 V | L1 K | L1 V]
        ("dec_cross_kv_b", 1, N_DEC_LAYERS * 2 * D),
    ]
    for l in range(N_DEC_LAYERS):
        entries += [
            (f"dec{l}_self_qkv_w", D, 3 * D), (f"dec{l}_self_qkv_b", 1, 3 * D),
            (f"dec{l}_self_o_w", D, D), (f"dec{l}_self_o_b", 1, D),
            (f"dec{l}_cross_q_w", D, D), (f"dec{l}_cross_q_b", 1, D),
            (f"dec{l}_cross_o_w", D, D), (f"dec{l}_cross_o_b", 1, D),
            (f"dec{l}_ln", 6, D),
            (f"dec{l}_fc1_w", D, FF), (f"dec{l}_fc1_b", 1, FF),
            (f"dec{l}_fc2_w", FF, D), (f"dec{l}_fc2_b", 1, D),
        ]
    entries += [("lm_w", D, VOCAB_PAD), ("lm_b", 1, VOCAB_PAD)]

    layout, off = {}, 0
    for name, rows, cols in entries:
        layout[name] = (off, rows, cols)
        off += _align8(rows)
    return layout, _align8(off)


_W_LAYOUT, W_ROWS = _build_layout()


# ----------------------------- in-kernel helpers ---------------------------------

def _layer_norm(x, g, b):
    mu = jnp.mean(x, axis=-1, keepdims=True)
    xc = x - mu
    var = jnp.mean(xc * xc, axis=-1, keepdims=True)
    return xc * lax.rsqrt(var + EPS) * g + b


def _gelu(x):
    # TODO(synk): PyTorch nn.GELU uses exact erf; tanh approximation used here
    # to guarantee Mosaic lowering (numerical delta is tiny for this model).
    return jax.nn.gelu(x, approximate=True)


def _mha(q, k, v, w_o, b_o, mask_add):
    """Multi-head attention + single fused output projection.

    q:(Sq,D)  k,v:(Sk,D)  w_o:(D,D)  b_o:(1,D)  mask_add broadcastable to (Sq,Sk).
    Scale is applied once to the full q block (hoisted out of the head loop);
    per-head contexts are concatenated and projected with ONE (Sq,D)@(D,D) matmul.
    """
    q = q * (1.0 / math.sqrt(DH))
    ctx_parts = []
    for h in range(H):
        lo = h * DH
        s = jnp.einsum("qd,kd->qk", q[:, lo:lo + DH], k[:, lo:lo + DH],
                       preferred_element_type=jnp.float32)
        s = s + mask_add
        mx = jnp.max(s, axis=-1, keepdims=True)
        p = jnp.exp(s - mx)
        p = p * pl.reciprocal(jnp.sum(p, axis=-1, keepdims=True), approx=True)
        ctx_parts.append(jnp.dot(p, v[:, lo:lo + DH],
                                 preferred_element_type=jnp.float32))
    ctx = jnp.concatenate(ctx_parts, axis=-1)                      # (Sq, D)
    return jnp.dot(ctx, w_o, preferred_element_type=jnp.float32) + b_o


# ----------------------------- fused forward kernel --------------------------------

def _trocr_kernel(
    patches_ref,      # (1, S_PAD, PDIM)   row 0 (CLS) and rows >= S_ENC are zero
    dec_in_ref,       # (1, T_DEC, D)      tok_emb[shifted ids] + dec_pos
    labels_ref,       # (1, T_DEC, 1) int32
    w_ref,            # (W_ROWS, 128)      single flat weight slab (VMEM-resident)
    logits_ref,       # (1, T_DEC, VOCAB_PAD)
    loss_ref,         # (1, 1, VOCAB_PAD)  lane-dense per-sample loss numerator
):
    f32 = jnp.float32

    def W(name):
        off, rows, cols = _W_LAYOUT[name]
        return w_ref[pl.ds(off, rows), pl.ds(0, cols)]

    # ---------------- ViT encoder (pre-LN) ----------------
    x = jnp.dot(patches_ref[0], W("patch_w"),
                preferred_element_type=f32) + W("enc_bias")          # (S_PAD, D)

    # additive key mask for padded encoder positions (>= S_ENC)
    enc_kmask = jnp.where(
        lax.broadcasted_iota(jnp.int32, (1, S_PAD), 1) < S_ENC, 0.0, NEG)

    for l in range(N_ENC_LAYERS):
        ln = W(f"enc{l}_ln")                                         # (4, D)
        h = _layer_norm(x, ln[0:1, :], ln[1:2, :])
        qkv = jnp.dot(h, W(f"enc{l}_qkv_w"),
                      preferred_element_type=f32) + W(f"enc{l}_qkv_b")
        att = _mha(qkv[:, 0:D], qkv[:, D:2 * D], qkv[:, 2 * D:3 * D],
                   W(f"enc{l}_o_w"), W(f"enc{l}_o_b"), enc_kmask)
        x = x + att
        h = _layer_norm(x, ln[2:3, :], ln[3:4, :])
        h = _gelu(jnp.dot(h, W(f"enc{l}_fc1_w"),
                          preferred_element_type=f32) + W(f"enc{l}_fc1_b"))
        x = x + jnp.dot(h, W(f"enc{l}_fc2_w"),
                        preferred_element_type=f32) + W(f"enc{l}_fc2_b")

    lnf = W("enc_lnf")
    enc = _layer_norm(x, lnf[0:1, :], lnf[1:2, :])                   # (S_PAD, D)

    # cross-attention K/V for ALL decoder layers in one lane-full matmul
    kv_all = jnp.dot(enc, W("dec_cross_kv_w"),
                     preferred_element_type=f32) + W("dec_cross_kv_b")   # (S_PAD, 4D)

    # ---------------- TrOCR decoder (post-LN) ----------------
    lne = W("dec_lnemb")
    y = _layer_norm(dec_in_ref[0], lne[0:1, :], lne[1:2, :])         # (T_DEC, D)

    causal = jnp.where(
        lax.broadcasted_iota(jnp.int32, (T_DEC, T_DEC), 0)
        >= lax.broadcasted_iota(jnp.int32, (T_DEC, T_DEC), 1), 0.0, NEG)

    for l in range(N_DEC_LAYERS):
        ln = W(f"dec{l}_ln")                                         # (6, D)
        # causal self-attention
        qkv = jnp.dot(y, W(f"dec{l}_self_qkv_w"),
                      preferred_element_type=f32) + W(f"dec{l}_self_qkv_b")
        att = _mha(qkv[:, 0:D], qkv[:, D:2 * D], qkv[:, 2 * D:3 * D],
                   W(f"dec{l}_self_o_w"), W(f"dec{l}_self_o_b"), causal)
        y = _layer_norm(y + att, ln[0:1, :], ln[1:2, :])
        # cross-attention to encoder states (K/V hoisted above the loop)
        q = jnp.dot(y, W(f"dec{l}_cross_q_w"),
                    preferred_element_type=f32) + W(f"dec{l}_cross_q_b")
        k = kv_all[:, 2 * l * D:(2 * l + 1) * D]
        v = kv_all[:, (2 * l + 1) * D:(2 * l + 2) * D]
        att = _mha(q, k, v, W(f"dec{l}_cross_o_w"), W(f"dec{l}_cross_o_b"),
                   enc_kmask)
        y = _layer_norm(y + att, ln[2:3, :], ln[3:4, :])
        # feed-forward
        h = _gelu(jnp.dot(y, W(f"dec{l}_fc1_w"),
                          preferred_element_type=f32) + W(f"dec{l}_fc1_b"))
        h = jnp.dot(h, W(f"dec{l}_fc2_w"),
                    preferred_element_type=f32) + W(f"dec{l}_fc2_b")
        y = _layer_norm(y + h, ln[4:5, :], ln[5:6, :])

    # ---------------- LM head + token cross-entropy ----------------
    # lm_b carries NEG in the padded vocab lanes, so no in-kernel vocab mask.
    logits = jnp.dot(y, W("lm_w"), preferred_element_type=f32) + W("lm_b")
    logits_ref[0] = logits                                           # (T, VOCAB_PAD)

    m = jnp.max(logits, axis=-1, keepdims=True)
    lse = jnp.log(jnp.sum(jnp.exp(logits - m), axis=-1, keepdims=True)) + m

    vocab_iota = lax.broadcasted_iota(jnp.int32, (T_DEC, VOCAB_PAD), 1)
    lab = labels_ref[0]                                              # (T, 1) int32
    valid = lab != jnp.int32(-100)
    lab_c = jnp.where(valid, lab, 0)
    tgt = jnp.sum(jnp.where(vocab_iota == lab_c, logits, 0.0),
                  axis=-1, keepdims=True)                            # (T, 1)
    per_tok = (lse - tgt) * valid.astype(f32)                        # (T, 1)
    loss_row = jnp.sum(per_tok, axis=0, keepdims=True)               # (1, 1)
    loss_ref[0] = loss_row + jnp.zeros((1, VOCAB_PAD), f32)          # lane-dense store


# ----------------------------- parameters ----------------------------------------

def _dense(key, k_in, k_out):
    kw, _ = jax.random.split(key)
    return {"w": 0.02 * jax.random.normal(kw, (k_in, k_out), jnp.float32),
            "b": jnp.zeros((k_out,), jnp.float32)}


def _ln_params(_key):
    return {"g": jnp.ones((D,), jnp.float32), "b": jnp.zeros((D,), jnp.float32)}


def _attn_params(key):
    ks = jax.random.split(key, 4)
    return {"q": _dense(ks[0], D, D), "k": _dense(ks[1], D, D),
            "v": _dense(ks[2], D, D), "o": _dense(ks[3], D, D)}


def make_params(key):
    keys = iter(jax.random.split(key, 64))
    p = {}
    # ViT encoder
    p["patch_proj"] = _dense(next(keys), PDIM, D)
    p["cls_token"] = 0.02 * jax.random.normal(next(keys), (1, 1, D), jnp.float32)
    p["enc_pos"] = 0.02 * jax.random.normal(next(keys), (1, S_ENC, D), jnp.float32)
    p["enc_layers"] = []
    for _ in range(N_ENC_LAYERS):
        p["enc_layers"].append({
            "ln1": _ln_params(next(keys)), "attn": _attn_params(next(keys)),
            "ln2": _ln_params(next(keys)),
            "fc1": _dense(next(keys), D, FF), "fc2": _dense(next(keys), FF, D),
        })
    p["enc_ln_f"] = _ln_params(next(keys))
    # TrOCR decoder
    p["tok_emb"] = 0.02 * jax.random.normal(next(keys), (VOCAB, D), jnp.float32)
    p["dec_pos"] = 0.02 * jax.random.normal(next(keys), (T_DEC, D), jnp.float32)
    p["dec_ln_emb"] = _ln_params(next(keys))
    p["dec_layers"] = []
    for _ in range(N_DEC_LAYERS):
        p["dec_layers"].append({
            "self_attn": _attn_params(next(keys)), "ln_sa": _ln_params(next(keys)),
            "cross_attn": _attn_params(next(keys)), "ln_ca": _ln_params(next(keys)),
            "fc1": _dense(next(keys), D, FF), "fc2": _dense(next(keys), FF, D),
            "ln_ffn": _ln_params(next(keys)),
        })
    p["lm_head"] = _dense(next(keys), D, VOCAB)
    return p


# ----------------------------- weight-slab packing --------------------------------

def _pack_slab(p):
    def attn_qkv(ap):
        w = jnp.concatenate([ap["q"]["w"], ap["k"]["w"], ap["v"]["w"]], axis=1)
        b = jnp.concatenate([ap["q"]["b"], ap["k"]["b"], ap["v"]["b"]]).reshape(1, 3 * D)
        return w, b

    parts = {}
    parts["patch_w"] = p["patch_proj"]["w"]

    # per-row encoder bias: row0 = CLS + pos0, rows 1..N_PATCH = patch bias + pos,
    # padded rows = 0 (those keys get masked in-kernel)
    cls_row = p["cls_token"].reshape(1, D) + p["enc_pos"][0, 0:1, :]
    patch_rows = p["patch_proj"]["b"].reshape(1, D) + p["enc_pos"][0, 1:, :]
    parts["enc_bias"] = jnp.concatenate(
        [cls_row, patch_rows, jnp.zeros((S_PAD - S_ENC, D), jnp.float32)], axis=0)

    for l, lyr in enumerate(p["enc_layers"]):
        w, b = attn_qkv(lyr["attn"])
        parts[f"enc{l}_qkv_w"] = w
        parts[f"enc{l}_qkv_b"] = b
        parts[f"enc{l}_o_w"] = lyr["attn"]["o"]["w"]
        parts[f"enc{l}_o_b"] = lyr["attn"]["o"]["b"].reshape(1, D)
        parts[f"enc{l}_ln"] = jnp.stack([lyr["ln1"]["g"], lyr["ln1"]["b"],
                                         lyr["ln2"]["g"], lyr["ln2"]["b"]])
        parts[f"enc{l}_fc1_w"] = lyr["fc1"]["w"]
        parts[f"enc{l}_fc1_b"] = lyr["fc1"]["b"].reshape(1, FF)
        parts[f"enc{l}_fc2_w"] = lyr["fc2"]["w"]
        parts[f"enc{l}_fc2_b"] = lyr["fc2"]["b"].reshape(1, D)

    parts["enc_lnf"] = jnp.stack([p["enc_ln_f"]["g"], p["enc_ln_f"]["b"]])
    parts["dec_lnemb"] = jnp.stack([p["dec_ln_emb"]["g"], p["dec_ln_emb"]["b"]])

    # hoisted cross-attention K/V for all decoder layers: (D, L*2*D) = (32, 128)
    parts["dec_cross_kv_w"] = jnp.concatenate(
        [jnp.concatenate([lyr["cross_attn"]["k"]["w"], lyr["cross_attn"]["v"]["w"]],
                         axis=1) for lyr in p["dec_layers"]], axis=1)
    parts["dec_cross_kv_b"] = jnp.concatenate(
        [jnp.concatenate([lyr["cross_attn"]["k"]["b"], lyr["cross_attn"]["v"]["b"]])
         for lyr in p["dec_layers"]]).reshape(1, N_DEC_LAYERS * 2 * D)

    for l, lyr in enumerate(p["dec_layers"]):
        w, b = attn_qkv(lyr["self_attn"])
        parts[f"dec{l}_self_qkv_w"] = w
        parts[f"dec{l}_self_qkv_b"] = b
        parts[f"dec{l}_self_o_w"] = lyr["self_attn"]["o"]["w"]
        parts[f"dec{l}_self_o_b"] = lyr["self_attn"]["o"]["b"].reshape(1, D)
        parts[f"dec{l}_cross_q_w"] = lyr["cross_attn"]["q"]["w"]
        parts[f"dec{l}_cross_q_b"] = lyr["cross_attn"]["q"]["b"].reshape(1, D)
        parts[f"dec{l}_cross_o_w"] = lyr["cross_attn"]["o"]["w"]
        parts[f"dec{l}_cross_o_b"] = lyr["cross_attn"]["o"]["b"].reshape(1, D)
        parts[f"dec{l}_ln"] = jnp.stack([lyr["ln_sa"]["g"], lyr["ln_sa"]["b"],
                                         lyr["ln_ca"]["g"], lyr["ln_ca"]["b"],
                                         lyr["ln_ffn"]["g"], lyr["ln_ffn"]["b"]])
        parts[f"dec{l}_fc1_w"] = lyr["fc1"]["w"]
        parts[f"dec{l}_fc1_b"] = lyr["fc1"]["b"].reshape(1, FF)
        parts[f"dec{l}_fc2_w"] = lyr["fc2"]["w"]
        parts[f"dec{l}_fc2_b"] = lyr["fc2"]["b"].reshape(1, D)

    parts["lm_w"] = jnp.pad(p["lm_head"]["w"], ((0, 0), (0, VOCAB_PAD - VOCAB)))
    # pre-bias padded vocab lanes with NEG so the kernel needs no vocab mask
    parts["lm_b"] = jnp.concatenate(
        [p["lm_head"]["b"],
         jnp.full((VOCAB_PAD - VOCAB,), NEG, jnp.float32)]).reshape(1, VOCAB_PAD)

    slab = jnp.zeros((W_ROWS, LANES), jnp.float32)
    for name, (off, rows, cols) in _W_LAYOUT.items():
        t = parts[name].astype(jnp.float32)
        assert t.shape == (rows, cols), (name, t.shape, (rows, cols))
        slab = slab.at[off:off + rows, :cols].set(t)
    return slab


# ----------------------------- pallas_call wrapper ----------------------------------

def shift_tokens_right(labels):
    shifted = jnp.concatenate(
        [jnp.full((labels.shape[0], 1), START_ID, labels.dtype), labels[:, :-1]],
        axis=1)
    return jnp.where(shifted == -100, PAD_ID, shifted)


def safe_trocr_forward(params, pixel_values, labels):
    """SafeTrOCRModel.forward: pixel_values -> ViT encoder, labels -> decoder
    (input_ids never reach the encoder); returns (loss, logits)."""
    # patch unfold (== Conv2d(kernel=stride=PATCH)), padded to S_PAD rows
    hn = wn = IMG // PATCH
    patches = pixel_values.reshape(B, C, hn, PATCH, wn, PATCH)
    patches = patches.transpose(0, 2, 4, 1, 3, 5).reshape(B, N_PATCH, PDIM)
    patches_padded = jnp.pad(patches, ((0, 0), (1, S_PAD - 1 - N_PATCH), (0, 0)))

    # decoder input embeddings (token gather + learned positions) -- plain-JAX glue
    dec_ids = shift_tokens_right(labels)
    dec_in = jnp.take(params["tok_emb"], dec_ids, axis=0) + params["dec_pos"][None, :, :]
    labels_in = labels.astype(jnp.int32).reshape(B, T_DEC, 1)

    slab = _pack_slab(params)

    in_specs = [
        pl.BlockSpec((1, S_PAD, PDIM), lambda b: (b, 0, 0)),
        pl.BlockSpec((1, T_DEC, D), lambda b: (b, 0, 0)),
        pl.BlockSpec((1, T_DEC, 1), lambda b: (b, 0, 0)),
        pl.BlockSpec((W_ROWS, LANES), lambda b: (0, 0)),    # invariant weight slab
    ]
    out_shape = (
        jax.ShapeDtypeStruct((B, T_DEC, VOCAB_PAD), jnp.float32),
        jax.ShapeDtypeStruct((B, 1, VOCAB_PAD), jnp.float32),
    )
    out_specs = (
        pl.BlockSpec((1, T_DEC, VOCAB_PAD), lambda b: (b, 0, 0)),
        pl.BlockSpec((1, 1, VOCAB_PAD), lambda b: (b, 0, 0)),
    )

    logits_pad, loss_rows = pl.pallas_call(
        _trocr_kernel,
        out_shape=out_shape,
        grid=(B,),
        in_specs=in_specs,
        out_specs=out_specs,
        compiler_params=pltpu.CompilerParams(dimension_semantics=("parallel",)),
    )(patches_padded, dec_in, labels_in, slab)

    logits = logits_pad[:, :, :VOCAB]
    valid_cnt = jnp.sum((labels != -100).astype(jnp.float32))   # count host-side
    loss = jnp.sum(loss_rows[:, 0, 0]) / jnp.maximum(valid_cnt, 1.0)
    return loss, logits


# TODO(synk): SafeTrOCRModel's generate()/save_pretrained()/device-proxy methods are
# host-side plumbing with no kernel equivalent; only forward() is implemented.

# ----------------------------- main ------------------------------------------------

if __name__ == "__main__":
    key = jax.random.PRNGKey(0)
    k_img, k_lbl, k_params = jax.random.split(key, 3)

    pixel_values = jax.random.normal(k_img, (B, C, IMG, IMG), jnp.float32)  # NCHW
    labels = jax.random.randint(k_lbl, (B, T_DEC), 0, VOCAB, dtype=jnp.int32)
    labels = labels.at[:, -2:].set(-100)  # some ignored (padding) positions

    params = make_params(k_params)

    loss, logits = jax.jit(safe_trocr_forward)(params, pixel_values, labels)
    jax.block_until_ready((loss, logits))

    assert logits.shape == (B, T_DEC, VOCAB)
    assert loss.shape == () and jnp.isfinite(loss)
    print("KERNEL_OK")
</pallas_src>

<mosaic_0001>
module attributes {stable_mosaic.version = 11 : i64} {
  func.func @_trocr_kernel(%arg0: i32, %arg1: memref<1x8x192xf32, #tpu.memory_space<vmem>>, %arg2: memref<1x8x32xf32, #tpu.memory_space<vmem>>, %arg3: memref<1x8x1xi32, #tpu.memory_space<vmem>>, %arg4: memref<1256x128xf32, #tpu.memory_space<vmem>>, %arg5: memref<1x8x128xf32, #tpu.memory_space<vmem>>, %arg6: memref<1x1x128xf32, #tpu.memory_space<vmem>>) attributes {dimension_semantics = [#tpu.dimension_semantics<parallel>], iteration_bounds = array<i64: 2>, scalar_prefetch = 0 : i64, scratch_operands = 0 : i64, tpu.core_type = #tpu.core_type<tc>, window_params = [{transform_indices = @transform_0, window_bounds = array<i64: 1, 8, 192>}, {transform_indices = @transform_1, window_bounds = array<i64: 1, 8, 32>}, {transform_indices = @transform_2, window_bounds = array<i64: 1, 8, 1>}, {pipeline_mode = #tpu.pipeline_mode<synchronous>, transform_indices = @transform_3, window_bounds = array<i64: 1256, 128>}, {transform_indices = @transform_4, window_bounds = array<i64: 1, 8, 128>}, {transform_indices = @transform_5, window_bounds = array<i64: 1, 1, 128>}]} {
    %c0 = arith.constant 0 : index
    %c0_0 = arith.constant 0 : index
    %c0_1 = arith.constant 0 : index
    %0 = vector.load %arg1[%c0, %c0_0, %c0_1] : memref<1x8x192xf32, #tpu.memory_space<vmem>>, vector<1x8x192xf32>
    %1 = vector.shape_cast %0 : vector<1x8x192xf32> to vector<8x192xf32>
    %c0_2 = arith.constant 0 : index
    %c0_3 = arith.constant 0 : index
    %2 = vector.load %arg4[%c0_2, %c0_3] : memref<1256x128xf32, #tpu.memory_space<vmem>>, vector<192x32xf32>
    %cst = arith.constant dense<0.000000e+00> : vector<8x32xf32>
    %3 = tpu.matmul %1, %2, %cst {dimension_numbers = #tpu.dot_dimension_numbers<[1], [0], [0], [1], [0, 0, 1, 1], [], []>} : vector<8x192xf32>, vector<192x32xf32>, vector<8x32xf32> -> vector<8x32xf32>
    %c192 = arith.constant 192 : index
    %c0_4 = arith.constant 0 : index
    %4 = vector.load %arg4[%c192, %c0_4] : memref<1256x128xf32, #tpu.memory_space<vmem>>, vector<8x32xf32>
    %5 = arith.addf %3, %4 : vector<8x32xf32>
    %6 = tpu.iota {dimensions = array<i32: 1>} : vector<1x8xi32>
    %c5_i32 = arith.constant 5 : i32
    %7 = vector.broadcast %c5_i32 : i32 to vector<1x8xi32>
    %8 = arith.cmpi slt, %6, %7 : vector<1x8xi32>
    %cst_5 = arith.constant 0.000000e+00 : f32
    %cst_6 = arith.constant -1.000000e+09 : f32
    %9 = vector.broadcast %cst_5 : f32 to vector<1x8xf32>
    %10 = vector.broadcast %cst_6 : f32 to vector<1x8xf32>
    %11 = arith.select %8, %9, %10 : vector<1x8xi1>, vector<1x8xf32>
    %c280 = arith.constant 280 : index
    %c0_7 = arith.constant 0 : index
    %12 = vector.load %arg4[%c280, %c0_7] : memref<1256x128xf32, #tpu.memory_space<vmem>>, vector<4x32xf32>
    %13 = vector.extract_strided_slice %12 {offsets = [0, 0], sizes = [1, 32], strides = [1, 1]} : vector<4x32xf32> to vector<1x32xf32>
    %14 = vector.extract_strided_slice %12 {offsets = [1, 0], sizes = [1, 32], strides = [1, 1]} : vector<4x32xf32> to vector<1x32xf32>
    %cst_8 = arith.constant dense<0.000000e+00> : vector<8xf32>
    %15 = vector.multi_reduction <add>, %5, %cst_8 [1] : vector<8x32xf32> to vector<8xf32>
    %16 = vector.shape_cast %15 : vector<8xf32> to vector<8x1xf32>
    %cst_9 = arith.constant 3.200000e+01 : f32
    %17 = vector.broadcast %cst_9 : f32 to vector<8x1xf32>
    %18 = arith.divf %16, %17 : vector<8x1xf32>
    %19 = vector.broadcast %18 : vector<8x1xf32> to vector<8x32xf32>
    %20 = arith.subf %5, %19 : vector<8x32xf32>
    %21 = arith.mulf %20, %20 : vector<8x32xf32>
    %cst_10 = arith.constant dense<0.000000e+00> : vector<8xf32>
    %22 = vector.multi_reduction <add>, %21, %cst_10 [1] : vector<8x32xf32> to vector<8xf32>
    %23 = vector.shape_cast %22 : vector<8xf32> to vector<8x1xf32>
    %cst_11 = arith.constant 3.200000e+01 : f32
    %24 = vector.broadcast %cst_11 : f32 to vector<8x1xf32>
    %25 = arith.divf %23, %24 : vector<8x1xf32>
    %cst_12 = arith.constant 9.99999974E-6 : f32
    %26 = vector.broadcast %cst_12 : f32 to vector<8x1xf32>
    %27 = arith.addf %25, %26 : vector<8x1xf32>
    %28 = math.rsqrt %27 : vector<8x1xf32>
    %29 = vector.broadcast %28 : vector<8x1xf32> to vector<8x32xf32>
    %30 = arith.mulf %20, %29 : vector<8x32xf32>
    %31 = vector.broadcast %13 : vector<1x32xf32> to vector<8x32xf32>
    %32 = arith.mulf %30, %31 : vector<8x32xf32>
    %33 = vector.broadcast %14 : vector<1x32xf32> to vector<8x32xf32>
    %34 = arith.addf %32, %33 : vector<8x32xf32>
    %c200 = arith.constant 200 : index
    %c0_13 = arith.constant 0 : index
    %35 = vector.load %arg4[%c200, %c0_13] : memref<1256x128xf32, #tpu.memory_space<vmem>>, vector<32x96xf32>
    %cst_14 = arith.constant dense<0.000000e+00> : vector<8x96xf32>
    %36 = tpu.matmul %34, %35, %cst_14 {dimension_numbers = #tpu.dot_dimension_numbers<[1], [0], [0], [1], [0, 0, 1, 1], [], []>} : vector<8x32xf32>, vector<32x96xf32>, vector<8x96xf32> -> vector<8x96xf32>
    %c232 = arith.constant 232 : index
    %c0_15 = arith.constant 0 : index
    %37 = vector.load %arg4[%c232, %c0_15] : memref<1256x128xf32, #tpu.memory_space<vmem>>, vector<1x96xf32>
    %38 = vector.broadcast %37 : vector<1x96xf32> to vector<8x96xf32>
    %39 = arith.addf %36, %38 : vector<8x96xf32>
    %40 = vector.extract_strided_slice %39 {offsets = [0, 0], sizes = [8, 32], strides = [1, 1]} : vector<8x96xf32> to vector<8x32xf32>
    %41 = vector.extract_strided_slice %39 {offsets = [0, 32], sizes = [8, 32], strides = [1, 1]} : vector<8x96xf32> to vector<8x32xf32>
    %42 = vector.extract_strided_slice %39 {offsets = [0, 64], sizes = [8, 32], strides = [1, 1]} : vector<8x96xf32> to vector<8x32xf32>
    %c240 = arith.constant 240 : index
    %c0_16 = arith.constant 0 : index
    %43 = vector.load %arg4[%c240, %c0_16] : memref<1256x128xf32, #tpu.memory_space<vmem>>, vector<32x32xf32>
    %c272 = arith.constant 272 : index
    %c0_17 = arith.constant 0 : index
    %44 = vector.load %arg4[%c272, %c0_17] : memref<1256x128xf32, #tpu.memory_space<vmem>>, vector<1x32xf32>
    %cst_18 = arith.constant 0.353553385 : f32
    %45 = vector.broadcast %cst_18 : f32 to vector<8x32xf32>
    %46 = arith.mulf %40, %45 : vector<8x32xf32>
    %47 = vector.extract_strided_slice %46 {offsets = [0, 0], sizes = [8, 8], strides = [1, 1]} : vector<8x32xf32> to vector<8x8xf32>
    %48 = vector.extract_strided_slice %41 {offsets = [0, 0], sizes = [8, 8], strides = [1, 1]} : vector<8x32xf32> to vector<8x8xf32>
    "tpu.trace_start"() <{level = 10 : i32, message = "qd,kd->qk"}> : () -> ()
    %cst_19 = arith.constant dense<0.000000e+00> : vector<8x8xf32>
    %49 = tpu.matmul %47, %48, %cst_19 {dimension_numbers = #tpu.dot_dimension_numbers<[1], [1], [0], [0], [0, 0, 1, 0], [], []>} : vector<8x8xf32>, vector<8x8xf32>, vector<8x8xf32> -> vector<8x8xf32>
    "tpu.trace_stop"() : () -> ()
    %50 = vector.broadcast %11 : vector<1x8xf32> to vector<8x8xf32>
    %51 = arith.addf %49, %50 : vector<8x8xf32>
    %cst_20 = arith.constant dense<0xFF800000> : vector<8xf32>
    %52 = vector.multi_reduction <maximumf>, %51, %cst_20 [1] : vector<8x8xf32> to vector<8xf32>
    %53 = vector.shape_cast %52 : vector<8xf32> to vector<8x1xf32>
    %54 = vector.broadcast %53 : vector<8x1xf32> to vector<8x8xf32>
    %55 = arith.subf %51, %54 : vector<8x8xf32>
    %56 = math.exp %55 : vector<8x8xf32>
    %cst_21 = arith.constant dense<0.000000e+00> : vector<8xf32>
    %57 = vector.multi_reduction <add>, %56, %cst_21 [1] : vector<8x8xf32> to vector<8xf32>
    %58 = vector.shape_cast %57 : vector<8xf32> to vector<8x1xf32>
    %59 = tpu.reciprocal %58 {approx = true} : vector<8x1xf32> -> vector<8x1xf32>
    %60 = vector.broadcast %59 : vector<8x1xf32> to vector<8x8xf32>
    %61 = arith.mulf %56, %60 : vector<8x8xf32>
    %62 = vector.extract_strided_slice %42 {offsets = [0, 0], sizes = [8, 8], strides = [1, 1]} : vector<8x32xf32> to vector<8x8xf32>
    %cst_22 = arith.constant dense<0.000000e+00> : vector<8x8xf32>
    %63 = tpu.matmul %61, %62, %cst_22 {dimension_numbers = #tpu.dot_dimension_numbers<[1], [0], [0], [1], [0, 0, 1, 1], [], []>} : vector<8x8xf32>, vector<8x8xf32>, vector<8x8xf32> -> vector<8x8xf32>
    %64 = vector.extract_strided_slice %46 {offsets = [0, 8], sizes = [8, 8], strides = [1, 1]} : vector<8x32xf32> to vector<8x8xf32>
    %65 = vector.extract_strided_slice %41 {offsets = [0, 8], sizes = [8, 8], strides = [1, 1]} : vector<8x32xf32> to vector<8x8xf32>
    "tpu.trace_start"() <{level = 10 : i32, message = "qd,kd->qk"}> : () -> ()
    %cst_23 = arith.constant dense<0.000000e+00> : vector<8x8xf32>
    %66 = tpu.matmul %64, %65, %cst_23 {dimension_numbers = #tpu.dot_dimension_numbers<[1], [1], [0], [0], [0, 0, 1, 0], [], []>} : vector<8x8xf32>, vector<8x8xf32>, vector<8x8xf32> -> vector<8x8xf32>
    "tpu.trace_stop"() : () -> ()
    %67 = vector.broadcast %11 : vector<1x8xf32> to vector<8x8xf32>
    %68 = arith.addf %66, %67 : vector<8x8xf32>
    %cst_24 = arith.constant dense<0xFF800000> : vector<8xf32>
    %69 = vector.multi_reduction <maximumf>, %68, %cst_24 [1] : vector<8x8xf32> to vector<8xf32>
    %70 = vector.shape_cast %69 : vector<8xf32> to vector<8x1xf32>
    %71 = vector.broadcast %70 : vector<8x1xf32> to vector<8x8xf32>
    %72 = arith.subf %68, %71 : vector<8x8xf32>
    %73 = math.exp %72 : vector<8x8xf32>
    %cst_25 = arith.constant dense<0.000000e+00> : vector<8xf32>
    %74 = vector.multi_reduction <add>, %73, %cst_25 [1] : vector<8x8xf32> to vector<8xf32>
    %75 = vector.shape_cast %74 : vector<8xf32> to vector<8x1xf32>
    %76 = tpu.reciprocal %75 {approx = true} : vector<8x1xf32> -> vector<8x1xf32>
    %77 = vector.broadcast %76 : vector<8x1xf32> to vector<8x8xf32>
    %78 = arith.mulf %73, %77 : vector<8x8xf32>
    %79 = vector.extract_strided_slice %42 {offsets = [0, 8], sizes = [8, 8], strides = [1, 1]} : vector<8x32xf32> to vector<8x8xf32>
    %cst_26 = arith.constant dense<0.000000e+00> : vector<8x8xf32>
    %80 = tpu.matmul %78, %79, %cst_26 {dimension_numbers = #tpu.dot_dimension_numbers<[1], [0], [0], [1], [0, 0, 1, 1], [], []>} : vector<8x8xf32>, vector<8x8xf32>, vector<8x8xf32> -> vector<8x8xf32>
    %81 = vector.extract_strided_slice %46 {offsets = [0, 16], sizes = [8, 8], strides = [1, 1]} : vector<8x32xf32> to vector<8x8xf32>
    %82 = vector.extract_strided_slice %41 {offsets = [0, 16], sizes = [8, 8], strides = [1, 1]} : vector<8x32xf32> to vector<8x8xf32>
    "tpu.trace_start"() <{level = 10 : i32, message = "qd,kd->qk"}> : () -> ()
    %cst_27 = arith.constant dense<0.000000e+00> : vector<8x8xf32>
    %83 = tpu.matmul %81, %82, %cst_27 {dimension_numbers = #tpu.dot_dimension_numbers<[1], [1], [0], [0], [0, 0, 1, 0], [], []>} : vector<8x8xf32>, vector<8x8xf32>, vector<8x8xf32> -> vector<8x8xf32>
    "tpu.trace_stop"() : () -> ()
    %84 = vector.broadcast %11 : vector<1x8xf32> to vector<8x8xf32>
    %85 = arith.addf %83, %84 : vector<8x8xf32>
    %cst_28 = arith.constant dense<0xFF800000> : vector<8xf32>
    %86 = vector.multi_reduction <maximumf>, %85, %cst_28 [1] : vector<8x8xf32> to vector<8xf32>
    %87 = vector.shape_cast %86 : vector<8xf32> to vector<8x1xf32>
    %88 = vector.broadcast %87 : vector<8x1xf32> to vector<8x8xf32>
    %89 = arith.subf %85, %88 : vector<8x8xf32>
    %90 = math.exp %89 : vector<8x8xf32>
    %cst_29 = arith.constant dense<0.000000e+00> : vector<8xf32>
    %91 = vector.multi_reduction <add>, %90, %cst_29 [1] : vector<8x8xf32> to vector<8xf32>
    %92 = vector.shape_cast %91 : vector<8xf32> to vector<8x1xf32>
    %93 = tpu.reciprocal %92 {approx = true} : vector<8x1xf32> -> vector<8x1xf32>
    %94 = vector.broadcast %93 : vector<8x1xf32> to vector<8x8xf32>
    %95 = arith.mulf %90, %94 : vector<8x8xf32>
    %96 = vector.extract_strided_slice %42 {offsets = [0, 16], sizes = [8, 8], strides = [1, 1]} : vector<8x32xf32> to vector<8x8xf32>
    %cst_30 = arith.constant dense<0.000000e+00> : vector<8x8xf32>
    %97 = tpu.matmul %95, %96, %cst_30 {dimension_numbers = #tpu.dot_dimension_numbers<[1], [0], [0], [1], [0, 0, 1, 1], [], []>} : vector<8x8xf32>, vector<8x8xf32>, vector<8x8xf32> -> vector<8x8xf32>
    %98 = vector.extract_strided_slice %46 {offsets = [0, 24], sizes = [8, 8], strides = [1, 1]} : vector<8x32xf32> to vector<8x8xf32>
    %99 = vector.extract_strided_slice %41 {offsets = [0, 24], sizes = [8, 8], strides = [1, 1]} : vector<8x32xf32> to vector<8x8xf32>
    "tpu.trace_start"() <{level = 10 : i32, message = "qd,kd->qk"}> : () -> ()
    %cst_31 = arith.constant dense<0.000000e+00> : vector<8x8xf32>
    %100 = tpu.matmul %98, %99, %cst_31 {dimension_numbers = #tpu.dot_dimension_numbers<[1], [1], [0], [0], [0, 0, 1, 0], [], []>} : vector<8x8xf32>, vector<8x8xf32>, vector<8x8xf32> -> vector<8x8xf32>
    "tpu.trace_stop"() : () -> ()
    %101 = vector.broadcast %11 : vector<1x8xf32> to vector<8x8xf32>
    %102 = arith.addf %100, %101 : vector<8x8xf32>
    %cst_32 = arith.constant dense<0xFF800000> : vector<8xf32>
    %103 = vector.multi_reduction <maximumf>, %102, %cst_32 [1] : vector<8x8xf32> to vector<8xf32>
    %104 = vector.shape_cast %103 : vector<8xf32> to vector<8x1xf32>
    %105 = vector.broadcast %104 : vector<8x1xf32> to vector<8x8xf32>
    %106 = arith.subf %102, %105 : vector<8x8xf32>
    %107 = math.exp %106 : vector<8x8xf32>
    %cst_33 = arith.constant dense<0.000000e+00> : vector<8xf32>
    %108 = vector.multi_reduction <add>, %107, %cst_33 [1] : vector<8x8xf32> to vector<8xf32>
    %109 = vector.shape_cast %108 : vector<8xf32> to vector<8x1xf32>
    %110 = tpu.reciprocal %109 {approx = true} : vector<8x1xf32> -> vector<8x1xf32>
    %111 = vector.broadcast %110 : vector<8x1xf32> to vector<8x8xf32>
    %112 = arith.mulf %107, %111 : vector<8x8xf32>
    %113 = vector.extract_strided_slice %42 {offsets = [0, 24], sizes = [8, 8], strides = [1, 1]} : vector<8x32xf32> to vector<8x8xf32>
    %cst_34 = arith.constant dense<0.000000e+00> : vector<8x8xf32>
    %114 = tpu.matmul %112, %113, %cst_34 {dimension_numbers = #tpu.dot_dimension_numbers<[1], [0], [0], [1], [0, 0, 1, 1], [], []>} : vector<8x8xf32>, vector<8x8xf32>, vector<8x8xf32> -> vector<8x8xf32>
    %115 = tpu.concatenate %63, %80, %97, %114 in 1 : vector<8x8xf32>, vector<8x8xf32>, vector<8x8xf32>, vector<8x8xf32> -> vector<8x32xf32>
    %cst_35 = arith.constant dense<0.000000e+00> : vector<8x32xf32>
    %116 = tpu.matmul %115, %43, %cst_35 {dimension_numbers = #tpu.dot_dimension_numbers<[1], [0], [0], [1], [0, 0, 1, 1], [], []>} : vector<8x32xf32>, vector<32x32xf32>, vector<8x32xf32> -> vector<8x32xf32>
    %117 = vector.broadcast %44 : vector<1x32xf32> to vector<8x32xf32>
    %118 = arith.addf %116, %117 : vector<8x32xf32>
    %119 = arith.addf %5, %118 : vector<8x32xf32>
    %120 = vector.extract_strided_slice %12 {offsets = [2, 0], sizes = [1, 32], strides = [1, 1]} : vector<4x32xf32> to vector<1x32xf32>
    %121 = vector.extract_strided_slice %12 {offsets = [3, 0], sizes = [1, 32], strides = [1, 1]} : vector<4x32xf32> to vector<1x32xf32>
    %cst_36 = arith.constant dense<0.000000e+00> : vector<8xf32>
    %122 = vector.multi_reduction <add>, %119, %cst_36 [1] : vector<8x32xf32> to vector<8xf32>
    %123 = vector.shape_cast %122 : vector<8xf32> to vector<8x1xf32>
    %cst_37 = arith.constant 3.200000e+01 : f32
    %124 = vector.broadcast %cst_37 : f32 to vector<8x1xf32>
    %125 = arith.divf %123, %124 : vector<8x1xf32>
    %126 = vector.broadcast %125 : vector<8x1xf32> to vector<8x32xf32>
    %127 = arith.subf %119, %126 : vector<8x32xf32>
    %128 = arith.mulf %127, %127 : vector<8x32xf32>
    %cst_38 = arith.constant dense<0.000000e+00> : vector<8xf32>
    %129 = vector.multi_reduction <add>, %128, %cst_38 [1] : vector<8x32xf32> to vector<8xf32>
    %130 = vector.shape_cast %129 : vector<8xf32> to vector<8x1xf32>
    %cst_39 = arith.constant 3.200000e+01 : f32
    %131 = vector.broadcast %cst_39 : f32 to vector<8x1xf32>
    %132 = arith.divf %130, %131 : vector<8x1xf32>
    %cst_40 = arith.constant 9.99999974E-6 : f32
    %133 = vector.broadcast %cst_40 : f32 to vector<8x1xf32>
    %134 = arith.addf %132, %133 : vector<8x1xf32>
    %135 = math.rsqrt %134 : vector<8x1xf32>
    %136 = vector.broadcast %135 : vector<8x1xf32> to vector<8x32xf32>
    %137 = arith.mulf %127, %136 : vector<8x32xf32>
    %138 = vector.broadcast %120 : vector<1x32xf32> to vector<8x32xf32>
    %139 = arith.mulf %137, %138 : vector<8x32xf32>
    %140 = vector.broadcast %121 : vector<1x32xf32> to vector<8x32xf32>
    %141 = arith.addf %139, %140 : vector<8x32xf32>
    %c288 = arith.constant 288 : index
    %c0_41 = arith.constant 0 : index
    %142 = vector.load %arg4[%c288, %c0_41] : memref<1256x128xf32, #tpu.memory_space<vmem>>, vector<32x64xf32>
    %cst_42 = arith.constant dense<0.000000e+00> : vector<8x64xf32>
    %143 = tpu.matmul %141, %142, %cst_42 {dimension_numbers = #tpu.dot_dimension_numbers<[1], [0], [0], [1], [0, 0, 1, 1], [], []>} : vector<8x32xf32>, vector<32x64xf32>, vector<8x64xf32> -> vector<8x64xf32>
    %c320 = arith.constant 320 : index
    %c0_43 = arith.constant 0 : index
    %144 = vector.load %arg4[%c320, %c0_43] : memref<1256x128xf32, #tpu.memory_space<vmem>>, vector<1x64xf32>
    %145 = vector.broadcast %144 : vector<1x64xf32> to vector<8x64xf32>
    %146 = arith.addf %143, %145 : vector<8x64xf32>
    %147 = arith.mulf %146, %146 : vector<8x64xf32>
    %148 = arith.mulf %146, %147 : vector<8x64xf32>
    %cst_44 = arith.constant 4.471500e-02 : f32
    %149 = vector.broadcast %cst_44 : f32 to vector<8x64xf32>
    %150 = arith.mulf %149, %148 : vector<8x64xf32>
    %151 = arith.addf %146, %150 : vector<8x64xf32>
    %cst_45 = arith.constant 0.797884583 : f32
    %152 = vector.broadcast %cst_45 : f32 to vector<8x64xf32>
    %153 = arith.mulf %152, %151 : vector<8x64xf32>
    %154 = math.tanh %153 : vector<8x64xf32>
    %cst_46 = arith.constant 1.000000e+00 : f32
    %155 = vector.broadcast %cst_46 : f32 to vector<8x64xf32>
    %156 = arith.addf %155, %154 : vector<8x64xf32>
    %cst_47 = arith.constant 5.000000e-01 : f32
    %157 = vector.broadcast %cst_47 : f32 to vector<8x64xf32>
    %158 = arith.mulf %157, %156 : vector<8x64xf32>
    %159 = arith.mulf %146, %158 : vector<8x64xf32>
    %c328 = arith.constant 328 : index
    %c0_48 = arith.constant 0 : index
    %160 = vector.load %arg4[%c328, %c0_48] : memref<1256x128xf32, #tpu.memory_space<vmem>>, vector<64x32xf32>
    %cst_49 = arith.constant dense<0.000000e+00> : vector<8x32xf32>
    %161 = tpu.matmul %159, %160, %cst_49 {dimension_numbers = #tpu.dot_dimension_numbers<[1], [0], [0], [1], [0, 0, 1, 1], [], []>} : vector<8x64xf32>, vector<64x32xf32>, vector<8x32xf32> -> vector<8x32xf32>
    %162 = arith.addf %119, %161 : vector<8x32xf32>
    %c392 = arith.constant 392 : index
    %c0_50 = arith.constant 0 : index
    %163 = vector.load %arg4[%c392, %c0_50] : memref<1256x128xf32, #tpu.memory_space<vmem>>, vector<1x32xf32>
    %164 = vector.broadcast %163 : vector<1x32xf32> to vector<8x32xf32>
    %165 = arith.addf %162, %164 : vector<8x32xf32>
    %c480 = arith.constant 480 : index
    %c0_51 = arith.constant 0 : index
    %166 = vector.load %arg4[%c480, %c0_51] : memref<1256x128xf32, #tpu.memory_space<vmem>>, vector<4x32xf32>
    %167 = vector.extract_strided_slice %166 {offsets = [0, 0], sizes = [1, 32], strides = [1, 1]} : vector<4x32xf32> to vector<1x32xf32>
    %168 = vector.extract_strided_slice %166 {offsets = [1, 0], sizes = [1, 32], strides = [1, 1]} : vector<4x32xf32> to vector<1x32xf32>
    %cst_52 = arith.constant dense<0.000000e+00> : vector<8xf32>
    %169 = vector.multi_reduction <add>, %165, %cst_52 [1] : vector<8x32xf32> to vector<8xf32>
    %170 = vector.shape_cast %169 : vector<8xf32> to vector<8x1xf32>
    %cst_53 = arith.constant 3.200000e+01 : f32
    %171 = vector.broadcast %cst_53 : f32 to vector<8x1xf32>
    %172 = arith.divf %170, %171 : vector<8x1xf32>
    %173 = vector.broadcast %172 : vector<8x1xf32> to vector<8x32xf32>
    %174 = arith.subf %165, %173 : vector<8x32xf32>
    %175 = arith.mulf %174, %174 : vector<8x32xf32>
    %cst_54 = arith.constant dense<0.000000e+00> : vector<8xf32>
    %176 = vector.multi_reduction <add>, %175, %cst_54 [1] : vector<8x32xf32> to vector<8xf32>
    %177 = vector.shape_cast %176 : vector<8xf32> to vector<8x1xf32>
    %cst_55 = arith.constant 3.200000e+01 : f32
    %178 = vector.broadcast %cst_55 : f32 to vector<8x1xf32>
    %179 = arith.divf %177, %178 : vector<8x1xf32>
    %cst_56 = arith.constant 9.99999974E-6 : f32
    %180 = vector.broadcast %cst_56 : f32 to vector<8x1xf32>
    %181 = arith.addf %179, %180 : vector<8x1xf32>
    %182 = math.rsqrt %181 : vector<8x1xf32>
    %183 = vector.broadcast %182 : vector<8x1xf32> to vector<8x32xf32>
    %184 = arith.mulf %174, %183 : vector<8x32xf32>
    %185 = vector.broadcast %167 : vector<1x32xf32> to vector<8x32xf32>
    %186 = arith.mulf %184, %185 : vector<8x32xf32>
    %187 = vector.broadcast %168 : vector<1x32xf32> to vector<8x32xf32>
    %188 = arith.addf %186, %187 : vector<8x32xf32>
    %c400 = arith.constant 400 : index
    %c0_57 = arith.constant 0 : index
    %189 = vector.load %arg4[%c400, %c0_57] : memref<1256x128xf32, #tpu.memory_space<vmem>>, vector<32x96xf32>
    %cst_58 = arith.constant dense<0.000000e+00> : vector<8x96xf32>
    %190 = tpu.matmul %188, %189, %cst_58 {dimension_numbers = #tpu.dot_dimension_numbers<[1], [0], [0], [1], [0, 0, 1, 1], [], []>} : vector<8x32xf32>, vector<32x96xf32>, vector<8x96xf32> -> vector<8x96xf32>
    %c432 = arith.constant 432 : index
    %c0_59 = arith.constant 0 : index
    %191 = vector.load %arg4[%c432, %c0_59] : memref<1256x128xf32, #tpu.memory_space<vmem>>, vector<1x96xf32>
    %192 = vector.broadcast %191 : vector<1x96xf32> to vector<8x96xf32>
    %193 = arith.addf %190, %192 : vector<8x96xf32>
    %194 = vector.extract_strided_slice %193 {offsets = [0, 0], sizes = [8, 32], strides = [1, 1]} : vector<8x96xf32> to vector<8x32xf32>
    %195 = vector.extract_strided_slice %193 {offsets = [0, 32], sizes = [8, 32], strides = [1, 1]} : vector<8x96xf32> to vector<8x32xf32>
    %196 = vector.extract_strided_slice %193 {offsets = [0, 64], sizes = [8, 32], strides = [1, 1]} : vector<8x96xf32> to vector<8x32xf32>
    %c440 = arith.constant 440 : index
    %c0_60 = arith.constant 0 : index
    %197 = vector.load %arg4[%c440, %c0_60] : memref<1256x128xf32, #tpu.memory_space<vmem>>, vector<32x32xf32>
    %c472 = arith.constant 472 : index
    %c0_61 = arith.constant 0 : index
    %198 = vector.load %arg4[%c472, %c0_61] : memref<1256x128xf32, #tpu.memory_space<vmem>>, vector<1x32xf32>
    %cst_62 = arith.constant 0.353553385 : f32
    %199 = vector.broadcast %cst_62 : f32 to vector<8x32xf32>
    %200 = arith.mulf %194, %199 : vector<8x32xf32>
    %201 = vector.extract_strided_slice %200 {offsets = [0, 0], sizes = [8, 8], strides = [1, 1]} : vector<8x32xf32> to vector<8x8xf32>
    %202 = vector.extract_strided_slice %195 {offsets = [0, 0], sizes = [8, 8], strides = [1, 1]} : vector<8x32xf32> to vector<8x8xf32>
    "tpu.trace_start"() <{level = 10 : i32, message = "qd,kd->qk"}> : () -> ()
    %cst_63 = arith.constant dense<0.000000e+00> : vector<8x8xf32>
    %203 = tpu.matmul %201, %202, %cst_63 {dimension_numbers = #tpu.dot_dimension_numbers<[1], [1], [0], [0], [0, 0, 1, 0], [], []>} : vector<8x8xf32>, vector<8x8xf32>, vector<8x8xf32> -> vector<8x8xf32>
    "tpu.trace_stop"() : () -> ()
    %204 = vector.broadcast %11 : vector<1x8xf32> to vector<8x8xf32>
    %205 = arith.addf %203, %204 : vector<8x8xf32>
    %cst_64 = arith.constant dense<0xFF800000> : vector<8xf32>
    %206 = vector.multi_reduction <maximumf>, %205, %cst_64 [1] : vector<8x8xf32> to vector<8xf32>
    %207 = vector.shape_cast %206 : vector<8xf32> to vector<8x1xf32>
    %208 = vector.broadcast %207 : vector<8x1xf32> to vector<8x8xf32>
    %209 = arith.subf %205, %208 : vector<8x8xf32>
    %210 = math.exp %209 : vector<8x8xf32>
    %cst_65 = arith.constant dense<0.000000e+00> : vector<8xf32>
    %211 = vector.multi_reduction <add>, %210, %cst_65 [1] : vector<8x8xf32> to vector<8xf32>
    %212 = vector.shape_cast %211 : vector<8xf32> to vector<8x1xf32>
    %213 = tpu.reciprocal %212 {approx = true} : vector<8x1xf32> -> vector<8x1xf32>
    %214 = vector.broadcast %213 : vector<8x1xf32> to vector<8x8xf32>
    %215 = arith.mulf %210, %214 : vector<8x8xf32>
    %216 = vector.extract_strided_slice %196 {offsets = [0, 0], sizes = [8, 8], strides = [1, 1]} : vector<8x32xf32> to vector<8x8xf32>
    %cst_66 = arith.constant dense<0.000000e+00> : vector<8x8xf32>
    %217 = tpu.matmul %215, %216, %cst_66 {dimension_numbers = #tpu.dot_dimension_numbers<[1], [0], [0], [1], [0, 0, 1, 1], [], []>} : vector<8x8xf32>, vector<8x8xf32>, vector<8x8xf32> -> vector<8x8xf32>
    %218 = vector.extract_strided_slice %200 {offsets = [0, 8], sizes = [8, 8], strides = [1, 1]} : vector<8x32xf32> to vector<8x8xf32>
    %219 = vector.extract_strided_slice %195 {offsets = [0, 8], sizes = [8, 8], strides = [1, 1]} : vector<8x32xf32> to vector<8x8xf32>
    "tpu.trace_start"() <{level = 10 : i32, message = "qd,kd->qk"}> : () -> ()
    %cst_67 = arith.constant dense<0.000000e+00> : vector<8x8xf32>
    %220 = tpu.matmul %218, %219, %cst_67 {dimension_numbers = #tpu.dot_dimension_numbers<[1], [1], [0], [0], [0, 0, 1, 0], [], []>} : vector<8x8xf32>, vector<8x8xf32>, vector<8x8xf32> -> vector<8x8xf32>
    "tpu.trace_stop"() : () -> ()
    %221 = vector.broadcast %11 : vector<1x8xf32> to vector<8x8xf32>
    %222 = arith.addf %220, %221 : vector<8x8xf32>
    %cst_68 = arith.constant dense<0xFF800000> : vector<8xf32>
    %223 = vector.multi_reduction <maximumf>, %222, %cst_68 [1] : vector<8x8xf32> to vector<8xf32>
    %224 = vector.shape_cast %223 : vector<8xf32> to vector<8x1xf32>
    %225 = vector.broadcast %224 : vector<8x1xf32> to vector<8x8xf32>
    %226 = arith.subf %222, %225 : vector<8x8xf32>
    %227 = math.exp %226 : vector<8x8xf32>
    %cst_69 = arith.constant dense<0.000000e+00> : vector<8xf32>
    %228 = vector.multi_reduction <add>, %227, %cst_69 [1] : vector<8x8xf32> to vector<8xf32>
    %229 = vector.shape_cast %228 : vector<8xf32> to vector<8x1xf32>
    %230 = tpu.reciprocal %229 {approx = true} : vector<8x1xf32> -> vector<8x1xf32>
    %231 = vector.broadcast %230 : vector<8x1xf32> to vector<8x8xf32>
    %232 = arith.mulf %227, %231 : vector<8x8xf32>
    %233 = vector.extract_strided_slice %196 {offsets = [0, 8], sizes = [8, 8], strides = [1, 1]} : vector<8x32xf32> to vector<8x8xf32>
    %cst_70 = arith.constant dense<0.000000e+00> : vector<8x8xf32>
    %234 = tpu.matmul %232, %233, %cst_70 {dimension_numbers = #tpu.dot_dimension_numbers<[1], [0], [0], [1], [0, 0, 1, 1], [], []>} : vector<8x8xf32>, vector<8x8xf32>, vector<8x8xf32> -> vector<8x8xf32>
    %235 = vector.extract_strided_slice %200 {offsets = [0, 16], sizes = [8, 8], strides = [1, 1]} : vector<8x32xf32> to vector<8x8xf32>
    %236 = vector.extract_strided_slice %195 {offsets = [0, 16], sizes = [8, 8], strides = [1, 1]} : vector<8x32xf32> to vector<8x8xf32>
    "tpu.trace_start"() <{level = 10 : i32, message = "qd,kd->qk"}> : () -> ()
    %cst_71 = arith.constant dense<0.000000e+00> : vector<8x8xf32>
    %237 = tpu.matmul %235, %236, %cst_71 {dimension_numbers = #tpu.dot_dimension_numbers<[1], [1], [0], [0], [0, 0, 1, 0], [], []>} : vector<8x8xf32>, vector<8x8xf32>, vector<8x8xf32> -> vector<8x8xf32>
    "tpu.trace_stop"() : () -> ()
    %238 = vector.broadcast %11 : vector<1x8xf32> to vector<8x8xf32>
    %239 = arith.addf %237, %238 : vector<8x8xf32>
    %cst_72 = arith.constant dense<0xFF800000> : vector<8xf32>
    %240 = vector.multi_reduction <maximumf>, %239, %cst_72 [1] : vector<8x8xf32> to vector<8xf32>
    %241 = vector.shape_cast %240 : vector<8xf32> to vector<8x1xf32>
    %242 = vector.broadcast %241 : vector<8x1xf32> to vector<8x8xf32>
    %243 = arith.subf %239, %242 : vector<8x8xf32>
    %244 = math.exp %243 : vector<8x8xf32>
    %cst_73 = arith.constant dense<0.000000e+00> : vector<8xf32>
    %245 = vector.multi_reduction <add>, %244, %cst_73 [1] : vector<8x8xf32> to vector<8xf32>
    %246 = vector.shape_cast %245 : vector<8xf32> to vector<8x1xf32>
    %247 = tpu.reciprocal %246 {approx = true} : vector<8x1xf32> -> vector<8x1xf32>
    %248 = vector.broadcast %247 : vector<8x1xf32> to vector<8x8xf32>
    %249 = arith.mulf %244, %248 : vector<8x8xf32>
    %250 = vector.extract_strided_slice %196 {offsets = [0, 16], sizes = [8, 8], strides = [1, 1]} : vector<8x32xf32> to vector<8x8xf32>
    %cst_74 = arith.constant dense<0.000000e+00> : vector<8x8xf32>
    %251 = tpu.matmul %249, %250, %cst_74 {dimension_numbers = #tpu.dot_dimension_numbers<[1], [0], [0], [1], [0, 0, 1, 1], [], []>} : vector<8x8xf32>, vector<8x8xf32>, vector<8x8xf32> -> vector<8x8xf32>
    %252 = vector.extract_strided_slice %200 {offsets = [0, 24], sizes = [8, 8], strides = [1, 1]} : vector<8x32xf32> to vector<8x8xf32>
    %253 = vector.extract_strided_slice %195 {offsets = [0, 24], sizes = [8, 8], strides = [1, 1]} : vector<8x32xf32> to vector<8x8xf32>
    "tpu.trace_start"() <{level = 10 : i32, message = "qd,kd->qk"}> : () -> ()
    %cst_75 = arith.constant dense<0.000000e+00> : vector<8x8xf32>
    %254 = tpu.matmul %252, %253, %cst_75 {dimension_numbers = #tpu.dot_dimension_numbers<[1], [1], [0], [0], [0, 0, 1, 0], [], []>} : vector<8x8xf32>, vector<8x8xf32>, vector<8x8xf32> -> vector<8x8xf32>
    "tpu.trace_stop"() : () -> ()
    %255 = vector.broadcast %11 : vector<1x8xf32> to vector<8x8xf32>
    %256 = arith.addf %254, %255 : vector<8x8xf32>
    %cst_76 = arith.constant dense<0xFF800000> : vector<8xf32>
    %257 = vector.multi_reduction <maximumf>, %256, %cst_76 [1] : vector<8x8xf32> to vector<8xf32>
    %258 = vector.shape_cast %257 : vector<8xf32> to vector<8x1xf32>
    %259 = vector.broadcast %258 : vector<8x1xf32> to vector<8x8xf32>
    %260 = arith.subf %256, %259 : vector<8x8xf32>
    %261 = math.exp %260 : vector<8x8xf32>
    %cst_77 = arith.constant dense<0.000000e+00> : vector<8xf32>
    %262 = vector.multi_reduction <add>, %261, %cst_77 [1] : vector<8x8xf32> to vector<8xf32>
    %263 = vector.shape_cast %262 : vector<8xf32> to vector<8x1xf32>
    %264 = tpu.reciprocal %263 {approx = true} : vector<8x1xf32> -> vector<8x1xf32>
    %265 = vector.broadcast %264 : vector<8x1xf32> to vector<8x8xf32>
    %266 = arith.mulf %261, %265 : vector<8x8xf32>
    %267 = vector.extract_strided_slice %196 {offsets = [0, 24], sizes = [8, 8], strides = [1, 1]} : vector<8x32xf32> to vector<8x8xf32>
    %cst_78 = arith.constant dense<0.000000e+00> : vector<8x8xf32>
    %268 = tpu.matmul %266, %267, %cst_78 {dimension_numbers = #tpu.dot_dimension_numbers<[1], [0], [0], [1], [0, 0, 1, 1], [], []>} : vector<8x8xf32>, vector<8x8xf32>, vector<8x8xf32> -> vector<8x8xf32>
    %269 = tpu.concatenate %217, %234, %251, %268 in 1 : vector<8x8xf32>, vector<8x8xf32>, vector<8x8xf32>, vector<8x8xf32> -> vector<8x32xf32>
    %cst_79 = arith.constant dense<0.000000e+00> : vector<8x32xf32>
    %270 = tpu.matmul %269, %197, %cst_79 {dimension_numbers = #tpu.dot_dimension_numbers<[1], [0], [0], [1], [0, 0, 1, 1], [], []>} : vector<8x32xf32>, vector<32x32xf32>, vector<8x32xf32> -> vector<8x32xf32>
    %271 = vector.broadcast %198 : vector<1x32xf32> to vector<8x32xf32>
    %272 = arith.addf %270, %271 : vector<8x32xf32>
    %273 = arith.addf %165, %272 : vector<8x32xf32>
    %274 = vector.extract_strided_slice %166 {offsets = [2, 0], sizes = [1, 32], strides = [1, 1]} : vector<4x32xf32> to vector<1x32xf32>
    %275 = vector.extract_strided_slice %166 {offsets = [3, 0], sizes = [1, 32], strides = [1, 1]} : vector<4x32xf32> to vector<1x32xf32>
    %cst_80 = arith.constant dense<0.000000e+00> : vector<8xf32>
    %276 = vector.multi_reduction <add>, %273, %cst_80 [1] : vector<8x32xf32> to vector<8xf32>
    %277 = vector.shape_cast %276 : vector<8xf32> to vector<8x1xf32>
    %cst_81 = arith.constant 3.200000e+01 : f32
    %278 = vector.broadcast %cst_81 : f32 to vector<8x1xf32>
    %279 = arith.divf %277, %278 : vector<8x1xf32>
    %280 = vector.broadcast %279 : vector<8x1xf32> to vector<8x32xf32>
    %281 = arith.subf %273, %280 : vector<8x32xf32>
    %282 = arith.mulf %281, %281 : vector<8x32xf32>
    %cst_82 = arith.constant dense<0.000000e+00> : vector<8xf32>
    %283 = vector.multi_reduction <add>, %282, %cst_82 [1] : vector<8x32xf32> to vector<8xf32>
    %284 = vector.shape_cast %283 : vector<8xf32> to vector<8x1xf32>
    %cst_83 = arith.constant 3.200000e+01 : f32
    %285 = vector.broadcast %cst_83 : f32 to vector<8x1xf32>
    %286 = arith.divf %284, %285 : vector<8x1xf32>
    %cst_84 = arith.constant 9.99999974E-6 : f32
    %287 = vector.broadcast %cst_84 : f32 to vector<8x1xf32>
    %288 = arith.addf %286, %287 : vector<8x1xf32>
    %289 = math.rsqrt %288 : vector<8x1xf32>
    %290 = vector.broadcast %289 : vector<8x1xf32> to vector<8x32xf32>
    %291 = arith.mulf %281, %290 : vector<8x32xf32>
    %292 = vector.broadcast %274 : vector<1x32xf32> to vector<8x32xf32>
    %293 = arith.mulf %291, %292 : vector<8x32xf32>
    %294 = vector.broadcast %275 : vector<1x32xf32> to vector<8x32xf32>
    %295 = arith.addf %293, %294 : vector<8x32xf32>
    %c488 = arith.constant 488 : index
    %c0_85 = arith.constant 0 : index
    %296 = vector.load %arg4[%c488, %c0_85] : memref<1256x128xf32, #tpu.memory_space<vmem>>, vector<32x64xf32>
    %cst_86 = arith.constant dense<0.000000e+00> : vector<8x64xf32>
    %297 = tpu.matmul %295, %296, %cst_86 {dimension_numbers = #tpu.dot_dimension_numbers<[1], [0], [0], [1], [0, 0, 1, 1], [], []>} : vector<8x32xf32>, vector<32x64xf32>, vector<8x64xf32> -> vector<8x64xf32>
    %c520 = arith.constant 520 : index
    %c0_87 = arith.constant 0 : index
    %298 = vector.load %arg4[%c520, %c0_87] : memref<1256x128xf32, #tpu.memory_space<vmem>>, vector<1x64xf32>
    %299 = vector.broadcast %298 : vector<1x64xf32> to vector<8x64xf32>
    %300 = arith.addf %297, %299 : vector<8x64xf32>
    %301 = arith.mulf %300, %300 : vector<8x64xf32>
    %302 = arith.mulf %300, %301 : vector<8x64xf32>
    %cst_88 = arith.constant 4.471500e-02 : f32
    %303 = vector.broadcast %cst_88 : f32 to vector<8x64xf32>
    %304 = arith.mulf %303, %302 : vector<8x64xf32>
    %305 = arith.addf %300, %304 : vector<8x64xf32>
    %cst_89 = arith.constant 0.797884583 : f32
    %306 = vector.broadcast %cst_89 : f32 to vector<8x64xf32>
    %307 = arith.mulf %306, %305 : vector<8x64xf32>
    %308 = math.tanh %307 : vector<8x64xf32>
    %cst_90 = arith.constant 1.000000e+00 : f32
    %309 = vector.broadcast %cst_90 : f32 to vector<8x64xf32>
    %310 = arith.addf %309, %308 : vector<8x64xf32>
    %cst_91 = arith.constant 5.000000e-01 : f32
    %311 = vector.broadcast %cst_91 : f32 to vector<8x64xf32>
    %312 = arith.mulf %311, %310 : vector<8x64xf32>
    %313 = arith.mulf %300, %312 : vector<8x64xf32>
    %c528 = arith.constant 528 : index
    %c0_92 = arith.constant 0 : index
    %314 = vector.load %arg4[%c528, %c0_92] : memref<1256x128xf32, #tpu.memory_space<vmem>>, vector<64x32xf32>
    %cst_93 = arith.constant dense<0.000000e+00> : vector<8x32xf32>
    %315 = tpu.matmul %313, %314, %cst_93 {dimension_numbers = #tpu.dot_dimension_numbers<[1], [0], [0], [1], [0, 0, 1, 1], [], []>} : vector<8x64xf32>, vector<64x32xf32>, vector<8x32xf32> -> vector<8x32xf32>
    %316 = arith.addf %273, %315 : vector<8x32xf32>
    %c592 = arith.constant 592 : index
    %c0_94 = arith.constant 0 : index
    %317 = vector.load %arg4[%c592, %c0_94] : memref<1256x128xf32, #tpu.memory_space<vmem>>, vector<1x32xf32>
    %318 = vector.broadcast %317 : vector<1x32xf32> to vector<8x32xf32>
    %319 = arith.addf %316, %318 : vector<8x32xf32>
    %c600 = arith.constant 600 : index
    %c0_95 = arith.constant 0 : index
    %320 = vector.load %arg4[%c600, %c0_95] : memref<1256x128xf32, #tpu.memory_space<vmem>>, vector<2x32xf32>
    %321 = vector.extract_strided_slice %320 {offsets = [0, 0], sizes = [1, 32], strides = [1, 1]} : vector<2x32xf32> to vector<1x32xf32>
    %322 = vector.extract_strided_slice %320 {offsets = [1, 0], sizes = [1, 32], strides = [1, 1]} : vector<2x32xf32> to vector<1x32xf32>
    %cst_96 = arith.constant dense<0.000000e+00> : vector<8xf32>
    %323 = vector.multi_reduction <add>, %319, %cst_96 [1] : vector<8x32xf32> to vector<8xf32>
    %324 = vector.shape_cast %323 : vector<8xf32> to vector<8x1xf32>
    %cst_97 = arith.constant 3.200000e+01 : f32
    %325 = vector.broadcast %cst_97 : f32 to vector<8x1xf32>
    %326 = arith.divf %324, %325 : vector<8x1xf32>
    %327 = vector.broadcast %326 : vector<8x1xf32> to vector<8x32xf32>
    %328 = arith.subf %319, %327 : vector<8x32xf32>
    %329 = arith.mulf %328, %328 : vector<8x32xf32>
    %cst_98 = arith.constant dense<0.000000e+00> : vector<8xf32>
    %330 = vector.multi_reduction <add>, %329, %cst_98 [1] : vector<8x32xf32> to vector<8xf32>
    %331 = vector.shape_cast %330 : vector<8xf32> to vector<8x1xf32>
    %cst_99 = arith.constant 3.200000e+01 : f32
    %332 = vector.broadcast %cst_99 : f32 to vector<8x1xf32>
    %333 = arith.divf %331, %332 : vector<8x1xf32>
    %cst_100 = arith.constant 9.99999974E-6 : f32
    %334 = vector.broadcast %cst_100 : f32 to vector<8x1xf32>
    %335 = arith.addf %333, %334 : vector<8x1xf32>
    %336 = math.rsqrt %335 : vector<8x1xf32>
    %337 = vector.broadcast %336 : vector<8x1xf32> to vector<8x32xf32>
    %338 = arith.mulf %328, %337 : vector<8x32xf32>
    %339 = vector.broadcast %321 : vector<1x32xf32> to vector<8x32xf32>
    %340 = arith.mulf %338, %339 : vector<8x32xf32>
    %341 = vector.broadcast %322 : vector<1x32xf32> to vector<8x32xf32>
    %342 = arith.addf %340, %341 : vector<8x32xf32>
    %c616 = arith.constant 616 : index
    %c0_101 = arith.constant 0 : index
    %343 = vector.load %arg4[%c616, %c0_101] : memref<1256x128xf32, #tpu.memory_space<vmem>>, vector<32x128xf32>
    %cst_102 = arith.constant dense<0.000000e+00> : vector<8x128xf32>
    %344 = tpu.matmul %342, %343, %cst_102 {dimension_numbers = #tpu.dot_dimension_numbers<[1], [0], [0], [1], [0, 0, 1, 1], [], []>} : vector<8x32xf32>, vector<32x128xf32>, vector<8x128xf32> -> vector<8x128xf32>
    %c648 = arith.constant 648 : index
    %c0_103 = arith.constant 0 : index
    %345 = vector.load %arg4[%c648, %c0_103] : memref<1256x128xf32, #tpu.memory_space<vmem>>, vector<1x128xf32>
    %346 = vector.broadcast %345 : vector<1x128xf32> to vector<8x128xf32>
    %347 = arith.addf %344, %346 : vector<8x128xf32>
    %c608 = arith.constant 608 : index
    %c0_104 = arith.constant 0 : index
    %348 = vector.load %arg4[%c608, %c0_104] : memref<1256x128xf32, #tpu.memory_space<vmem>>, vector<2x32xf32>
    %c0_105 = arith.constant 0 : index
    %c0_106 = arith.constant 0 : index
    %c0_107 = arith.constant 0 : index
    %349 = vector.load %arg2[%c0_105, %c0_106, %c0_107] : memref<1x8x32xf32, #tpu.memory_space<vmem>>, vector<1x8x32xf32>
    %350 = vector.shape_cast %349 : vector<1x8x32xf32> to vector<8x32xf32>
    %351 = vector.extract_strided_slice %348 {offsets = [0, 0], sizes = [1, 32], strides = [1, 1]} : vector<2x32xf32> to vector<1x32xf32>
    %352 = vector.extract_strided_slice %348 {offsets = [1, 0], sizes = [1, 32], strides = [1, 1]} : vector<2x32xf32> to vector<1x32xf32>
    %cst_108 = arith.constant dense<0.000000e+00> : vector<8xf32>
    %353 = vector.multi_reduction <add>, %350, %cst_108 [1] : vector<8x32xf32> to vector<8xf32>
    %354 = vector.shape_cast %353 : vector<8xf32> to vector<8x1xf32>
    %cst_109 = arith.constant 3.200000e+01 : f32
    %355 = vector.broadcast %cst_109 : f32 to vector<8x1xf32>
    %356 = arith.divf %354, %355 : vector<8x1xf32>
    %357 = vector.broadcast %356 : vector<8x1xf32> to vector<8x32xf32>
    %358 = arith.subf %350, %357 : vector<8x32xf32>
    %359 = arith.mulf %358, %358 : vector<8x32xf32>
    %cst_110 = arith.constant dense<0.000000e+00> : vector<8xf32>
    %360 = vector.multi_reduction <add>, %359, %cst_110 [1] : vector<8x32xf32> to vector<8xf32>
    %361 = vector.shape_cast %360 : vector<8xf32> to vector<8x1xf32>
    %cst_111 = arith.constant 3.200000e+01 : f32
    %362 = vector.broadcast %cst_111 : f32 to vector<8x1xf32>
    %363 = arith.divf %361, %362 : vector<8x1xf32>
    %cst_112 = arith.constant 9.99999974E-6 : f32
    %364 = vector.broadcast %cst_112 : f32 to vector<8x1xf32>
    %365 = arith.addf %363, %364 : vector<8x1xf32>
    %366 = math.rsqrt %365 : vector<8x1xf32>
    %367 = vector.broadcast %366 : vector<8x1xf32> to vector<8x32xf32>
    %368 = arith.mulf %358, %367 : vector<8x32xf32>
    %369 = vector.broadcast %351 : vector<1x32xf32> to vector<8x32xf32>
    %370 = arith.mulf %368, %369 : vector<8x32xf32>
    %371 = vector.broadcast %352 : vector<1x32xf32> to vector<8x32xf32>
    %372 = arith.addf %370, %371 : vector<8x32xf32>
    %373 = tpu.iota {dimensions = array<i32: 0>} : vector<8x8xi32>
    %374 = tpu.iota {dimensions = array<i32: 1>} : vector<8x8xi32>
    %375 = arith.cmpi sge, %373, %374 : vector<8x8xi32>
    %cst_113 = arith.constant 0.000000e+00 : f32
    %cst_114 = arith.constant -1.000000e+09 : f32
    %376 = vector.broadcast %cst_113 : f32 to vector<8x8xf32>
    %377 = vector.broadcast %cst_114 : f32 to vector<8x8xf32>
    %378 = arith.select %375, %376, %377 : vector<8x8xi1>, vector<8x8xf32>
    %c816 = arith.constant 816 : index
    %c0_115 = arith.constant 0 : index
    %379 = vector.load %arg4[%c816, %c0_115] : memref<1256x128xf32, #tpu.memory_space<vmem>>, vector<6x32xf32>
    %c656 = arith.constant 656 : index
    %c0_116 = arith.constant 0 : index
    %380 = vector.load %arg4[%c656, %c0_116] : memref<1256x128xf32, #tpu.memory_space<vmem>>, vector<32x96xf32>
    %cst_117 = arith.constant dense<0.000000e+00> : vector<8x96xf32>
    %381 = tpu.matmul %372, %380, %cst_117 {dimension_numbers = #tpu.dot_dimension_numbers<[1], [0], [0], [1], [0, 0, 1, 1], [], []>} : vector<8x32xf32>, vector<32x96xf32>, vector<8x96xf32> -> vector<8x96xf32>
    %c688 = arith.constant 688 : index
    %c0_118 = arith.constant 0 : index
    %382 = vector.load %arg4[%c688, %c0_118] : memref<1256x128xf32, #tpu.memory_space<vmem>>, vector<1x96xf32>
    %383 = vector.broadcast %382 : vector<1x96xf32> to vector<8x96xf32>
    %384 = arith.addf %381, %383 : vector<8x96xf32>
    %385 = vector.extract_strided_slice %384 {offsets = [0, 0], sizes = [8, 32], strides = [1, 1]} : vector<8x96xf32> to vector<8x32xf32>
    %386 = vector.extract_strided_slice %384 {offsets = [0, 32], sizes = [8, 32], strides = [1, 1]} : vector<8x96xf32> to vector<8x32xf32>
    %387 = vector.extract_strided_slice %384 {offsets = [0, 64], sizes = [8, 32], strides = [1, 1]} : vector<8x96xf32> to vector<8x32xf32>
    %c696 = arith.constant 696 : index
    %c0_119 = arith.constant 0 : index
    %388 = vector.load %arg4[%c696, %c0_119] : memref<1256x128xf32, #tpu.memory_space<vmem>>, vector<32x32xf32>
    %c728 = arith.constant 728 : index
    %c0_120 = arith.constant 0 : index
    %389 = vector.load %arg4[%c728, %c0_120] : memref<1256x128xf32, #tpu.memory_space<vmem>>, vector<1x32xf32>
    %cst_121 = arith.constant 0.353553385 : f32
    %390 = vector.broadcast %cst_121 : f32 to vector<8x32xf32>
    %391 = arith.mulf %385, %390 : vector<8x32xf32>
    %392 = vector.extract_strided_slice %391 {offsets = [0, 0], sizes = [8, 8], strides = [1, 1]} : vector<8x32xf32> to vector<8x8xf32>
    %393 = vector.extract_strided_slice %386 {offsets = [0, 0], sizes = [8, 8], strides = [1, 1]} : vector<8x32xf32> to vector<8x8xf32>
    "tpu.trace_start"() <{level = 10 : i32, message = "qd,kd->qk"}> : () -> ()
    %cst_122 = arith.constant dense<0.000000e+00> : vector<8x8xf32>
    %394 = tpu.matmul %392, %393, %cst_122 {dimension_numbers = #tpu.dot_dimension_numbers<[1], [1], [0], [0], [0, 0, 1, 0], [], []>} : vector<8x8xf32>, vector<8x8xf32>, vector<8x8xf32> -> vector<8x8xf32>
    "tpu.trace_stop"() : () -> ()
    %395 = arith.addf %394, %378 : vector<8x8xf32>
    %cst_123 = arith.constant dense<0xFF800000> : vector<8xf32>
    %396 = vector.multi_reduction <maximumf>, %395, %cst_123 [1] : vector<8x8xf32> to vector<8xf32>
    %397 = vector.shape_cast %396 : vector<8xf32> to vector<8x1xf32>
    %398 = vector.broadcast %397 : vector<8x1xf32> to vector<8x8xf32>
    %399 = arith.subf %395, %398 : vector<8x8xf32>
    %400 = math.exp %399 : vector<8x8xf32>
    %cst_124 = arith.constant dense<0.000000e+00> : vector<8xf32>
    %401 = vector.multi_reduction <add>, %400, %cst_124 [1] : vector<8x8xf32> to vector<8xf32>
    %402 = vector.shape_cast %401 : vector<8xf32> to vector<8x1xf32>
    %403 = tpu.reciprocal %402 {approx = true} : vector<8x1xf32> -> vector<8x1xf32>
    %404 = vector.broadcast %403 : vector<8x1xf32> to vector<8x8xf32>
    %405 = arith.mulf %400, %404 : vector<8x8xf32>
    %406 = vector.extract_strided_slice %387 {offsets = [0, 0], sizes = [8, 8], strides = [1, 1]} : vector<8x32xf32> to vector<8x8xf32>
    %cst_125 = arith.constant dense<0.000000e+00> : vector<8x8xf32>
    %407 = tpu.matmul %405, %406, %cst_125 {dimension_numbers = #tpu.dot_dimension_numbers<[1], [0], [0], [1], [0, 0, 1, 1], [], []>} : vector<8x8xf32>, vector<8x8xf32>, vector<8x8xf32> -> vector<8x8xf32>
    %408 = vector.extract_strided_slice %391 {offsets = [0, 8], sizes = [8, 8], strides = [1, 1]} : vector<8x32xf32> to vector<8x8xf32>
    %409 = vector.extract_strided_slice %386 {offsets = [0, 8], sizes = [8, 8], strides = [1, 1]} : vector<8x32xf32> to vector<8x8xf32>
    "tpu.trace_start"() <{level = 10 : i32, message = "qd,kd->qk"}> : () -> ()
    %cst_126 = arith.constant dense<0.000000e+00> : vector<8x8xf32>
    %410 = tpu.matmul %408, %409, %cst_126 {dimension_numbers = #tpu.dot_dimension_numbers<[1], [1], [0], [0], [0, 0, 1, 0], [], []>} : vector<8x8xf32>, vector<8x8xf32>, vector<8x8xf32> -> vector<8x8xf32>
    "tpu.trace_stop"() : () -> ()
    %411 = arith.addf %410, %378 : vector<8x8xf32>
    %cst_127 = arith.constant dense<0xFF800000> : vector<8xf32>
    %412 = vector.multi_reduction <maximumf>, %411, %cst_127 [1] : vector<8x8xf32> to vector<8xf32>
    %413 = vector.shape_cast %412 : vector<8xf32> to vector<8x1xf32>
    %414 = vector.broadcast %413 : vector<8x1xf32> to vector<8x8xf32>
    %415 = arith.subf %411, %414 : vector<8x8xf32>
    %416 = math.exp %415 : vector<8x8xf32>
    %cst_128 = arith.constant dense<0.000000e+00> : vector<8xf32>
    %417 = vector.multi_reduction <add>, %416, %cst_128 [1] : vector<8x8xf32> to vector<8xf32>
    %418 = vector.shape_cast %417 : vector<8xf32> to vector<8x1xf32>
    %419 = tpu.reciprocal %418 {approx = true} : vector<8x1xf32> -> vector<8x1xf32>
    %420 = vector.broadcast %419 : vector<8x1xf32> to vector<8x8xf32>
    %421 = arith.mulf %416, %420 : vector<8x8xf32>
    %422 = vector.extract_strided_slice %387 {offsets = [0, 8], sizes = [8, 8], strides = [1, 1]} : vector<8x32xf32> to vector<8x8xf32>
    %cst_129 = arith.constant dense<0.000000e+00> : vector<8x8xf32>
    %423 = tpu.matmul %421, %422, %cst_129 {dimension_numbers = #tpu.dot_dimension_numbers<[1], [0], [0], [1], [0, 0, 1, 1], [], []>} : vector<8x8xf32>, vector<8x8xf32>, vector<8x8xf32> -> vector<8x8xf32>
    %424 = vector.extract_strided_slice %391 {offsets = [0, 16], sizes = [8, 8], strides = [1, 1]} : vector<8x32xf32> to vector<8x8xf32>
    %425 = vector.extract_strided_slice %386 {offsets = [0, 16], sizes = [8, 8], strides = [1, 1]} : vector<8x32xf32> to vector<8x8xf32>
    "tpu.trace_start"() <{level = 10 : i32, message = "qd,kd->qk"}> : () -> ()
    %cst_130 = arith.constant dense<0.000000e+00> : vector<8x8xf32>
    %426 = tpu.matmul %424, %425, %cst_130 {dimension_numbers = #tpu.dot_dimension_numbers<[1], [1], [0], [0], [0, 0, 1, 0], [], []>} : vector<8x8xf32>, vector<8x8xf32>, vector<8x8xf32> -> vector<8x8xf32>
    "tpu.trace_stop"() : () -> ()
    %427 = arith.addf %426, %378 : vector<8x8xf32>
    %cst_131 = arith.constant dense<0xFF800000> : vector<8xf32>
    %428 = vector.multi_reduction <maximumf>, %427, %cst_131 [1] : vector<8x8xf32> to vector<8xf32>
    %429 = vector.shape_cast %428 : vector<8xf32> to vector<8x1xf32>
    %430 = vector.broadcast %429 : vector<8x1xf32> to vector<8x8xf32>
    %431 = arith.subf %427, %430 : vector<8x8xf32>
    %432 = math.exp %431 : vector<8x8xf32>
    %cst_132 = arith.constant dense<0.000000e+00> : vector<8xf32>
    %433 = vector.multi_reduction <add>, %432, %cst_132 [1] : vector<8x8xf32> to vector<8xf32>
    %434 = vector.shape_cast %433 : vector<8xf32> to vector<8x1xf32>
    %435 = tpu.reciprocal %434 {approx = true} : vector<8x1xf32> -> vector<8x1xf32>
    %436 = vector.broadcast %435 : vector<8x1xf32> to vector<8x8xf32>
    %437 = arith.mulf %432, %436 : vector<8x8xf32>
    %438 = vector.extract_strided_slice %387 {offsets = [0, 16], sizes = [8, 8], strides = [1, 1]} : vector<8x32xf32> to vector<8x8xf32>
    %cst_133 = arith.constant dense<0.000000e+00> : vector<8x8xf32>
    %439 = tpu.matmul %437, %438, %cst_133 {dimension_numbers = #tpu.dot_dimension_numbers<[1], [0], [0], [1], [0, 0, 1, 1], [], []>} : vector<8x8xf32>, vector<8x8xf32>, vector<8x8xf32> -> vector<8x8xf32>
    %440 = vector.extract_strided_slice %391 {offsets = [0, 24], sizes = [8, 8], strides = [1, 1]} : vector<8x32xf32> to vector<8x8xf32>
    %441 = vector.extract_strided_slice %386 {offsets = [0, 24], sizes = [8, 8], strides = [1, 1]} : vector<8x32xf32> to vector<8x8xf32>
    "tpu.trace_start"() <{level = 10 : i32, message = "qd,kd->qk"}> : () -> ()
    %cst_134 = arith.constant dense<0.000000e+00> : vector<8x8xf32>
    %442 = tpu.matmul %440, %441, %cst_134 {dimension_numbers = #tpu.dot_dimension_numbers<[1], [1], [0], [0], [0, 0, 1, 0], [], []>} : vector<8x8xf32>, vector<8x8xf32>, vector<8x8xf32> -> vector<8x8xf32>
    "tpu.trace_stop"() : () -> ()
    %443 = arith.addf %442, %378 : vector<8x8xf32>
    %cst_135 = arith.constant dense<0xFF800000> : vector<8xf32>
    %444 = vector.multi_reduction <maximumf>, %443, %cst_135 [1] : vector<8x8xf32> to vector<8xf32>
    %445 = vector.shape_cast %444 : vector<8xf32> to vector<8x1xf32>
    %446 = vector.broadcast %445 : vector<8x1xf32> to vector<8x8xf32>
    %447 = arith.subf %443, %446 : vector<8x8xf32>
    %448 = math.exp %447 : vector<8x8xf32>
    %cst_136 = arith.constant dense<0.000000e+00> : vector<8xf32>
    %449 = vector.multi_reduction <add>, %448, %cst_136 [1] : vector<8x8xf32> to vector<8xf32>
    %450 = vector.shape_cast %449 : vector<8xf32> to vector<8x1xf32>
    %451 = tpu.reciprocal %450 {approx = true} : vector<8x1xf32> -> vector<8x1xf32>
    %452 = vector.broadcast %451 : vector<8x1xf32> to vector<8x8xf32>
    %453 = arith.mulf %448, %452 : vector<8x8xf32>
    %454 = vector.extract_strided_slice %387 {offsets = [0, 24], sizes = [8, 8], strides = [1, 1]} : vector<8x32xf32> to vector<8x8xf32>
    %cst_137 = arith.constant dense<0.000000e+00> : vector<8x8xf32>
    %455 = tpu.matmul %453, %454, %cst_137 {dimension_numbers = #tpu.dot_dimension_numbers<[1], [0], [0], [1], [0, 0, 1, 1], [], []>} : vector<8x8xf32>, vector<8x8xf32>, vector<8x8xf32> -> vector<8x8xf32>
    %456 = tpu.concatenate %407, %423, %439, %455 in 1 : vector<8x8xf32>, vector<8x8xf32>, vector<8x8xf32>, vector<8x8xf32> -> vector<8x32xf32>
    %cst_138 = arith.constant dense<0.000000e+00> : vector<8x32xf32>
    %457 = tpu.matmul %456, %388, %cst_138 {dimension_numbers = #tpu.dot_dimension_numbers<[1], [0], [0], [1], [0, 0, 1, 1], [], []>} : vector<8x32xf32>, vector<32x32xf32>, vector<8x32xf32> -> vector<8x32xf32>
    %458 = vector.broadcast %389 : vector<1x32xf32> to vector<8x32xf32>
    %459 = arith.addf %457, %458 : vector<8x32xf32>
    %460 = arith.addf %372, %459 : vector<8x32xf32>
    %461 = vector.extract_strided_slice %379 {offsets = [0, 0], sizes = [1, 32], strides = [1, 1]} : vector<6x32xf32> to vector<1x32xf32>
    %462 = vector.extract_strided_slice %379 {offsets = [1, 0], sizes = [1, 32], strides = [1, 1]} : vector<6x32xf32> to vector<1x32xf32>
    %cst_139 = arith.constant dense<0.000000e+00> : vector<8xf32>
    %463 = vector.multi_reduction <add>, %460, %cst_139 [1] : vector<8x32xf32> to vector<8xf32>
    %464 = vector.shape_cast %463 : vector<8xf32> to vector<8x1xf32>
    %cst_140 = arith.constant 3.200000e+01 : f32
    %465 = vector.broadcast %cst_140 : f32 to vector<8x1xf32>
    %466 = arith.divf %464, %465 : vector<8x1xf32>
    %467 = vector.broadcast %466 : vector<8x1xf32> to vector<8x32xf32>
    %468 = arith.subf %460, %467 : vector<8x32xf32>
    %469 = arith.mulf %468, %468 : vector<8x32xf32>
    %cst_141 = arith.constant dense<0.000000e+00> : vector<8xf32>
    %470 = vector.multi_reduction <add>, %469, %cst_141 [1] : vector<8x32xf32> to vector<8xf32>
    %471 = vector.shape_cast %470 : vector<8xf32> to vector<8x1xf32>
    %cst_142 = arith.constant 3.200000e+01 : f32
    %472 = vector.broadcast %cst_142 : f32 to vector<8x1xf32>
    %473 = arith.divf %471, %472 : vector<8x1xf32>
    %cst_143 = arith.constant 9.99999974E-6 : f32
    %474 = vector.broadcast %cst_143 : f32 to vector<8x1xf32>
    %475 = arith.addf %473, %474 : vector<8x1xf32>
    %476 = math.rsqrt %475 : vector<8x1xf32>
    %477 = vector.broadcast %476 : vector<8x1xf32> to vector<8x32xf32>
    %478 = arith.mulf %468, %477 : vector<8x32xf32>
    %479 = vector.broadcast %461 : vector<1x32xf32> to vector<8x32xf32>
    %480 = arith.mulf %478, %479 : vector<8x32xf32>
    %481 = vector.broadcast %462 : vector<1x32xf32> to vector<8x32xf32>
    %482 = arith.addf %480, %481 : vector<8x32xf32>
    %c736 = arith.constant 736 : index
    %c0_144 = arith.constant 0 : index
    %483 = vector.load %arg4[%c736, %c0_144] : memref<1256x128xf32, #tpu.memory_space<vmem>>, vector<32x32xf32>
    %cst_145 = arith.constant dense<0.000000e+00> : vector<8x32xf32>
    %484 = tpu.matmul %482, %483, %cst_145 {dimension_numbers = #tpu.dot_dimension_numbers<[1], [0], [0], [1], [0, 0, 1, 1], [], []>} : vector<8x32xf32>, vector<32x32xf32>, vector<8x32xf32> -> vector<8x32xf32>
    %c768 = arith.constant 768 : index
    %c0_146 = arith.constant 0 : index
    %485 = vector.load %arg4[%c768, %c0_146] : memref<1256x128xf32, #tpu.memory_space<vmem>>, vector<1x32xf32>
    %486 = vector.broadcast %485 : vector<1x32xf32> to vector<8x32xf32>
    %487 = arith.addf %484, %486 : vector<8x32xf32>
    %488 = vector.extract_strided_slice %347 {offsets = [0, 0], sizes = [8, 32], strides = [1, 1]} : vector<8x128xf32> to vector<8x32xf32>
    %489 = vector.extract_strided_slice %347 {offsets = [0, 32], sizes = [8, 32], strides = [1, 1]} : vector<8x128xf32> to vector<8x32xf32>
    %c776 = arith.constant 776 : index
    %c0_147 = arith.constant 0 : index
    %490 = vector.load %arg4[%c776, %c0_147] : memref<1256x128xf32, #tpu.memory_space<vmem>>, vector<32x32xf32>
    %c808 = arith.constant 808 : index
    %c0_148 = arith.constant 0 : index
    %491 = vector.load %arg4[%c808, %c0_148] : memref<1256x128xf32, #tpu.memory_space<vmem>>, vector<1x32xf32>
    %cst_149 = arith.constant 0.353553385 : f32
    %492 = vector.broadcast %cst_149 : f32 to vector<8x32xf32>
    %493 = arith.mulf %487, %492 : vector<8x32xf32>
    %494 = vector.extract_strided_slice %493 {offsets = [0, 0], sizes = [8, 8], strides = [1, 1]} : vector<8x32xf32> to vector<8x8xf32>
    %495 = vector.extract_strided_slice %488 {offsets = [0, 0], sizes = [8, 8], strides = [1, 1]} : vector<8x32xf32> to vector<8x8xf32>
    "tpu.trace_start"() <{level = 10 : i32, message = "qd,kd->qk"}> : () -> ()
    %cst_150 = arith.constant dense<0.000000e+00> : vector<8x8xf32>
    %496 = tpu.matmul %494, %495, %cst_150 {dimension_numbers = #tpu.dot_dimension_numbers<[1], [1], [0], [0], [0, 0, 1, 0], [], []>} : vector<8x8xf32>, vector<8x8xf32>, vector<8x8xf32> -> vector<8x8xf32>
    "tpu.trace_stop"() : () -> ()
    %497 = vector.broadcast %11 : vector<1x8xf32> to vector<8x8xf32>
    %498 = arith.addf %496, %497 : vector<8x8xf32>
    %cst_151 = arith.constant dense<0xFF800000> : vector<8xf32>
    %499 = vector.multi_reduction <maximumf>, %498, %cst_151 [1] : vector<8x8xf32> to vector<8xf32>
    %500 = vector.shape_cast %499 : vector<8xf32> to vector<8x1xf32>
    %501 = vector.broadcast %500 : vector<8x1xf32> to vector<8x8xf32>
    %502 = arith.subf %498, %501 : vector<8x8xf32>
    %503 = math.exp %502 : vector<8x8xf32>
    %cst_152 = arith.constant dense<0.000000e+00> : vector<8xf32>
    %504 = vector.multi_reduction <add>, %503, %cst_152 [1] : vector<8x8xf32> to vector<8xf32>
    %505 = vector.shape_cast %504 : vector<8xf32> to vector<8x1xf32>
    %506 = tpu.reciprocal %505 {approx = true} : vector<8x1xf32> -> vector<8x1xf32>
    %507 = vector.broadcast %506 : vector<8x1xf32> to vector<8x8xf32>
    %508 = arith.mulf %503, %507 : vector<8x8xf32>
    %509 = vector.extract_strided_slice %489 {offsets = [0, 0], sizes = [8, 8], strides = [1, 1]} : vector<8x32xf32> to vector<8x8xf32>
    %cst_153 = arith.constant dense<0.000000e+00> : vector<8x8xf32>
    %510 = tpu.matmul %508, %509, %cst_153 {dimension_numbers = #tpu.dot_dimension_numbers<[1], [0], [0], [1], [0, 0, 1, 1], [], []>} : vector<8x8xf32>, vector<8x8xf32>, vector<8x8xf32> -> vector<8x8xf32>
    %511 = vector.extract_strided_slice %493 {offsets = [0, 8], sizes = [8, 8], strides = [1, 1]} : vector<8x32xf32> to vector<8x8xf32>
    %512 = vector.extract_strided_slice %488 {offsets = [0, 8], sizes = [8, 8], strides = [1, 1]} : vector<8x32xf32> to vector<8x8xf32>
    "tpu.trace_start"() <{level = 10 : i32, message = "qd,kd->qk"}> : () -> ()
    %cst_154 = arith.constant dense<0.000000e+00> : vector<8x8xf32>
    %513 = tpu.matmul %511, %512, %cst_154 {dimension_numbers = #tpu.dot_dimension_numbers<[1], [1], [0], [0], [0, 0, 1, 0], [], []>} : vector<8x8xf32>, vector<8x8xf32>, vector<8x8xf32> -> vector<8x8xf32>
    "tpu.trace_stop"() : () -> ()
    %514 = vector.broadcast %11 : vector<1x8xf32> to vector<8x8xf32>
    %515 = arith.addf %513, %514 : vector<8x8xf32>
    %cst_155 = arith.constant dense<0xFF800000> : vector<8xf32>
    %516 = vector.multi_reduction <maximumf>, %515, %cst_155 [1] : vector<8x8xf32> to vector<8xf32>
    %517 = vector.shape_cast %516 : vector<8xf32> to vector<8x1xf32>
    %518 = vector.broadcast %517 : vector<8x1xf32> to vector<8x8xf32>
    %519 = arith.subf %515, %518 : vector<8x8xf32>
    %520 = math.exp %519 : vector<8x8xf32>
    %cst_156 = arith.constant dense<0.000000e+00> : vector<8xf32>
    %521 = vector.multi_reduction <add>, %520, %cst_156 [1] : vector<8x8xf32> to vector<8xf32>
    %522 = vector.shape_cast %521 : vector<8xf32> to vector<8x1xf32>
    %523 = tpu.reciprocal %522 {approx = true} : vector<8x1xf32> -> vector<8x1xf32>
    %524 = vector.broadcast %523 : vector<8x1xf32> to vector<8x8xf32>
    %525 = arith.mulf %520, %524 : vector<8x8xf32>
    %526 = vector.extract_strided_slice %489 {offsets = [0, 8], sizes = [8, 8], strides = [1, 1]} : vector<8x32xf32> to vector<8x8xf32>
    %cst_157 = arith.constant dense<0.000000e+00> : vector<8x8xf32>
    %527 = tpu.matmul %525, %526, %cst_157 {dimension_numbers = #tpu.dot_dimension_numbers<[1], [0], [0], [1], [0, 0, 1, 1], [], []>} : vector<8x8xf32>, vector<8x8xf32>, vector<8x8xf32> -> vector<8x8xf32>
    %528 = vector.extract_strided_slice %493 {offsets = [0, 16], sizes = [8, 8], strides = [1, 1]} : vector<8x32xf32> to vector<8x8xf32>
    %529 = vector.extract_strided_slice %488 {offsets = [0, 16], sizes = [8, 8], strides = [1, 1]} : vector<8x32xf32> to vector<8x8xf32>
    "tpu.trace_start"() <{level = 10 : i32, message = "qd,kd->qk"}> : () -> ()
    %cst_158 = arith.constant dense<0.000000e+00> : vector<8x8xf32>
    %530 = tpu.matmul %528, %529, %cst_158 {dimension_numbers = #tpu.dot_dimension_numbers<[1], [1], [0], [0], [0, 0, 1, 0], [], []>} : vector<8x8xf32>, vector<8x8xf32>, vector<8x8xf32> -> vector<8x8xf32>
    "tpu.trace_stop"() : () -> ()
    %531 = vector.broadcast %11 : vector<1x8xf32> to vector<8x8xf32>
    %532 = arith.addf %530, %531 : vector<8x8xf32>
    %cst_159 = arith.constant dense<0xFF800000> : vector<8xf32>
    %533 = vector.multi_reduction <maximumf>, %532, %cst_159 [1] : vector<8x8xf32> to vector<8xf32>
    %534 = vector.shape_cast %533 : vector<8xf32> to vector<8x1xf32>
    %535 = vector.broadcast %534 : vector<8x1xf32> to vector<8x8xf32>
    %536 = arith.subf %532, %535 : vector<8x8xf32>
    %537 = math.exp %536 : vector<8x8xf32>
    %cst_160 = arith.constant dense<0.000000e+00> : vector<8xf32>
    %538 = vector.multi_reduction <add>, %537, %cst_160 [1] : vector<8x8xf32> to vector<8xf32>
    %539 = vector.shape_cast %538 : vector<8xf32> to vector<8x1xf32>
    %540 = tpu.reciprocal %539 {approx = true} : vector<8x1xf32> -> vector<8x1xf32>
    %541 = vector.broadcast %540 : vector<8x1xf32> to vector<8x8xf32>
    %542 = arith.mulf %537, %541 : vector<8x8xf32>
    %543 = vector.extract_strided_slice %489 {offsets = [0, 16], sizes = [8, 8], strides = [1, 1]} : vector<8x32xf32> to vector<8x8xf32>
    %cst_161 = arith.constant dense<0.000000e+00> : vector<8x8xf32>
    %544 = tpu.matmul %542, %543, %cst_161 {dimension_numbers = #tpu.dot_dimension_numbers<[1], [0], [0], [1], [0, 0, 1, 1], [], []>} : vector<8x8xf32>, vector<8x8xf32>, vector<8x8xf32> -> vector<8x8xf32>
    %545 = vector.extract_strided_slice %493 {offsets = [0, 24], sizes = [8, 8], strides = [1, 1]} : vector<8x32xf32> to vector<8x8xf32>
    %546 = vector.extract_strided_slice %488 {offsets = [0, 24], sizes = [8, 8], strides = [1, 1]} : vector<8x32xf32> to vector<8x8xf32>
    "tpu.trace_start"() <{level = 10 : i32, message = "qd,kd->qk"}> : () -> ()
    %cst_162 = arith.constant dense<0.000000e+00> : vector<8x8xf32>
    %547 = tpu.matmul %545, %546, %cst_162 {dimension_numbers = #tpu.dot_dimension_numbers<[1], [1], [0], [0], [0, 0, 1, 0], [], []>} : vector<8x8xf32>, vector<8x8xf32>, vector<8x8xf32> -> vector<8x8xf32>
    "tpu.trace_stop"() : () -> ()
    %548 = vector.broadcast %11 : vector<1x8xf32> to vector<8x8xf32>
    %549 = arith.addf %547, %548 : vector<8x8xf32>
    %cst_163 = arith.constant dense<0xFF800000> : vector<8xf32>
    %550 = vector.multi_reduction <maximumf>, %549, %cst_163 [1] : vector<8x8xf32> to vector<8xf32>
    %551 = vector.shape_cast %550 : vector<8xf32> to vector<8x1xf32>
    %552 = vector.broadcast %551 : vector<8x1xf32> to vector<8x8xf32>
    %553 = arith.subf %549, %552 : vector<8x8xf32>
    %554 = math.exp %553 : vector<8x8xf32>
    %cst_164 = arith.constant dense<0.000000e+00> : vector<8xf32>
    %555 = vector.multi_reduction <add>, %554, %cst_164 [1] : vector<8x8xf32> to vector<8xf32>
    %556 = vector.shape_cast %555 : vector<8xf32> to vector<8x1xf32>
    %557 = tpu.reciprocal %556 {approx = true} : vector<8x1xf32> -> vector<8x1xf32>
    %558 = vector.broadcast %557 : vector<8x1xf32> to vector<8x8xf32>
    %559 = arith.mulf %554, %558 : vector<8x8xf32>
    %560 = vector.extract_strided_slice %489 {offsets = [0, 24], sizes = [8, 8], strides = [1, 1]} : vector<8x32xf32> to vector<8x8xf32>
    %cst_165 = arith.constant dense<0.000000e+00> : vector<8x8xf32>
    %561 = tpu.matmul %559, %560, %cst_165 {dimension_numbers = #tpu.dot_dimension_numbers<[1], [0], [0], [1], [0, 0, 1, 1], [], []>} : vector<8x8xf32>, vector<8x8xf32>, vector<8x8xf32> -> vector<8x8xf32>
    %562 = tpu.concatenate %510, %527, %544, %561 in 1 : vector<8x8xf32>, vector<8x8xf32>, vector<8x8xf32>, vector<8x8xf32> -> vector<8x32xf32>
    %cst_166 = arith.constant dense<0.000000e+00> : vector<8x32xf32>
    %563 = tpu.matmul %562, %490, %cst_166 {dimension_numbers = #tpu.dot_dimension_numbers<[1], [0], [0], [1], [0, 0, 1, 1], [], []>} : vector<8x32xf32>, vector<32x32xf32>, vector<8x32xf32> -> vector<8x32xf32>
    %564 = vector.broadcast %491 : vector<1x32xf32> to vector<8x32xf32>
    %565 = arith.addf %563, %564 : vector<8x32xf32>
    %566 = arith.addf %482, %565 : vector<8x32xf32>
    %567 = vector.extract_strided_slice %379 {offsets = [2, 0], sizes = [1, 32], strides = [1, 1]} : vector<6x32xf32> to vector<1x32xf32>
    %568 = vector.extract_strided_slice %379 {offsets = [3, 0], sizes = [1, 32], strides = [1, 1]} : vector<6x32xf32> to vector<1x32xf32>
    %cst_167 = arith.constant dense<0.000000e+00> : vector<8xf32>
    %569 = vector.multi_reduction <add>, %566, %cst_167 [1] : vector<8x32xf32> to vector<8xf32>
    %570 = vector.shape_cast %569 : vector<8xf32> to vector<8x1xf32>
    %cst_168 = arith.constant 3.200000e+01 : f32
    %571 = vector.broadcast %cst_168 : f32 to vector<8x1xf32>
    %572 = arith.divf %570, %571 : vector<8x1xf32>
    %573 = vector.broadcast %572 : vector<8x1xf32> to vector<8x32xf32>
    %574 = arith.subf %566, %573 : vector<8x32xf32>
    %575 = arith.mulf %574, %574 : vector<8x32xf32>
    %cst_169 = arith.constant dense<0.000000e+00> : vector<8xf32>
    %576 = vector.multi_reduction <add>, %575, %cst_169 [1] : vector<8x32xf32> to vector<8xf32>
    %577 = vector.shape_cast %576 : vector<8xf32> to vector<8x1xf32>
    %cst_170 = arith.constant 3.200000e+01 : f32
    %578 = vector.broadcast %cst_170 : f32 to vector<8x1xf32>
    %579 = arith.divf %577, %578 : vector<8x1xf32>
    %cst_171 = arith.constant 9.99999974E-6 : f32
    %580 = vector.broadcast %cst_171 : f32 to vector<8x1xf32>
    %581 = arith.addf %579, %580 : vector<8x1xf32>
    %582 = math.rsqrt %581 : vector<8x1xf32>
    %583 = vector.broadcast %582 : vector<8x1xf32> to vector<8x32xf32>
    %584 = arith.mulf %574, %583 : vector<8x32xf32>
    %585 = vector.broadcast %567 : vector<1x32xf32> to vector<8x32xf32>
    %586 = arith.mulf %584, %585 : vector<8x32xf32>
    %587 = vector.broadcast %568 : vector<1x32xf32> to vector<8x32xf32>
    %588 = arith.addf %586, %587 : vector<8x32xf32>
    %c824 = arith.constant 824 : index
    %c0_172 = arith.constant 0 : index
    %589 = vector.load %arg4[%c824, %c0_172] : memref<1256x128xf32, #tpu.memory_space<vmem>>, vector<32x64xf32>
    %cst_173 = arith.constant dense<0.000000e+00> : vector<8x64xf32>
    %590 = tpu.matmul %588, %589, %cst_173 {dimension_numbers = #tpu.dot_dimension_numbers<[1], [0], [0], [1], [0, 0, 1, 1], [], []>} : vector<8x32xf32>, vector<32x64xf32>, vector<8x64xf32> -> vector<8x64xf32>
    %c856 = arith.constant 856 : index
    %c0_174 = arith.constant 0 : index
    %591 = vector.load %arg4[%c856, %c0_174] : memref<1256x128xf32, #tpu.memory_space<vmem>>, vector<1x64xf32>
    %592 = vector.broadcast %591 : vector<1x64xf32> to vector<8x64xf32>
    %593 = arith.addf %590, %592 : vector<8x64xf32>
    %594 = arith.mulf %593, %593 : vector<8x64xf32>
    %595 = arith.mulf %593, %594 : vector<8x64xf32>
    %cst_175 = arith.constant 4.471500e-02 : f32
    %596 = vector.broadcast %cst_175 : f32 to vector<8x64xf32>
    %597 = arith.mulf %596, %595 : vector<8x64xf32>
    %598 = arith.addf %593, %597 : vector<8x64xf32>
    %cst_176 = arith.constant 0.797884583 : f32
    %599 = vector.broadcast %cst_176 : f32 to vector<8x64xf32>
    %600 = arith.mulf %599, %598 : vector<8x64xf32>
    %601 = math.tanh %600 : vector<8x64xf32>
    %cst_177 = arith.constant 1.000000e+00 : f32
    %602 = vector.broadcast %cst_177 : f32 to vector<8x64xf32>
    %603 = arith.addf %602, %601 : vector<8x64xf32>
    %cst_178 = arith.constant 5.000000e-01 : f32
    %604 = vector.broadcast %cst_178 : f32 to vector<8x64xf32>
    %605 = arith.mulf %604, %603 : vector<8x64xf32>
    %606 = arith.mulf %593, %605 : vector<8x64xf32>
    %c864 = arith.constant 864 : index
    %c0_179 = arith.constant 0 : index
    %607 = vector.load %arg4[%c864, %c0_179] : memref<1256x128xf32, #tpu.memory_space<vmem>>, vector<64x32xf32>
    %cst_180 = arith.constant dense<0.000000e+00> : vector<8x32xf32>
    %608 = tpu.matmul %606, %607, %cst_180 {dimension_numbers = #tpu.dot_dimension_numbers<[1], [0], [0], [1], [0, 0, 1, 1], [], []>} : vector<8x64xf32>, vector<64x32xf32>, vector<8x32xf32> -> vector<8x32xf32>
    %c928 = arith.constant 928 : index
    %c0_181 = arith.constant 0 : index
    %609 = vector.load %arg4[%c928, %c0_181] : memref<1256x128xf32, #tpu.memory_space<vmem>>, vector<1x32xf32>
    %610 = vector.broadcast %609 : vector<1x32xf32> to vector<8x32xf32>
    %611 = arith.addf %608, %610 : vector<8x32xf32>
    %612 = arith.addf %588, %611 : vector<8x32xf32>
    %613 = vector.extract_strided_slice %379 {offsets = [4, 0], sizes = [1, 32], strides = [1, 1]} : vector<6x32xf32> to vector<1x32xf32>
    %614 = vector.extract_strided_slice %379 {offsets = [5, 0], sizes = [1, 32], strides = [1, 1]} : vector<6x32xf32> to vector<1x32xf32>
    %cst_182 = arith.constant dense<0.000000e+00> : vector<8xf32>
    %615 = vector.multi_reduction <add>, %612, %cst_182 [1] : vector<8x32xf32> to vector<8xf32>
    %616 = vector.shape_cast %615 : vector<8xf32> to vector<8x1xf32>
    %cst_183 = arith.constant 3.200000e+01 : f32
    %617 = vector.broadcast %cst_183 : f32 to vector<8x1xf32>
    %618 = arith.divf %616, %617 : vector<8x1xf32>
    %619 = vector.broadcast %618 : vector<8x1xf32> to vector<8x32xf32>
    %620 = arith.subf %612, %619 : vector<8x32xf32>
    %621 = arith.mulf %620, %620 : vector<8x32xf32>
    %cst_184 = arith.constant dense<0.000000e+00> : vector<8xf32>
    %622 = vector.multi_reduction <add>, %621, %cst_184 [1] : vector<8x32xf32> to vector<8xf32>
    %623 = vector.shape_cast %622 : vector<8xf32> to vector<8x1xf32>
    %cst_185 = arith.constant 3.200000e+01 : f32
    %624 = vector.broadcast %cst_185 : f32 to vector<8x1xf32>
    %625 = arith.divf %623, %624 : vector<8x1xf32>
    %cst_186 = arith.constant 9.99999974E-6 : f32
    %626 = vector.broadcast %cst_186 : f32 to vector<8x1xf32>
    %627 = arith.addf %625, %626 : vector<8x1xf32>
    %628 = math.rsqrt %627 : vector<8x1xf32>
    %629 = vector.broadcast %628 : vector<8x1xf32> to vector<8x32xf32>
    %630 = arith.mulf %620, %629 : vector<8x32xf32>
    %631 = vector.broadcast %613 : vector<1x32xf32> to vector<8x32xf32>
    %632 = arith.mulf %630, %631 : vector<8x32xf32>
    %633 = vector.broadcast %614 : vector<1x32xf32> to vector<8x32xf32>
    %634 = arith.addf %632, %633 : vector<8x32xf32>
    %c1096 = arith.constant 1096 : index
    %c0_187 = arith.constant 0 : index
    %635 = vector.load %arg4[%c1096, %c0_187] : memref<1256x128xf32, #tpu.memory_space<vmem>>, vector<6x32xf32>
    %c936 = arith.constant 936 : index
    %c0_188 = arith.constant 0 : index
    %636 = vector.load %arg4[%c936, %c0_188] : memref<1256x128xf32, #tpu.memory_space<vmem>>, vector<32x96xf32>
    %cst_189 = arith.constant dense<0.000000e+00> : vector<8x96xf32>
    %637 = tpu.matmul %634, %636, %cst_189 {dimension_numbers = #tpu.dot_dimension_numbers<[1], [0], [0], [1], [0, 0, 1, 1], [], []>} : vector<8x32xf32>, vector<32x96xf32>, vector<8x96xf32> -> vector<8x96xf32>
    %c968 = arith.constant 968 : index
    %c0_190 = arith.constant 0 : index
    %638 = vector.load %arg4[%c968, %c0_190] : memref<1256x128xf32, #tpu.memory_space<vmem>>, vector<1x96xf32>
    %639 = vector.broadcast %638 : vector<1x96xf32> to vector<8x96xf32>
    %640 = arith.addf %637, %639 : vector<8x96xf32>
    %641 = vector.extract_strided_slice %640 {offsets = [0, 0], sizes = [8, 32], strides = [1, 1]} : vector<8x96xf32> to vector<8x32xf32>
    %642 = vector.extract_strided_slice %640 {offsets = [0, 32], sizes = [8, 32], strides = [1, 1]} : vector<8x96xf32> to vector<8x32xf32>
    %643 = vector.extract_strided_slice %640 {offsets = [0, 64], sizes = [8, 32], strides = [1, 1]} : vector<8x96xf32> to vector<8x32xf32>
    %c976 = arith.constant 976 : index
    %c0_191 = arith.constant 0 : index
    %644 = vector.load %arg4[%c976, %c0_191] : memref<1256x128xf32, #tpu.memory_space<vmem>>, vector<32x32xf32>
    %c1008 = arith.constant 1008 : index
    %c0_192 = arith.constant 0 : index
    %645 = vector.load %arg4[%c1008, %c0_192] : memref<1256x128xf32, #tpu.memory_space<vmem>>, vector<1x32xf32>
    %cst_193 = arith.constant 0.353553385 : f32
    %646 = vector.broadcast %cst_193 : f32 to vector<8x32xf32>
    %647 = arith.mulf %641, %646 : vector<8x32xf32>
    %648 = vector.extract_strided_slice %647 {offsets = [0, 0], sizes = [8, 8], strides = [1, 1]} : vector<8x32xf32> to vector<8x8xf32>
    %649 = vector.extract_strided_slice %642 {offsets = [0, 0], sizes = [8, 8], strides = [1, 1]} : vector<8x32xf32> to vector<8x8xf32>
    "tpu.trace_start"() <{level = 10 : i32, message = "qd,kd->qk"}> : () -> ()
    %cst_194 = arith.constant dense<0.000000e+00> : vector<8x8xf32>
    %650 = tpu.matmul %648, %649, %cst_194 {dimension_numbers = #tpu.dot_dimension_numbers<[1], [1], [0], [0], [0, 0, 1, 0], [], []>} : vector<8x8xf32>, vector<8x8xf32>, vector<8x8xf32> -> vector<8x8xf32>
    "tpu.trace_stop"() : () -> ()
    %651 = arith.addf %650, %378 : vector<8x8xf32>
    %cst_195 = arith.constant dense<0xFF800000> : vector<8xf32>
    %652 = vector.multi_reduction <maximumf>, %651, %cst_195 [1] : vector<8x8xf32> to vector<8xf32>
    %653 = vector.shape_cast %652 : vector<8xf32> to vector<8x1xf32>
    %654 = vector.broadcast %653 : vector<8x1xf32> to vector<8x8xf32>
    %655 = arith.subf %651, %654 : vector<8x8xf32>
    %656 = math.exp %655 : vector<8x8xf32>
    %cst_196 = arith.constant dense<0.000000e+00> : vector<8xf32>
    %657 = vector.multi_reduction <add>, %656, %cst_196 [1] : vector<8x8xf32> to vector<8xf32>
    %658 = vector.shape_cast %657 : vector<8xf32> to vector<8x1xf32>
    %659 = tpu.reciprocal %658 {approx = true} : vector<8x1xf32> -> vector<8x1xf32>
    %660 = vector.broadcast %659 : vector<8x1xf32> to vector<8x8xf32>
    %661 = arith.mulf %656, %660 : vector<8x8xf32>
    %662 = vector.extract_strided_slice %643 {offsets = [0, 0], sizes = [8, 8], strides = [1, 1]} : vector<8x32xf32> to vector<8x8xf32>
    %cst_197 = arith.constant dense<0.000000e+00> : vector<8x8xf32>
    %663 = tpu.matmul %661, %662, %cst_197 {dimension_numbers = #tpu.dot_dimension_numbers<[1], [0], [0], [1], [0, 0, 1, 1], [], []>} : vector<8x8xf32>, vector<8x8xf32>, vector<8x8xf32> -> vector<8x8xf32>
    %664 = vector.extract_strided_slice %647 {offsets = [0, 8], sizes = [8, 8], strides = [1, 1]} : vector<8x32xf32> to vector<8x8xf32>
    %665 = vector.extract_strided_slice %642 {offsets = [0, 8], sizes = [8, 8], strides = [1, 1]} : vector<8x32xf32> to vector<8x8xf32>
    "tpu.trace_start"() <{level = 10 : i32, message = "qd,kd->qk"}> : () -> ()
    %cst_198 = arith.constant dense<0.000000e+00> : vector<8x8xf32>
    %666 = tpu.matmul %664, %665, %cst_198 {dimension_numbers = #tpu.dot_dimension_numbers<[1], [1], [0], [0], [0, 0, 1, 0], [], []>} : vector<8x8xf32>, vector<8x8xf32>, vector<8x8xf32> -> vector<8x8xf32>
    "tpu.trace_stop"() : () -> ()
    %667 = arith.addf %666, %378 : vector<8x8xf32>
    %cst_199 = arith.constant dense<0xFF800000> : vector<8xf32>
    %668 = vector.multi_reduction <maximumf>, %667, %cst_199 [1] : vector<8x8xf32> to vector<8xf32>
    %669 = vector.shape_cast %668 : vector<8xf32> to vector<8x1xf32>
    %670 = vector.broadcast %669 : vector<8x1xf32> to vector<8x8xf32>
    %671 = arith.subf %667, %670 : vector<8x8xf32>
    %672 = math.exp %671 : vector<8x8xf32>
    %cst_200 = arith.constant dense<0.000000e+00> : vector<8xf32>
    %673 = vector.multi_reduction <add>, %672, %cst_200 [1] : vector<8x8xf32> to vector<8xf32>
    %674 = vector.shape_cast %673 : vector<8xf32> to vector<8x1xf32>
    %675 = tpu.reciprocal %674 {approx = true} : vector<8x1xf32> -> vector<8x1xf32>
    %676 = vector.broadcast %675 : vector<8x1xf32> to vector<8x8xf32>
    %677 = arith.mulf %672, %676 : vector<8x8xf32>
    %678 = vector.extract_strided_slice %643 {offsets = [0, 8], sizes = [8, 8], strides = [1, 1]} : vector<8x32xf32> to vector<8x8xf32>
    %cst_201 = arith.constant dense<0.000000e+00> : vector<8x8xf32>
    %679 = tpu.matmul %677, %678, %cst_201 {dimension_numbers = #tpu.dot_dimension_numbers<[1], [0], [0], [1], [0, 0, 1, 1], [], []>} : vector<8x8xf32>, vector<8x8xf32>, vector<8x8xf32> -> vector<8x8xf32>
    %680 = vector.extract_strided_slice %647 {offsets = [0, 16], sizes = [8, 8], strides = [1, 1]} : vector<8x32xf32> to vector<8x8xf32>
    %681 = vector.extract_strided_slice %642 {offsets = [0, 16], sizes = [8, 8], strides = [1, 1]} : vector<8x32xf32> to vector<8x8xf32>
    "tpu.trace_start"() <{level = 10 : i32, message = "qd,kd->qk"}> : () -> ()
    %cst_202 = arith.constant dense<0.000000e+00> : vector<8x8xf32>
    %682 = tpu.matmul %680, %681, %cst_202 {dimension_numbers = #tpu.dot_dimension_numbers<[1], [1], [0], [0], [0, 0, 1, 0], [], []>} : vector<8x8xf32>, vector<8x8xf32>, vector<8x8xf32> -> vector<8x8xf32>
    "tpu.trace_stop"() : () -> ()
    %683 = arith.addf %682, %378 : vector<8x8xf32>
    %cst_203 = arith.constant dense<0xFF800000> : vector<8xf32>
    %684 = vector.multi_reduction <maximumf>, %683, %cst_203 [1] : vector<8x8xf32> to vector<8xf32>
    %685 = vector.shape_cast %684 : vector<8xf32> to vector<8x1xf32>
    %686 = vector.broadcast %685 : vector<8x1xf32> to vector<8x8xf32>
    %687 = arith.subf %683, %686 : vector<8x8xf32>
    %688 = math.exp %687 : vector<8x8xf32>
    %cst_204 = arith.constant dense<0.000000e+00> : vector<8xf32>
    %689 = vector.multi_reduction <add>, %688, %cst_204 [1] : vector<8x8xf32> to vector<8xf32>
    %690 = vector.shape_cast %689 : vector<8xf32> to vector<8x1xf32>
    %691 = tpu.reciprocal %690 {approx = true} : vector<8x1xf32> -> vector<8x1xf32>
    %692 = vector.broadcast %691 : vector<8x1xf32> to vector<8x8xf32>
    %693 = arith.mulf %688, %692 : vector<8x8xf32>
    %694 = vector.extract_strided_slice %643 {offsets = [0, 16], sizes = [8, 8], strides = [1, 1]} : vector<8x32xf32> to vector<8x8xf32>
    %cst_205 = arith.constant dense<0.000000e+00> : vector<8x8xf32>
    %695 = tpu.matmul %693, %694, %cst_205 {dimension_numbers = #tpu.dot_dimension_numbers<[1], [0], [0], [1], [0, 0, 1, 1], [], []>} : vector<8x8xf32>, vector<8x8xf32>, vector<8x8xf32> -> vector<8x8xf32>
    %696 = vector.extract_strided_slice %647 {offsets = [0, 24], sizes = [8, 8], strides = [1, 1]} : vector<8x32xf32> to vector<8x8xf32>
    %697 = vector.extract_strided_slice %642 {offsets = [0, 24], sizes = [8, 8], strides = [1, 1]} : vector<8x32xf32> to vector<8x8xf32>
    "tpu.trace_start"() <{level = 10 : i32, message = "qd,kd->qk"}> : () -> ()
    %cst_206 = arith.constant dense<0.000000e+00> : vector<8x8xf32>
    %698 = tpu.matmul %696, %697, %cst_206 {dimension_numbers = #tpu.dot_dimension_numbers<[1], [1], [0], [0], [0, 0, 1, 0], [], []>} : vector<8x8xf32>, vector<8x8xf32>, vector<8x8xf32> -> vector<8x8xf32>
    "tpu.trace_stop"() : () -> ()
    %699 = arith.addf %698, %378 : vector<8x8xf32>
    %cst_207 = arith.constant dense<0xFF800000> : vector<8xf32>
    %700 = vector.multi_reduction <maximumf>, %699, %cst_207 [1] : vector<8x8xf32> to vector<8xf32>
    %701 = vector.shape_cast %700 : vector<8xf32> to vector<8x1xf32>
    %702 = vector.broadcast %701 : vector<8x1xf32> to vector<8x8xf32>
    %703 = arith.subf %699, %702 : vector<8x8xf32>
    %704 = math.exp %703 : vector<8x8xf32>
    %cst_208 = arith.constant dense<0.000000e+00> : vector<8xf32>
    %705 = vector.multi_reduction <add>, %704, %cst_208 [1] : vector<8x8xf32> to vector<8xf32>
    %706 = vector.shape_cast %705 : vector<8xf32> to vector<8x1xf32>
    %707 = tpu.reciprocal %706 {approx = true} : vector<8x1xf32> -> vector<8x1xf32>
    %708 = vector.broadcast %707 : vector<8x1xf32> to vector<8x8xf32>
    %709 = arith.mulf %704, %708 : vector<8x8xf32>
    %710 = vector.extract_strided_slice %643 {offsets = [0, 24], sizes = [8, 8], strides = [1, 1]} : vector<8x32xf32> to vector<8x8xf32>
    %cst_209 = arith.constant dense<0.000000e+00> : vector<8x8xf32>
    %711 = tpu.matmul %709, %710, %cst_209 {dimension_numbers = #tpu.dot_dimension_numbers<[1], [0], [0], [1], [0, 0, 1, 1], [], []>} : vector<8x8xf32>, vector<8x8xf32>, vector<8x8xf32> -> vector<8x8xf32>
    %712 = tpu.concatenate %663, %679, %695, %711 in 1 : vector<8x8xf32>, vector<8x8xf32>, vector<8x8xf32>, vector<8x8xf32> -> vector<8x32xf32>
    %cst_210 = arith.constant dense<0.000000e+00> : vector<8x32xf32>
    %713 = tpu.matmul %712, %644, %cst_210 {dimension_numbers = #tpu.dot_dimension_numbers<[1], [0], [0], [1], [0, 0, 1, 1], [], []>} : vector<8x32xf32>, vector<32x32xf32>, vector<8x32xf32> -> vector<8x32xf32>
    %714 = vector.broadcast %645 : vector<1x32xf32> to vector<8x32xf32>
    %715 = arith.addf %713, %714 : vector<8x32xf32>
    %716 = arith.addf %634, %715 : vector<8x32xf32>
    %717 = vector.extract_strided_slice %635 {offsets = [0, 0], sizes = [1, 32], strides = [1, 1]} : vector<6x32xf32> to vector<1x32xf32>
    %718 = vector.extract_strided_slice %635 {offsets = [1, 0], sizes = [1, 32], strides = [1, 1]} : vector<6x32xf32> to vector<1x32xf32>
    %cst_211 = arith.constant dense<0.000000e+00> : vector<8xf32>
    %719 = vector.multi_reduction <add>, %716, %cst_211 [1] : vector<8x32xf32> to vector<8xf32>
    %720 = vector.shape_cast %719 : vector<8xf32> to vector<8x1xf32>
    %cst_212 = arith.constant 3.200000e+01 : f32
    %721 = vector.broadcast %cst_212 : f32 to vector<8x1xf32>
    %722 = arith.divf %720, %721 : vector<8x1xf32>
    %723 = vector.broadcast %722 : vector<8x1xf32> to vector<8x32xf32>
    %724 = arith.subf %716, %723 : vector<8x32xf32>
    %725 = arith.mulf %724, %724 : vector<8x32xf32>
    %cst_213 = arith.constant dense<0.000000e+00> : vector<8xf32>
    %726 = vector.multi_reduction <add>, %725, %cst_213 [1] : vector<8x32xf32> to vector<8xf32>
    %727 = vector.shape_cast %726 : vector<8xf32> to vector<8x1xf32>
    %cst_214 = arith.constant 3.200000e+01 : f32
    %728 = vector.broadcast %cst_214 : f32 to vector<8x1xf32>
    %729 = arith.divf %727, %728 : vector<8x1xf32>
    %cst_215 = arith.constant 9.99999974E-6 : f32
    %730 = vector.broadcast %cst_215 : f32 to vector<8x1xf32>
    %731 = arith.addf %729, %730 : vector<8x1xf32>
    %732 = math.rsqrt %731 : vector<8x1xf32>
    %733 = vector.broadcast %732 : vector<8x1xf32> to vector<8x32xf32>
    %734 = arith.mulf %724, %733 : vector<8x32xf32>
    %735 = vector.broadcast %717 : vector<1x32xf32> to vector<8x32xf32>
    %736 = arith.mulf %734, %735 : vector<8x32xf32>
    %737 = vector.broadcast %718 : vector<1x32xf32> to vector<8x32xf32>
    %738 = arith.addf %736, %737 : vector<8x32xf32>
    %c1016 = arith.constant 1016 : index
    %c0_216 = arith.constant 0 : index
    %739 = vector.load %arg4[%c1016, %c0_216] : memref<1256x128xf32, #tpu.memory_space<vmem>>, vector<32x32xf32>
    %cst_217 = arith.constant dense<0.000000e+00> : vector<8x32xf32>
    %740 = tpu.matmul %738, %739, %cst_217 {dimension_numbers = #tpu.dot_dimension_numbers<[1], [0], [0], [1], [0, 0, 1, 1], [], []>} : vector<8x32xf32>, vector<32x32xf32>, vector<8x32xf32> -> vector<8x32xf32>
    %c1048 = arith.constant 1048 : index
    %c0_218 = arith.constant 0 : index
    %741 = vector.load %arg4[%c1048, %c0_218] : memref<1256x128xf32, #tpu.memory_space<vmem>>, vector<1x32xf32>
    %742 = vector.broadcast %741 : vector<1x32xf32> to vector<8x32xf32>
    %743 = arith.addf %740, %742 : vector<8x32xf32>
    %744 = vector.extract_strided_slice %347 {offsets = [0, 64], sizes = [8, 32], strides = [1, 1]} : vector<8x128xf32> to vector<8x32xf32>
    %745 = vector.extract_strided_slice %347 {offsets = [0, 96], sizes = [8, 32], strides = [1, 1]} : vector<8x128xf32> to vector<8x32xf32>
    %c1056 = arith.constant 1056 : index
    %c0_219 = arith.constant 0 : index
    %746 = vector.load %arg4[%c1056, %c0_219] : memref<1256x128xf32, #tpu.memory_space<vmem>>, vector<32x32xf32>
    %c1088 = arith.constant 1088 : index
    %c0_220 = arith.constant 0 : index
    %747 = vector.load %arg4[%c1088, %c0_220] : memref<1256x128xf32, #tpu.memory_space<vmem>>, vector<1x32xf32>
    %cst_221 = arith.constant 0.353553385 : f32
    %748 = vector.broadcast %cst_221 : f32 to vector<8x32xf32>
    %749 = arith.mulf %743, %748 : vector<8x32xf32>
    %750 = vector.extract_strided_slice %749 {offsets = [0, 0], sizes = [8, 8], strides = [1, 1]} : vector<8x32xf32> to vector<8x8xf32>
    %751 = vector.extract_strided_slice %744 {offsets = [0, 0], sizes = [8, 8], strides = [1, 1]} : vector<8x32xf32> to vector<8x8xf32>
    "tpu.trace_start"() <{level = 10 : i32, message = "qd,kd->qk"}> : () -> ()
    %cst_222 = arith.constant dense<0.000000e+00> : vector<8x8xf32>
    %752 = tpu.matmul %750, %751, %cst_222 {dimension_numbers = #tpu.dot_dimension_numbers<[1], [1], [0], [0], [0, 0, 1, 0], [], []>} : vector<8x8xf32>, vector<8x8xf32>, vector<8x8xf32> -> vector<8x8xf32>
    "tpu.trace_stop"() : () -> ()
    %753 = vector.broadcast %11 : vector<1x8xf32> to vector<8x8xf32>
    %754 = arith.addf %752, %753 : vector<8x8xf32>
    %cst_223 = arith.constant dense<0xFF800000> : vector<8xf32>
    %755 = vector.multi_reduction <maximumf>, %754, %cst_223 [1] : vector<8x8xf32> to vector<8xf32>
    %756 = vector.shape_cast %755 : vector<8xf32> to vector<8x1xf32>
    %757 = vector.broadcast %756 : vector<8x1xf32> to vector<8x8xf32>
    %758 = arith.subf %754, %757 : vector<8x8xf32>
    %759 = math.exp %758 : vector<8x8xf32>
    %cst_224 = arith.constant dense<0.000000e+00> : vector<8xf32>
    %760 = vector.multi_reduction <add>, %759, %cst_224 [1] : vector<8x8xf32> to vector<8xf32>
    %761 = vector.shape_cast %760 : vector<8xf32> to vector<8x1xf32>
    %762 = tpu.reciprocal %761 {approx = true} : vector<8x1xf32> -> vector<8x1xf32>
    %763 = vector.broadcast %762 : vector<8x1xf32> to vector<8x8xf32>
    %764 = arith.mulf %759, %763 : vector<8x8xf32>
    %765 = vector.extract_strided_slice %745 {offsets = [0, 0], sizes = [8, 8], strides = [1, 1]} : vector<8x32xf32> to vector<8x8xf32>
    %cst_225 = arith.constant dense<0.000000e+00> : vector<8x8xf32>
    %766 = tpu.matmul %764, %765, %cst_225 {dimension_numbers = #tpu.dot_dimension_numbers<[1], [0], [0], [1], [0, 0, 1, 1], [], []>} : vector<8x8xf32>, vector<8x8xf32>, vector<8x8xf32> -> vector<8x8xf32>
    %767 = vector.extract_strided_slice %749 {offsets = [0, 8], sizes = [8, 8], strides = [1, 1]} : vector<8x32xf32> to vector<8x8xf32>
    %768 = vector.extract_strided_slice %744 {offsets = [0, 8], sizes = [8, 8], strides = [1, 1]} : vector<8x32xf32> to vector<8x8xf32>
    "tpu.trace_start"() <{level = 10 : i32, message = "qd,kd->qk"}> : () -> ()
    %cst_226 = arith.constant dense<0.000000e+00> : vector<8x8xf32>
    %769 = tpu.matmul %767, %768, %cst_226 {dimension_numbers = #tpu.dot_dimension_numbers<[1], [1], [0], [0], [0, 0, 1, 0], [], []>} : vector<8x8xf32>, vector<8x8xf32>, vector<8x8xf32> -> vector<8x8xf32>
    "tpu.trace_stop"() : () -> ()
    %770 = vector.broadcast %11 : vector<1x8xf32> to vector<8x8xf32>
    %771 = arith.addf %769, %770 : vector<8x8xf32>
    %cst_227 = arith.constant dense<0xFF800000> : vector<8xf32>
    %772 = vector.multi_reduction <maximumf>, %771, %cst_227 [1] : vector<8x8xf32> to vector<8xf32>
    %773 = vector.shape_cast %772 : vector<8xf32> to vector<8x1xf32>
    %774 = vector.broadcast %773 : vector<8x1xf32> to vector<8x8xf32>
    %775 = arith.subf %771, %774 : vector<8x8xf32>
    %776 = math.exp %775 : vector<8x8xf32>
    %cst_228 = arith.constant dense<0.000000e+00> : vector<8xf32>
    %777 = vector.multi_reduction <add>, %776, %cst_228 [1] : vector<8x8xf32> to vector<8xf32>
    %778 = vector.shape_cast %777 : vector<8xf32> to vector<8x1xf32>
    %779 = tpu.reciprocal %778 {approx = true} : vector<8x1xf32> -> vector<8x1xf32>
    %780 = vector.broadcast %779 : vector<8x1xf32> to vector<8x8xf32>
    %781 = arith.mulf %776, %780 : vector<8x8xf32>
    %782 = vector.extract_strided_slice %745 {offsets = [0, 8], sizes = [8, 8], strides = [1, 1]} : vector<8x32xf32> to vector<8x8xf32>
    %cst_229 = arith.constant dense<0.000000e+00> : vector<8x8xf32>
    %783 = tpu.matmul %781, %782, %cst_229 {dimension_numbers = #tpu.dot_dimension_numbers<[1], [0], [0], [1], [0, 0, 1, 1], [], []>} : vector<8x8xf32>, vector<8x8xf32>, vector<8x8xf32> -> vector<8x8xf32>
    %784 = vector.extract_strided_slice %749 {offsets = [0, 16], sizes = [8, 8], strides = [1, 1]} : vector<8x32xf32> to vector<8x8xf32>
    %785 = vector.extract_strided_slice %744 {offsets = [0, 16], sizes = [8, 8], strides = [1, 1]} : vector<8x32xf32> to vector<8x8xf32>
    "tpu.trace_start"() <{level = 10 : i32, message = "qd,kd->qk"}> : () -> ()
    %cst_230 = arith.constant dense<0.000000e+00> : vector<8x8xf32>
    %786 = tpu.matmul %784, %785, %cst_230 {dimension_numbers = #tpu.dot_dimension_numbers<[1], [1], [0], [0], [0, 0, 1, 0], [], []>} : vector<8x8xf32>, vector<8x8xf32>, vector<8x8xf32> -> vector<8x8xf32>
    "tpu.trace_stop"() : () -> ()
    %787 = vector.broadcast %11 : vector<1x8xf32> to vector<8x8xf32>
    %788 = arith.addf %786, %787 : vector<8x8xf32>
    %cst_231 = arith.constant dense<0xFF800000> : vector<8xf32>
    %789 = vector.multi_reduction <maximumf>, %788, %cst_231 [1] : vector<8x8xf32> to vector<8xf32>
    %790 = vector.shape_cast %789 : vector<8xf32> to vector<8x1xf32>
    %791 = vector.broadcast %790 : vector<8x1xf32> to vector<8x8xf32>
    %792 = arith.subf %788, %791 : vector<8x8xf32>
    %793 = math.exp %792 : vector<8x8xf32>
    %cst_232 = arith.constant dense<0.000000e+00> : vector<8xf32>
    %794 = vector.multi_reduction <add>, %793, %cst_232 [1] : vector<8x8xf32> to vector<8xf32>
    %795 = vector.shape_cast %794 : vector<8xf32> to vector<8x1xf32>
    %796 = tpu.reciprocal %795 {approx = true} : vector<8x1xf32> -> vector<8x1xf32>
    %797 = vector.broadcast %796 : vector<8x1xf32> to vector<8x8xf32>
    %798 = arith.mulf %793, %797 : vector<8x8xf32>
    %799 = vector.extract_strided_slice %745 {offsets = [0, 16], sizes = [8, 8], strides = [1, 1]} : vector<8x32xf32> to vector<8x8xf32>
    %cst_233 = arith.constant dense<0.000000e+00> : vector<8x8xf32>
    %800 = tpu.matmul %798, %799, %cst_233 {dimension_numbers = #tpu.dot_dimension_numbers<[1], [0], [0], [1], [0, 0, 1, 1], [], []>} : vector<8x8xf32>, vector<8x8xf32>, vector<8x8xf32> -> vector<8x8xf32>
    %801 = vector.extract_strided_slice %749 {offsets = [0, 24], sizes = [8, 8], strides = [1, 1]} : vector<8x32xf32> to vector<8x8xf32>
    %802 = vector.extract_strided_slice %744 {offsets = [0, 24], sizes = [8, 8], strides = [1, 1]} : vector<8x32xf32> to vector<8x8xf32>
    "tpu.trace_start"() <{level = 10 : i32, message = "qd,kd->qk"}> : () -> ()
    %cst_234 = arith.constant dense<0.000000e+00> : vector<8x8xf32>
    %803 = tpu.matmul %801, %802, %cst_234 {dimension_numbers = #tpu.dot_dimension_numbers<[1], [1], [0], [0], [0, 0, 1, 0], [], []>} : vector<8x8xf32>, vector<8x8xf32>, vector<8x8xf32> -> vector<8x8xf32>
    "tpu.trace_stop"() : () -> ()
    %804 = vector.broadcast %11 : vector<1x8xf32> to vector<8x8xf32>
    %805 = arith.addf %803, %804 : vector<8x8xf32>
    %cst_235 = arith.constant dense<0xFF800000> : vector<8xf32>
    %806 = vector.multi_reduction <maximumf>, %805, %cst_235 [1] : vector<8x8xf32> to vector<8xf32>
    %807 = vector.shape_cast %806 : vector<8xf32> to vector<8x1xf32>
    %808 = vector.broadcast %807 : vector<8x1xf32> to vector<8x8xf32>
    %809 = arith.subf %805, %808 : vector<8x8xf32>
    %810 = math.exp %809 : vector<8x8xf32>
    %cst_236 = arith.constant dense<0.000000e+00> : vector<8xf32>
    %811 = vector.multi_reduction <add>, %810, %cst_236 [1] : vector<8x8xf32> to vector<8xf32>
    %812 = vector.shape_cast %811 : vector<8xf32> to vector<8x1xf32>
    %813 = tpu.reciprocal %812 {approx = true} : vector<8x1xf32> -> vector<8x1xf32>
    %814 = vector.broadcast %813 : vector<8x1xf32> to vector<8x8xf32>
    %815 = arith.mulf %810, %814 : vector<8x8xf32>
    %816 = vector.extract_strided_slice %745 {offsets = [0, 24], sizes = [8, 8], strides = [1, 1]} : vector<8x32xf32> to vector<8x8xf32>
    %cst_237 = arith.constant dense<0.000000e+00> : vector<8x8xf32>
    %817 = tpu.matmul %815, %816, %cst_237 {dimension_numbers = #tpu.dot_dimension_numbers<[1], [0], [0], [1], [0, 0, 1, 1], [], []>} : vector<8x8xf32>, vector<8x8xf32>, vector<8x8xf32> -> vector<8x8xf32>
    %818 = tpu.concatenate %766, %783, %800, %817 in 1 : vector<8x8xf32>, vector<8x8xf32>, vector<8x8xf32>, vector<8x8xf32> -> vector<8x32xf32>
    %cst_238 = arith.constant dense<0.000000e+00> : vector<8x32xf32>
    %819 = tpu.matmul %818, %746, %cst_238 {dimension_numbers = #tpu.dot_dimension_numbers<[1], [0], [0], [1], [0, 0, 1, 1], [], []>} : vector<8x32xf32>, vector<32x32xf32>, vector<8x32xf32> -> vector<8x32xf32>
    %820 = vector.broadcast %747 : vector<1x32xf32> to vector<8x32xf32>
    %821 = arith.addf %819, %820 : vector<8x32xf32>
    %822 = arith.addf %738, %821 : vector<8x32xf32>
    %823 = vector.extract_strided_slice %635 {offsets = [2, 0], sizes = [1, 32], strides = [1, 1]} : vector<6x32xf32> to vector<1x32xf32>
    %824 = vector.extract_strided_slice %635 {offsets = [3, 0], sizes = [1, 32], strides = [1, 1]} : vector<6x32xf32> to vector<1x32xf32>
    %cst_239 = arith.constant dense<0.000000e+00> : vector<8xf32>
    %825 = vector.multi_reduction <add>, %822, %cst_239 [1] : vector<8x32xf32> to vector<8xf32>
    %826 = vector.shape_cast %825 : vector<8xf32> to vector<8x1xf32>
    %cst_240 = arith.constant 3.200000e+01 : f32
    %827 = vector.broadcast %cst_240 : f32 to vector<8x1xf32>
    %828 = arith.divf %826, %827 : vector<8x1xf32>
    %829 = vector.broadcast %828 : vector<8x1xf32> to vector<8x32xf32>
    %830 = arith.subf %822, %829 : vector<8x32xf32>
    %831 = arith.mulf %830, %830 : vector<8x32xf32>
    %cst_241 = arith.constant dense<0.000000e+00> : vector<8xf32>
    %832 = vector.multi_reduction <add>, %831, %cst_241 [1] : vector<8x32xf32> to vector<8xf32>
    %833 = vector.shape_cast %832 : vector<8xf32> to vector<8x1xf32>
    %cst_242 = arith.constant 3.200000e+01 : f32
    %834 = vector.broadcast %cst_242 : f32 to vector<8x1xf32>
    %835 = arith.divf %833, %834 : vector<8x1xf32>
    %cst_243 = arith.constant 9.99999974E-6 : f32
    %836 = vector.broadcast %cst_243 : f32 to vector<8x1xf32>
    %837 = arith.addf %835, %836 : vector<8x1xf32>
    %838 = math.rsqrt %837 : vector<8x1xf32>
    %839 = vector.broadcast %838 : vector<8x1xf32> to vector<8x32xf32>
    %840 = arith.mulf %830, %839 : vector<8x32xf32>
    %841 = vector.broadcast %823 : vector<1x32xf32> to vector<8x32xf32>
    %842 = arith.mulf %840, %841 : vector<8x32xf32>
    %843 = vector.broadcast %824 : vector<1x32xf32> to vector<8x32xf32>
    %844 = arith.addf %842, %843 : vector<8x32xf32>
    %c1104 = arith.constant 1104 : index
    %c0_244 = arith.constant 0 : index
    %845 = vector.load %arg4[%c1104, %c0_244] : memref<1256x128xf32, #tpu.memory_space<vmem>>, vector<32x64xf32>
    %cst_245 = arith.constant dense<0.000000e+00> : vector<8x64xf32>
    %846 = tpu.matmul %844, %845, %cst_245 {dimension_numbers = #tpu.dot_dimension_numbers<[1], [0], [0], [1], [0, 0, 1, 1], [], []>} : vector<8x32xf32>, vector<32x64xf32>, vector<8x64xf32> -> vector<8x64xf32>
    %c1136 = arith.constant 1136 : index
    %c0_246 = arith.constant 0 : index
    %847 = vector.load %arg4[%c1136, %c0_246] : memref<1256x128xf32, #tpu.memory_space<vmem>>, vector<1x64xf32>
    %848 = vector.broadcast %847 : vector<1x64xf32> to vector<8x64xf32>
    %849 = arith.addf %846, %848 : vector<8x64xf32>
    %850 = arith.mulf %849, %849 : vector<8x64xf32>
    %851 = arith.mulf %849, %850 : vector<8x64xf32>
    %cst_247 = arith.constant 4.471500e-02 : f32
    %852 = vector.broadcast %cst_247 : f32 to vector<8x64xf32>
    %853 = arith.mulf %852, %851 : vector<8x64xf32>
    %854 = arith.addf %849, %853 : vector<8x64xf32>
    %cst_248 = arith.constant 0.797884583 : f32
    %855 = vector.broadcast %cst_248 : f32 to vector<8x64xf32>
    %856 = arith.mulf %855, %854 : vector<8x64xf32>
    %857 = math.tanh %856 : vector<8x64xf32>
    %cst_249 = arith.constant 1.000000e+00 : f32
    %858 = vector.broadcast %cst_249 : f32 to vector<8x64xf32>
    %859 = arith.addf %858, %857 : vector<8x64xf32>
    %cst_250 = arith.constant 5.000000e-01 : f32
    %860 = vector.broadcast %cst_250 : f32 to vector<8x64xf32>
    %861 = arith.mulf %860, %859 : vector<8x64xf32>
    %862 = arith.mulf %849, %861 : vector<8x64xf32>
    %c1144 = arith.constant 1144 : index
    %c0_251 = arith.constant 0 : index
    %863 = vector.load %arg4[%c1144, %c0_251] : memref<1256x128xf32, #tpu.memory_space<vmem>>, vector<64x32xf32>
    %cst_252 = arith.constant dense<0.000000e+00> : vector<8x32xf32>
    %864 = tpu.matmul %862, %863, %cst_252 {dimension_numbers = #tpu.dot_dimension_numbers<[1], [0], [0], [1], [0, 0, 1, 1], [], []>} : vector<8x64xf32>, vector<64x32xf32>, vector<8x32xf32> -> vector<8x32xf32>
    %c1208 = arith.constant 1208 : index
    %c0_253 = arith.constant 0 : index
    %865 = vector.load %arg4[%c1208, %c0_253] : memref<1256x128xf32, #tpu.memory_space<vmem>>, vector<1x32xf32>
    %866 = vector.broadcast %865 : vector<1x32xf32> to vector<8x32xf32>
    %867 = arith.addf %864, %866 : vector<8x32xf32>
    %868 = arith.addf %844, %867 : vector<8x32xf32>
    %869 = vector.extract_strided_slice %635 {offsets = [4, 0], sizes = [1, 32], strides = [1, 1]} : vector<6x32xf32> to vector<1x32xf32>
    %870 = vector.extract_strided_slice %635 {offsets = [5, 0], sizes = [1, 32], strides = [1, 1]} : vector<6x32xf32> to vector<1x32xf32>
    %cst_254 = arith.constant dense<0.000000e+00> : vector<8xf32>
    %871 = vector.multi_reduction <add>, %868, %cst_254 [1] : vector<8x32xf32> to vector<8xf32>
    %872 = vector.shape_cast %871 : vector<8xf32> to vector<8x1xf32>
    %cst_255 = arith.constant 3.200000e+01 : f32
    %873 = vector.broadcast %cst_255 : f32 to vector<8x1xf32>
    %874 = arith.divf %872, %873 : vector<8x1xf32>
    %875 = vector.broadcast %874 : vector<8x1xf32> to vector<8x32xf32>
    %876 = arith.subf %868, %875 : vector<8x32xf32>
    %877 = arith.mulf %876, %876 : vector<8x32xf32>
    %cst_256 = arith.constant dense<0.000000e+00> : vector<8xf32>
    %878 = vector.multi_reduction <add>, %877, %cst_256 [1] : vector<8x32xf32> to vector<8xf32>
    %879 = vector.shape_cast %878 : vector<8xf32> to vector<8x1xf32>
    %cst_257 = arith.constant 3.200000e+01 : f32
    %880 = vector.broadcast %cst_257 : f32 to vector<8x1xf32>
    %881 = arith.divf %879, %880 : vector<8x1xf32>
    %cst_258 = arith.constant 9.99999974E-6 : f32
    %882 = vector.broadcast %cst_258 : f32 to vector<8x1xf32>
    %883 = arith.addf %881, %882 : vector<8x1xf32>
    %884 = math.rsqrt %883 : vector<8x1xf32>
    %885 = vector.broadcast %884 : vector<8x1xf32> to vector<8x32xf32>
    %886 = arith.mulf %876, %885 : vector<8x32xf32>
    %887 = vector.broadcast %869 : vector<1x32xf32> to vector<8x32xf32>
    %888 = arith.mulf %886, %887 : vector<8x32xf32>
    %889 = vector.broadcast %870 : vector<1x32xf32> to vector<8x32xf32>
    %890 = arith.addf %888, %889 : vector<8x32xf32>
    %c1216 = arith.constant 1216 : index
    %c0_259 = arith.constant 0 : index
    %891 = vector.load %arg4[%c1216, %c0_259] : memref<1256x128xf32, #tpu.memory_space<vmem>>, vector<32x128xf32>
    %cst_260 = arith.constant dense<0.000000e+00> : vector<8x128xf32>
    %892 = tpu.matmul %890, %891, %cst_260 {dimension_numbers = #tpu.dot_dimension_numbers<[1], [0], [0], [1], [0, 0, 1, 1], [], []>} : vector<8x32xf32>, vector<32x128xf32>, vector<8x128xf32> -> vector<8x128xf32>
    %c1248 = arith.constant 1248 : index
    %c0_261 = arith.constant 0 : index
    %893 = vector.load %arg4[%c1248, %c0_261] : memref<1256x128xf32, #tpu.memory_space<vmem>>, vector<1x128xf32>
    %894 = vector.broadcast %893 : vector<1x128xf32> to vector<8x128xf32>
    %895 = arith.addf %892, %894 : vector<8x128xf32>
    %c0_262 = arith.constant 0 : index
    %c0_263 = arith.constant 0 : index
    %c0_264 = arith.constant 0 : index
    %896 = vector.load %arg5[%c0_262, %c0_263, %c0_264] : memref<1x8x128xf32, #tpu.memory_space<vmem>>, vector<1x8x128xf32>
    %897 = vector.shape_cast %896 : vector<1x8x128xf32> to vector<8x128xf32>
    %898 = vector.shape_cast %895 : vector<8x128xf32> to vector<1x8x128xf32>
    tpu.vector_store %arg5[%c0_262, %c0_263, %c0_264], %898 {strides = array<i32>} : memref<1x8x128xf32, #tpu.memory_space<vmem>>, vector<1x8x128xf32>,
    %cst_265 = arith.constant dense<0xFF800000> : vector<8xf32>
    %899 = vector.multi_reduction <maximumf>, %895, %cst_265 [1] : vector<8x128xf32> to vector<8xf32>
    %900 = vector.shape_cast %899 : vector<8xf32> to vector<8x1xf32>
    %901 = vector.broadcast %900 : vector<8x1xf32> to vector<8x128xf32>
    %902 = arith.subf %895, %901 : vector<8x128xf32>
    %903 = math.exp %902 : vector<8x128xf32>
    %cst_266 = arith.constant dense<0.000000e+00> : vector<8xf32>
    %904 = vector.multi_reduction <add>, %903, %cst_266 [1] : vector<8x128xf32> to vector<8xf32>
    %905 = vector.shape_cast %904 : vector<8xf32> to vector<8x1xf32>
    %906 = math.log %905 : vector<8x1xf32>
    %907 = arith.addf %906, %900 : vector<8x1xf32>
    %908 = tpu.iota {dimensions = array<i32: 1>} : vector<8x128xi32>
    %c0_267 = arith.constant 0 : index
    %c0_268 = arith.constant 0 : index
    %c0_269 = arith.constant 0 : index
    %909 = vector.load %arg3[%c0_267, %c0_268, %c0_269] : memref<1x8x1xi32, #tpu.memory_space<vmem>>, vector<1x8x1xi32>
    %910 = vector.shape_cast %909 : vector<1x8x1xi32> to vector<8x1xi32>
    %c-100_i32 = arith.constant -100 : i32
    %911 = vector.broadcast %c-100_i32 : i32 to vector<8x1xi32>
    %912 = arith.cmpi ne, %910, %911 : vector<8x1xi32>
    %c0_i32 = arith.constant 0 : i32
    %913 = vector.broadcast %c0_i32 : i32 to vector<8x1xi32>
    %914 = arith.select %912, %910, %913 : vector<8x1xi1>, vector<8x1xi32>
    %915 = vector.broadcast %914 : vector<8x1xi32> to vector<8x128xi32>
    %916 = arith.cmpi eq, %908, %915 : vector<8x128xi32>
    %cst_270 = arith.constant 0.000000e+00 : f32
    %917 = vector.broadcast %cst_270 : f32 to vector<8x128xf32>
    %918 = arith.select %916, %895, %917 : vector<8x128xi1>, vector<8x128xf32>
    %cst_271 = arith.constant dense<0.000000e+00> : vector<8xf32>
    %919 = vector.multi_reduction <add>, %918, %cst_271 [1] : vector<8x128xf32> to vector<8xf32>
    %920 = vector.shape_cast %919 : vector<8xf32> to vector<8x1xf32>
    %921 = arith.subf %907, %920 : vector<8x1xf32>
    %922 = arith.extui %912 : vector<8x1xi1> to vector<8x1xi32>
    %923 = arith.sitofp %922 : vector<8x1xi32> to vector<8x1xf32>
    %924 = arith.mulf %921, %923 : vector<8x1xf32>
    %cst_272 = arith.constant dense<0.000000e+00> : vector<1xf32>
    %925 = vector.multi_reduction <add>, %924, %cst_272 [0] : vector<8x1xf32> to vector<1xf32>
    %926 = vector.shape_cast %925 : vector<1xf32> to vector<1x1xf32>
    %cst_273 = arith.constant 0.000000e+00 : f32
    %927 = vector.broadcast %cst_273 : f32 to vector<1x128xf32>
    %928 = vector.broadcast %926 : vector<1x1xf32> to vector<1x128xf32>
    %929 = arith.addf %928, %927 : vector<1x128xf32>
    %c0_274 = arith.constant 0 : index
    %c0_275 = arith.constant 0 : index
    %c0_276 = arith.constant 0 : index
    %930 = vector.load %arg6[%c0_274, %c0_275, %c0_276] : memref<1x1x128xf32, #tpu.memory_space<vmem>>, vector<1x1x128xf32>
    %931 = vector.shape_cast %930 : vector<1x1x128xf32> to vector<1x128xf32>
    %932 = vector.shape_cast %929 : vector<1x128xf32> to vector<1x1x128xf32>
    tpu.vector_store %arg6[%c0_274, %c0_275, %c0_276], %932 {strides = array<i32>} : memref<1x1x128xf32, #tpu.memory_space<vmem>>, vector<1x1x128xf32>,
    return
  }
  func.func @transform_0(%arg0: i32) -> (i32, i32, i32) {
    %c0_i32 = arith.constant 0 : i32
    %c0_i32_0 = arith.constant 0 : i32
    %c0_i32_1 = arith.constant 0 : i32
    return %arg0, %c0_i32, %c0_i32_0 : i32, i32, i32
  }
  func.func @transform_1(%arg0: i32) -> (i32, i32, i32) {
    %c0_i32 = arith.constant 0 : i32
    %c0_i32_0 = arith.constant 0 : i32
    %c0_i32_1 = arith.constant 0 : i32
    return %arg0, %c0_i32, %c0_i32_0 : i32, i32, i32
  }
  func.func @transform_2(%arg0: i32) -> (i32, i32, i32) {
    %c0_i32 = arith.constant 0 : i32
    %c0_i32_0 = arith.constant 0 : i32
    %c0_i32_1 = arith.constant 0 : i32
    return %arg0, %c0_i32, %c0_i32_0 : i32, i32, i32
  }
  func.func @transform_3(%arg0: i32) -> (i32, i32) {
    %c0_i32 = arith.constant 0 : i32
    %c0_i32_0 = arith.constant 0 : i32
    %c0_i32_1 = arith.constant 0 : i32
    return %c0_i32, %c0_i32_0 : i32, i32
  }
  func.func @transform_4(%arg0: i32) -> (i32, i32, i32) {
    %c0_i32 = arith.constant 0 : i32
    %c0_i32_0 = arith.constant 0 : i32
    %c0_i32_1 = arith.constant 0 : i32
    return %arg0, %c0_i32, %c0_i32_0 : i32, i32, i32
  }
  func.func @transform_5(%arg0: i32) -> (i32, i32, i32) {
    %c0_i32 = arith.constant 0 : i32
    %c0_i32_0 = arith.constant 0 : i32
    %c0_i32_1 = arith.constant 0 : i32
    return %arg0, %c0_i32, %c0_i32_0 : i32, i32, i32
  }
}

</mosaic_0001>

<bundles_post_ra>
// kernel: safe_trocr_forward.1
= control target key start
LH: loop header
LB: loop body
LE: loop exit
PB: predicated region body
PF: predicated region fallthrough
CT: control target
= control target key end

     0   :  { %s9452_s0 = inlined_call_operand.vmem [shape: f32[2,8,192], index: 0, kind: input, shape index: {}]   ;;  %s9453_s1 = inlined_call_operand.vmem [shape: f32[2,8,32], index: 1, kind: input, shape index: {}]   ;;  %s9454_s2 = inlined_call_operand.vmem [shape: s32[2,8,1], index: 2, kind: input, shape index: {}]   ;;  %s9455_s3 = inlined_call_operand.vmem [shape: f32[1256,128], index: 3, kind: input, shape index: {}]   ;;  %s9456_s4 = inlined_call_operand.hbm [shape: f32[2,8,128], index: 4, kind: output, shape index: {0}]   ;;  %s9457_s5 = inlined_call_operand.vmem [shape: f32[2,1,128], index: 5, kind: output, shape index: {1}]  }
   0x1   :  { %9492 = sst [smem:[#allocation10_spill]] %s9452_s0 }
   0x2   :  { %9493 = sst [smem:[#allocation11_spill]] %s9453_s1 }
   0x3   :  { %11 = vsyncpa [#allocation3], 0 }
   0x4   :  { %13 = vsyncpa [#allocation3 + $0x1], 0  ;;  %s8114_s18 = smov 0   ;;  %s8116_s19 = smov 0  }
   0x5   :  { %s8118_s20 = smov 0   ;;  %s8120_s21 = smov 0  }
   0x6 LB: > { %9494 = sst [smem:[#allocation5_spill]] %s8049_s18  ;;  %s8135_s22 = sadd.s32 4294967295, %s8061_s21   ;;  %s8061_s21 = sphi %s8120_s21, %s9520_s21   ;;  %s8057_s20 = sphi %s8118_s20, %s9522_s20   ;;  %s8053_s19 = sphi %s8116_s19, %s9524_s19   ;;  %s8049_s18 = sphi %s8114_s18, %s9523_s18  }
   0x7   : > { %9495 = sst [smem:[#allocation6_spill]] %s8057_s20  ;;  %s6746_s23 = sadd.s32 4294967294, %s8061_s21  }
   0x8   : > { %s8139_s24 = sadd.s32 1, %s8061_s21   ;;  %s125_s25 = sadd.s32 1, %s8057_s20 }
   0x9   : > { %9496 = sst [smem:[#allocation7_spill]] %s8139_s24  ;;  %s122_s26 = ssub.s32 %s8061_s21, %s8139_s24 }
   0xa   : > { %p135_p0 = scmp.ne.s32.totalorder %s8057_s20, %s8053_s19  ;;  %p123_p1 = scmp.eq.s32.totalorder %s122_s26, 0 }
   0xb   : > { %p136_p2 = scmp.eq.s32.totalorder %s8135_s22, 1  ;;  %p141_p3 = scmp.ne.s32.totalorder %s8053_s19, %s8049_s18 }
   0xc   : > { %p142_p4 = scmp.eq.s32.totalorder %s6746_s23, 1  ;;  %p6749_p7 = scmp.ge.s32.totalorder %s8061_s21, 1 }
   0xd   : > { %s8150_s27 = scalar_select %p123_p1, %s8057_s20, %s125_s25  }
   0xe   : > { %p8152_p5 = por %p136_p2, %p135_p0  ;;  %p8156_p6 = por %p142_p4, %p141_p3 }
   0xf   : > { %9497 = sst [smem:[#allocation8_spill]] %s8150_s27  ;;  %p211_p8 = scmp.lt.s32.totalorder %s8061_s21, 3 }
  0x10   : > { %s9499_s29 = scalar_select %p8156_p6, 1, 0 }
  0x11   : > { %p212_p9 = pnand %p6749_p7, %p211_p8 }
  0x12   : > { %9500 = sst [smem:[#allocation9_spill]] %s9499_s29  ;;  %v268_v0 = vld [vmem:[%s9455_s3] sm:$0xff] (!%p212_p9)  ;;  %v269_v1 = vld [vmem:[%s9455_s3 + $0x8] sm:$0xff] (!%p212_p9)  ;;  %v270_v2 = vld [vmem:[%s9455_s3 + $0x10] sm:$0xff] (!%p212_p9)  ;;  %p250_p10 = scmp.lt.s32.totalorder (!%p212_p9), %s8135_s22, 1  ;;  %v8063_v3 = vmov (!%p212_p9), 0.0|0.0   ;;  %v367_v58 = vlaneseq (!%p212_p9) }
  0x13   : > { %215 = sbr.rel (%p212_p9) target bundleno = 16458 (0x404a), region = 36  ;;  %7614 = vmatprep.subr.bf16.mxu0 (!%p212_p9), %v8063_v3  ;;  %v7615_v4 = vpack.c.bf16 (!%p212_p9), %v269_v1, %v268_v0  ;;  %v271_v5 = vld [vmem:[%s9455_s3 + $0x18] sm:$0xff] (!%p212_p9)  ;;  %7650 = vmatprep.subr.bf16.mxu1 (!%p212_p9), %v8063_v3  ;;  %v272_v7 = vld [vmem:[%s9455_s3 + $0x20] sm:$0xff] (!%p212_p9)  ;;  %v273_v8 = vld [vmem:[%s9455_s3 + $0x28] sm:$0xff] (!%p212_p9)  ;;  %s9501_s0 = sld [smem:[#allocation10_spill]] (!%p212_p9)  ;;  %vm293_vm0 = vcmask (!%p212_p9), 523264  }
  0x14   : > { %v7618_v6 = vpack.c.bf16 (!%p212_p9), %v271_v5, %v270_v2  ;;  %v7621_v9 = vpack.c.bf16 (!%p212_p9), %v273_v8, %v272_v7  ;;  %v274_v10 = vld [vmem:[%s9455_s3 + $0x30] sm:$0xff] (!%p212_p9)  ;;  %v275_v11 = vld [vmem:[%s9455_s3 + $0x38] sm:$0xff] (!%p212_p9)  ;;  %v276_v14 = vld [vmem:[%s9455_s3 + $0x40] sm:$0xff] (!%p212_p9)  ;;  %vm372_vm1 = vcmask (!%p212_p9), 261120   ;;  %vm8064_vm2 = vmmov (!%p212_p9), 0   ;;  %s9468_s14 = smov (!%p212_p9), 64  }
  0x15   : > { %7616 = vmatpush1.bf16.msra.mxu0 (!%p212_p9), %v7615_v4  ;;  %v7624_v13 = vpack.c.bf16 (!%p212_p9), %v275_v11, %v274_v10  ;;  %v277_v15 = vld [vmem:[%s9455_s3 + $0x48] sm:$0xff] (!%p212_p9)  ;;  %v278_v17 = vld [vmem:[%s9455_s3 + $0x50] sm:$0xff] (!%p212_p9)  ;;  %v279_v18 = vld [vmem:[%s9455_s3 + $0x58] sm:$0xff] (!%p212_p9)  ;;  %v8065_v54 = vmov (!%p212_p9), 0.0   ;;  %v8288_v60 = vshrl.u32 (!%p212_p9), %v367_v58, 7  ;;  %s9482_s15 = smov (!%p212_p9), 96  }
  0x16   : > { %7617 = vmatprep.subr.bf16.mxu0 (!%p212_p9), %v8063_v3  ;;  %v7627_v16 = vpack.c.bf16 (!%p212_p9), %v277_v15, %v276_v14  ;;  %v7630_v19 = vpack.c.bf16 (!%p212_p9), %v279_v18, %v278_v17  ;;  %v280_v20 = vld [vmem:[%s9455_s3 + $0x60] sm:$0xff] (!%p212_p9)  ;;  %v281_v21 = vld [vmem:[%s9455_s3 + $0x68] sm:$0xff] (!%p212_p9)  ;;  %v282_v23 = vld [vmem:[%s9455_s3 + $0x70] sm:$0xff] (!%p212_p9)  ;;  %7108 = vmatprep.mubr.msk.f32.mxu1 (!%p212_p9), %vm8064_vm2, %v8065_v54  ;;  %s9484_s16 = smov (!%p212_p9), 88   ;;  %vm488_vm3 = vcmask (!%p212_p9), 64512   ;;  %v8329_v14 = vand.u32 (!%p212_p9), 127, %v367_v58 }
  0x17   : > { %v7633_v22 = vpack.c.bf16 (!%p212_p9), %v281_v21, %v280_v20  ;;  %v283_v24 = vld [vmem:[%s9455_s3 + $0x78] sm:$0xff] (!%p212_p9)  ;;  %v284_v26 = vld [vmem:[%s9455_s3 + $0x80] sm:$0xff] (!%p212_p9)  ;;  %v285_v27 = vld [vmem:[%s9455_s3 + $0x88] sm:$0xff] (!%p212_p9)  ;;  %v8291_v61 = vsub.s32 (!%p212_p9), 0, %v8288_v60  ;;  %v8299_v63 = vsub.s32 (!%p212_p9), 1, %v8288_v60  ;;  %s9462_s17 = smov (!%p212_p9), 56  }
  0x18   : > { %v7636_v25 = vpack.c.bf16 (!%p212_p9), %v283_v24, %v282_v23  ;;  %v7639_v28 = vpack.c.bf16 (!%p212_p9), %v285_v27, %v284_v26  ;;  %v286_v29 = vld [vmem:[%s9455_s3 + $0x90] sm:$0xff] (!%p212_p9)  ;;  %v287_v30 = vld [vmem:[%s9455_s3 + $0x98] sm:$0xff] (!%p212_p9)  ;;  %v288_v32 = vld [vmem:[%s9455_s3 + $0xa0] sm:$0xff] (!%p212_p9)  ;;  %vm369_vm4 = vcmp.lt.s32.totalorder (!%p212_p9), %v8329_v14, 5  ;;  %v8069_v15 = vmov (!%p212_p9), -1e+09  }
  0x19   : > { %7619 = vmatpush1.bf16.msra.mxu0 (!%p212_p9), %v7618_v6  ;;  %v7642_v31 = vpack.c.bf16 (!%p212_p9), %v287_v30, %v286_v29  ;;  %v289_v33 = vld [vmem:[%s9455_s3 + $0xa8] sm:$0xff] (!%p212_p9)  ;;  %v290_v35 = vld [vmem:[%s9455_s3 + $0xb0] sm:$0xff] (!%p212_p9)  ;;  %v291_v36 = vld [vmem:[%s9455_s3 + $0xb8] sm:$0xff] (!%p212_p9)  ;;  %s9480_s25 = smov (!%p212_p9), 112   ;;  %s9466_s26 = smov (!%p212_p9), 48   ;;  %vm1159_vm5 = vcmask (!%p212_p9), 130048   ;;  %vm2643_vm7 = vcmp.ge.s32.totalorder (!%p212_p9), %v8288_v60, %v8329_v14 }
  0x1a   : > { %s8178_s13 = scalar_select %p250_p10, %s8135_s22, 1  ;;  %7620 = vmatprep.subr.bf16.mxu0 %v8063_v3  ;;  %v7645_v34 = vpack.c.bf16 %v289_v33, %v288_v32  ;;  %v7648_v37 = vpack.c.bf16 %v291_v36, %v290_v35  ;;  %v292_v39 = vld [vmem:[%s9455_s3 + $0xc0] sm:$0xff]  ;;  %v397_v49 = vld [vmem:[%s9455_s3 + $0xc8] sm:$0xff]  ;;  %v398_v50 = vld [vmem:[%s9455_s3 + $0xd0] sm:$0xff]  ;;  %vm1161_vm6 = vcmask 195584   ;;  %vm6609_vm10 = vcmask 7168  }
  0x1b   : > { %v399_v51 = vld [vmem:[%s9455_s3 + $0xd8] sm:$0xff]  ;;  %v7651_v52 = vpack.c.bf16 %v398_v50, %v397_v49  ;;  %v400_v53 = vld [vmem:[%s9455_s3 + $0xe0] sm:$0xff]  ;;  %v6756_v7 = vld [vmem:[%s9455_s3 + $0xe8] ss:$0 sm:$0xff]  ;;  %s9472_s6 = smov 72   ;;  %s9476_s7 = smov 104  }
  0x1c   : > { %s6877_s23 = sshll.u32 %s8178_s13, 4  ;;  %v7654_v55 = vpack.c.bf16 %v400_v53, %v399_v51  ;;  %v8296_v62 = vld [vmem:[%s9455_s3 + $0x118] sm:$0xf]  ;;  %s9464_s8 = smov 40  }
  0x1d   : > { %s8191_s30 = scalar_lea.vmem %s9501_s0, %s6877_s23  ;;  %7622 = vmatpush1.bf16.msra.mxu0 %v7621_v9  ;;  %7652 = vmatpush3.bf16.msra.mxu1 %v7651_v52  ;;  %v390_v0 = vrot.slane %v8296_v62, %v8291_v61  ;;  %v395_v4 = vrot.slane %v8296_v62, %v8299_v63  ;;  %s9474_s23 = smov 80  }
  0x1e   : > { %v267_v12 = vld [vmem:[%s8191_s30 + $0x8] sm:$0xff]  ;;  %7623 = vmatprep.subr.bf16.mxu0 %v8063_v3  ;;  %v266_v38 = vld [vmem:[%s8191_s30] sm:$0xff]  ;;  %7653 = vmatprep.subr.bf16.mxu1 %v8063_v3  ;;  %s9478_s30 = smov 120   ;;  %s9460_s9 = smov 8  }
  0x1f   : > { %6755 = vmatprep.mubr.msk.f32.mxu0 %vm293_vm0, %v267_v12  ;;  %s9458_s10 = smov 16   ;;  %s9470_s11 = smov 24  }
  0x20   : > { %s9507_s12 = smov 16   ;;  %s9509_s1 = sld [smem:[#allocation11_spill]] }
  0x21   : > { %7625 = vmatpush1.bf16.msra.mxu0 %v7624_v13  ;;  %7655 = vmatpush3.bf16.msra.mxu1 %v7654_v55  ;;  %s242_s20 = sand.u32 1, %s8053_s19  }
  0x22   : > { %7626 = vmatprep.subr.bf16.mxu0 %v8063_v3  ;;  %7111 = vmatprep.subr.mxu1 %v8065_v54  ;;  %s9387_s24 = sshll.u32 %s242_s20, 3 }
  0x23   : > { %s244_s0 = scalar_lea.vmem [#allocation2], %s9387_s24 }
  0x25   : > { %7628 = vmatpush1.bf16.msra.mxu0 %v7627_v16  ;;  %v8333_v16 = vsel %vm369_vm4, 0.0, %v8069_v15 }
  0x26   : > { %7629 = vmatprep.subr.bf16.mxu0 %v8063_v3 }
  0x29   : > { %7631 = vmatpush1.bf16.msra.mxu0 %v7630_v19 }
  0x2a   : > { %7632 = vmatprep.subr.bf16.mxu0 %v8063_v3 }
  0x2d   : > { %7634 = vmatpush1.bf16.msra.mxu0 %v7633_v22 }
  0x2e   : > { %7635 = vmatprep.subr.bf16.mxu0 %v8063_v3 }
  0x31   : > { %7637 = vmatpush1.bf16.msra.mxu0 %v7636_v25 }
  0x32   : > { %7638 = vmatprep.subr.bf16.mxu0 %v8063_v3 }
  0x35   : > { %7640 = vmatpush1.bf16.msra.mxu0 %v7639_v28 }
  0x36   : > { %7641 = vmatprep.subr.bf16.mxu0 %v8063_v3 }
  0x39   : > { %7643 = vmatpush1.bf16.msra.mxu0 %v7642_v31 }
  0x3a   : > { %7644 = vmatprep.subr.bf16.mxu0 %v8063_v3 }
  0x3d   : > { %7646 = vmatpush1.bf16.msra.mxu0 %v7645_v34 }
  0x3e   : > { %7647 = vmatprep.subr.bf16.mxu0 %v8063_v3 }
  0x41   : > { %7649 = vmatpush1.bf16.msra.mxu0 %v7648_v37 }
  0x42   : > { %7662 = vmatprep.subr.bf16.mxu0 %v8063_v3 }
  0x44   : > { %362 = vmatmul.mubr.f32.vlgmr.msra.gmra.mrb[0].mxu0 %v266_v38 }
  0x45   : > { %7170 = vmatprep.mubr.msk.f32.mxu0 %vm8064_vm2, %v8065_v54 }
 0x117   : > { %v363_v40 = vpop.f32.mrb[0].mxu0 }
 0x118   : > { %v8264_v41 = vadd.f32 %v363_v40, %v292_v39  ;;  %v365_v42 = vpop.f32.mrb[1].mxu0 }
 0x11a   : > { %v373_v43 = vsel %vm372_vm1, %v8264_v41, 0.0 }
 0x11b   : > { %374 = vadd.xlane.f32.xlu0 %v373_v43 }
 0x1a8   : > { %v375_v44 = vpop.xlane.xlu0 %374 }
 0x1a9   : > { %v377_v45 = vmul.f32 0.03125, %v375_v44 }
 0x1ab   : > { %v378_v46 = vsub.f32 %v8264_v41, %v377_v45 }
 0x1ad   : > { %v379_v47 = vmul.f32 %v378_v46, %v378_v46 }
 0x1af   : > { %v380_v48 = vsel %vm372_vm1, %v379_v47, 0.0 }
 0x1b0   : > { %381 = vadd.xlane.f32.xlu0 %v380_v48 }
 0x23d   : > { %v382_v56 = vpop.xlane.xlu0 %381 }
 0x23e   : > { %v383_v57 = vmul.f32 0.03125, %v382_v56 }
 0x240   : > { %v384_v59 = vadd.f32 1e-05, %v383_v57 }
 0x242   : > { %7867 = vrsqrt.f32 %v384_v59 }
 0x24c   : > { %v7868_v1 = vpop.eup %7867 }
 0x24d   : > { %v386_v2 = vmul.f32 %v7868_v1, %v378_v46 }
 0x24f   : > { %v391_v5 = vmul.f32 %v390_v0, %v386_v2 }
 0x251   : > { %v396_v6 = vadd.f32 %v395_v4, %v391_v5 }
 0x253   : > { %7109 = vmatmul.mubr.msk.f32.vlgmr.msra.gmra.mrb[0].mxu1 %vm372_vm1, %v396_v6 }
 0x254   : > { %7113 = vmatprep.mubr.msk.f32.mxu1 %vm8064_vm2, %v8065_v54 }
 0x326   : > { %v475_v8 = vpop.f32.mrb[0].mxu1 }
 0x327   : > { %v8311_v9 = vadd.f32 %v6756_v7, %v475_v8  ;;  %v7110_v10 = vpop.f32.mrb[1].mxu1 }
 0x329   : > { %575 = vrot.lane.b32.xlu0 %v8311_v9, %s9468_s14  ;;  %486 = vrot.lane.b32.xlu1 %v8311_v9, %s9482_s15  ;;  %v8321_v12 = vmul.f32 0.35355338, %v8311_v9  ;;  %s9508_s14 = smov 24  }
 0x32d   : > { %653 = vrot.lane.b32.xlu0 %v8311_v9, %s9484_s16 }
 0x39b   : > { %v487_v11 = vpop.permute.xlu1 %486  ;;  %v576_v13 = vpop.permute.xlu0 %575 }
 0x39c   : > { %7112 = vmatpush3.xpose.msk.msra.mxu1 %vm488_vm3, %v487_v11 }
 0x39d   : > { %7116 = vmatprep.subr.mxu1 %v8065_v54 }
 0x39f   : > { %7114 = vmatmul.mubr.msk.f32.vlgmr.msra.gmra.mrb[2].mxu1 %vm488_vm3, %v8321_v12  ;;  %v654_v26 = vpop.permute.xlu0 %653 }
 0x3a0   : > { %7117 = vmatpush3.msra.mxu1 %v576_v13  ;;  %7118 = vmatprep.mubr.msk.f32.mxu1 %vm8064_vm2, %v8065_v54 }
 0x3a1   : > { %7121 = vmatprep.subr.mxu1 %v8065_v54 }
 0x472   : > { %v560_v17 = vpop.f32.mrb[2].mxu1 }
 0x473   : > { %v561_v18 = vadd.f32 %v560_v17, %v8333_v16  ;;  %v7115_v19 = vpop.f32.mrb[3].mxu1 }
 0x475   : > { %v564_v20 = vsel %vm488_vm3, %v561_v18, -inf }
 0x476   : > { %565 = vmax.xlane.f32.xlu1 %v564_v20 }
 0x503   : > { %v566_v21 = vpop.xlane.xlu1 %565 }
 0x504   : > { %v567_v22 = vsub.f32 %v561_v18, %v566_v21 }
 0x506   : > { %v568_v23 = vmul.f32 1.442695, %v567_v22 }
 0x508   : > { %7869 = vpow2.f32 %v568_v23 }
 0x512   : > { %v7870_v24 = vpop.eup %7869 }
 0x513   : > { %v570_v25 = vsel %vm488_vm3, %v7870_v24, 0.0 }
 0x514   : > { %571 = vadd.xlane.f32.xlu0 %v570_v25 }
 0x52a   : > { %651 = vrot.lane.b32.xlu0 %v8321_v12, %s9478_s30 }
 0x5a1   : > { %v572_v27 = vpop.xlane.xlu0 %571 }
 0x5a2   : > { %7871 = vrcp.f32 %v572_v27  ;;  %v480_v27 = vld [vmem:[%s9455_s3 + $0xf8] sm:$0xff] }
 0x5a5   : > { %v652_v30 = vpop.permute.xlu0 %651 }
 0x5ac   : > { %v7872_v28 = vpop.eup %7871 }
 0x5ad   : > { %v574_v29 = vmul.f32 %v7872_v28, %v7870_v24  ;;  %v481_v28 = vld [vmem:[%s9455_s3 + $0x100] sm:$0xff] }
 0x5af   : > { %7119 = vmatmul.mubr.msk.f32.vlgmr.msra.gmra.mrb[4].mxu1 %vm488_vm3, %v574_v29 }
 0x5b0   : > { %7122 = vmatpush3.xpose.msk.msra.mxu1 %vm488_vm3, %v654_v26  ;;  %7123 = vmatprep.mubr.msk.f32.mxu1 %vm8064_vm2, %v8065_v54  ;;  %v479_v26 = vld [vmem:[%s9455_s3 + $0xf0] sm:$0xff] }
 0x5b1   : > { %7126 = vmatprep.subr.mxu1 %v8065_v54  ;;  %v7657_v29 = vpack.c.bf16 %v480_v27, %v479_v26 }
 0x5b3   : > { %7124 = vmatmul.mubr.msk.f32.vlgmr.msra.gmra.mrb[6].mxu1 %vm488_vm3, %v652_v30  ;;  %v482_v30 = vld [vmem:[%s9455_s3 + $0x108] sm:$0xff] }
 0x5b4   : > { %7128 = vmatprep.mubr.msk.f32.mxu1 %vm8064_vm2, %v8065_v54 }
 0x682   : > { %v8348_v31 = vpop.f32.mrb[4].mxu1 }
 0x683   : > { %v7120_v32 = vpop.f32.mrb[5].mxu1 }
 0x684   : > { %v7660_v32 = vpack.c.bf16 %v482_v30, %v481_v28 }
 0x686   : > { %v725_v33 = vpop.f32.mrb[6].mxu1 }
 0x687   : > { %v726_v34 = vadd.f32 %v725_v33, %v8333_v16  ;;  %v7125_v35 = vpop.f32.mrb[7].mxu1 }
 0x689   : > { %v729_v36 = vsel %vm488_vm3, %v726_v34, -inf }
 0x68a   : > { %730 = vmax.xlane.f32.xlu1 %v729_v36 }
 0x69b   : > { %740 = vrot.lane.b32.xlu1 %v8311_v9, %s9462_s17  ;;  %s9511_s17 = smov 96  }
 0x69f   : > { %818 = vrot.lane.b32.xlu1 %v8311_v9, %s9474_s23 }
 0x6a3   : > { %816 = vrot.lane.b32.xlu1 %v8321_v12, %s9480_s25 }
 0x717   : > { %v731_v37 = vpop.xlane.xlu1 %730 }
 0x718   : > { %v732_v38 = vsub.f32 %v726_v34, %v731_v37 }
 0x71a   : > { %v733_v39 = vmul.f32 1.442695, %v732_v38 }
 0x71b   : > { %v741_v40 = vpop.permute.xlu1 %740 }
 0x71c   : > { %7873 = vpow2.f32 %v733_v39  ;;  %7127 = vmatpush3.msra.mxu1 %v741_v40 }
 0x71d   : > { %7131 = vmatprep.subr.mxu1 %v8065_v54 }
 0x71f   : > { %v819_v46 = vpop.permute.xlu1 %818 }
 0x723   : > { %v817_v48 = vpop.permute.xlu1 %816 }
 0x726   : > { %v7874_v42 = vpop.eup %7873 }
 0x727   : > { %v735_v43 = vsel %vm488_vm3, %v7874_v42, 0.0 }
 0x728   : > { %736 = vadd.xlane.f32.xlu0 %v735_v43 }
 0x73e   : > { %905 = vrot.lane.b32.xlu0 %v8311_v9, %s9466_s26  ;;  %s9503_s26 = smov 48  }
 0x742   : > { %983 = vrot.lane.b32.xlu0 %v8311_v9, %s9472_s6 }
 0x7b5   : > { %v737_v44 = vpop.xlane.xlu0 %736 }
 0x7b6   : > { %7875 = vrcp.f32 %v737_v44 }
 0x7b9   : > { %v906_v49 = vpop.permute.xlu0 %905 }
 0x7bd   : > { %v984_v2 = vpop.permute.xlu0 %983 }
 0x7c0   : > { %v7876_v45 = vpop.eup %7875 }
 0x7c1   : > { %v739_v47 = vmul.f32 %v7876_v45, %v7874_v42  ;;  %v6770_v42 = vld [vmem:[%s9455_s3 + $0x110] ss:$0 sm:$0xff] }
 0x7c3   : > { %7129 = vmatmul.mubr.msk.f32.vlgmr.msra.gmra.mrb[8].mxu1 %vm488_vm3, %v739_v47 }
 0x7c4   : > { %7132 = vmatpush3.xpose.msk.msra.mxu1 %vm488_vm3, %v819_v46  ;;  %7133 = vmatprep.mubr.msk.f32.mxu1 %vm8064_vm2, %v8065_v54 }
 0x7c5   : > { %7136 = vmatprep.subr.mxu1 %v8065_v54 }
 0x7c7   : > { %7134 = vmatmul.mubr.msk.f32.vlgmr.msra.gmra.mrb[10].mxu1 %vm488_vm3, %v817_v48 }
 0x7c8   : > { %7137 = vmatpush3.msra.mxu1 %v906_v49  ;;  %7138 = vmatprep.mubr.msk.f32.mxu1 %vm8064_vm2, %v8065_v54 }
 0x7c9   : > { %7141 = vmatprep.subr.mxu1 %v8065_v54 }
 0x896   : > { %v812_v50 = vpop.f32.mrb[8].mxu1 }
 0x897   : > { %v7130_v51 = vpop.f32.mrb[9].mxu1 }
 0x89a   : > { %v890_v52 = vpop.f32.mrb[10].mxu1 }
 0x89b   : > { %v891_v53 = vadd.f32 %v890_v52, %v8333_v16  ;;  %v7135_v55 = vpop.f32.mrb[11].mxu1  ;;  %v1264_v52 = vld [vmem:[%s9455_s3 + $0x120] sm:$0xff] }
 0x89c   : > { %v1266_v55 = vld [vmem:[%s9455_s3 + $0x130] sm:$0xff] }
 0x89d   : > { %v894_v56 = vsel %vm488_vm3, %v891_v53, -inf }
 0x89e   : > { %895 = vmax.xlane.f32.xlu1 %v894_v56  ;;  %v1267_v56 = vld [vmem:[%s9455_s3 + $0x138] sm:$0xff] }
 0x92b   : > { %v896_v57 = vpop.xlane.xlu1 %895 }
 0x92c   : > { %v897_v58 = vsub.f32 %v891_v53, %v896_v57  ;;  %v7666_v57 = vpack.c.bf16 %v1267_v56, %v1266_v55 }
 0x92e   : > { %v898_v59 = vmul.f32 1.442695, %v897_v58 }
 0x930   : > { %7877 = vpow2.f32 %v898_v59 }
 0x93a   : > { %v7878_v0 = vpop.eup %7877 }
 0x93b   : > { %v900_v1 = vsel %vm488_vm3, %v7878_v0, 0.0 }
 0x93c   : > { %901 = vadd.xlane.f32.xlu0 %v900_v1  ;;  %v8444_v1 = vsub.s32 2, %v8288_v60 }
 0x952   : > { %981 = vrot.lane.b32.xlu0 %v8321_v12, %s9476_s7 }
 0x9c9   : > { %v902_v4 = vpop.xlane.xlu0 %901 }
 0x9ca   : > { %7879 = vrcp.f32 %v902_v4  ;;  %v1257_v4 = vrot.slane %v8296_v62, %v8444_v1 }
 0x9cd   : > { %v982_v7 = vpop.permute.xlu0 %981 }
 0x9d4   : > { %v7880_v5 = vpop.eup %7879 }
 0x9d5   : > { %v904_v6 = vmul.f32 %v7880_v5, %v7878_v0 }
 0x9d7   : > { %7139 = vmatmul.mubr.msk.f32.vlgmr.msra.gmra.mrb[12].mxu1 %vm488_vm3, %v904_v6 }
 0x9d8   : > { %7142 = vmatpush3.xpose.msk.msra.mxu1 %vm488_vm3, %v984_v2  ;;  %7143 = vmatprep.mubr.msk.f32.mxu1 %vm8064_vm2, %v8065_v54  ;;  %v8447_v2 = vsub.s32 3, %v8288_v60 }
 0x9d9   : > { %7146 = vmatprep.subr.mxu1 %v8065_v54 }
 0x9db   : > { %7144 = vmatmul.mubr.msk.f32.vlgmr.msra.gmra.mrb[14].mxu1 %vm488_vm3, %v982_v7  ;;  %v1262_v7 = vrot.slane %v8296_v62, %v8447_v2  ;;  %v1357_v62 = vld [vmem:[%s9455_s3 + $0x158] sm:$0xff] }
 0x9dc   : > { %7148 = vmatprep.mubr.msk.f32.mxu1 %vm8064_vm2, %v8065_v54 }
 0xaaa   : > { %v977_v8 = vpop.f32.mrb[12].mxu1 }
 0xaab   : > { %v7140_v10 = vpop.f32.mrb[13].mxu1 }
 0xaae   : > { %v1055_v11 = vpop.f32.mrb[14].mxu1 }
 0xaaf   : > { %v1056_v12 = vadd.f32 %v1055_v11, %v8333_v16  ;;  %v7145_v13 = vpop.f32.mrb[15].mxu1  ;;  %v1355_v11 = vld [vmem:[%s9455_s3 + $0x148] sm:$0xff] }
 0xab1   : > { %v1059_v17 = vsel %vm488_vm3, %v1056_v12, -inf }
 0xab2   : > { %1060 = vmax.xlane.f32.xlu1 %v1059_v17  ;;  %v1358_v17 = vld [vmem:[%s9455_s3 + $0x160] sm:$0xff] }
 0xac3   : > { %1070 = vrot.lane.b32.xlu1 %v8311_v9, %s9464_s8  ;;  %s9504_s8 = smov 40  }
 0xac7   : > { %1147 = vrot.lane.b32.xlu1 %v812_v50, %s9460_s9  ;;  %s9505_s9 = smov 56  }
 0xacb   : > { %1151 = vrot.lane.b32.xlu1 %v977_v8, %s9458_s10  ;;  %s9506_s10 = smov 8  }
 0xb3f   : > { %v1061_v18 = vpop.xlane.xlu1 %1060 }
 0xb40   : > { %v1062_v19 = vsub.f32 %v1056_v12, %v1061_v18  ;;  %v1356_v12 = vld [vmem:[%s9455_s3 + $0x150] sm:$0xff]  ;;  %v7672_v18 = vpack.c.bf16 %v1358_v17, %v1357_v62 }
 0xb41   : > { %v7669_v13 = vpack.c.bf16 %v1356_v12, %v1355_v11 }
 0xb42   : > { %v1063_v20 = vmul.f32 1.442695, %v1062_v19  ;;  %v1359_v19 = vld [vmem:[%s9455_s3 + $0x168] sm:$0xff] }
 0xb43   : > { %v1071_v21 = vpop.permute.xlu1 %1070 }
 0xb44   : > { %7881 = vpow2.f32 %v1063_v20  ;;  %7147 = vmatpush3.msra.mxu1 %v1071_v21  ;;  %v1360_v20 = vld [vmem:[%s9455_s3 + $0x170] sm:$0xff] }
 0xb45   : > { %7656 = vmatprep.subr.bf16.mxu1 %v8063_v3  ;;  %v7675_v21 = vpack.c.bf16 %v1360_v20, %v1359_v19 }
 0xb47   : > { %v1148_v35 = vpop.permute.xlu1 %1147 }
 0xb48   : > { %v1158_v37 = vsel %vm488_vm3, %v8348_v31, %v1148_v35 }
 0xb4b   : > { %v1152_v36 = vpop.permute.xlu1 %1151 }
 0xb4c   : > { %v1160_v38 = vsel %vm1159_vm5, %v1158_v37, %v1152_v36 }
 0xb4e   : > { %v7882_v22 = vpop.eup %7881 }
 0xb4f   : > { %v1065_v23 = vsel %vm488_vm3, %v7882_v22, 0.0 }
 0xb50   : > { %1066 = vadd.xlane.f32.xlu0 %v1065_v23  ;;  %v1362_v23 = vld [vmem:[%s9455_s3 + $0x180] sm:$0xff] }
 0xbdd   : > { %v1067_v24 = vpop.xlane.xlu0 %1066 }
 0xbde   : > { %7883 = vrcp.f32 %v1067_v24 }
 0xbe8   : > { %v7884_v9 = vpop.eup %7883 }
 0xbe9   : > { %v1069_v25 = vmul.f32 %v7884_v9, %v7882_v22  ;;  %v1361_v22 = vld [vmem:[%s9455_s3 + $0x178] sm:$0xff]  ;;  %v6772_v9 = vld [vmem:[%s9455_s3 + $0x140] ss:$0 sm:$0xff] }
 0xbea   : > { %v7678_v24 = vpack.c.bf16 %v1362_v23, %v1361_v22 }
 0xbeb   : > { %7149 = vmatmul.mubr.msk.f32.vlgmr.msra.gmra.mrb[16].mxu1 %vm488_vm3, %v1069_v25 }
 0xbec   : > { %7159 = vmatprep.mubr.msk.f32.mxu1 %vm8064_vm2, %v8065_v54  ;;  %7658 = vmatpush3.bf16.msra.mxu1 %v7657_v29 }
 0xbed   : > { %7659 = vmatprep.subr.bf16.mxu1 %v8063_v3 }
 0xbf0   : > { %7661 = vmatpush3.bf16.msra.mxu1 %v7660_v32 }
 0xbf1   : > { %7668 = vmatprep.subr.bf16.mxu1 %v8063_v3 }
 0xcbe   : > { %v1142_v33 = vpop.f32.mrb[16].mxu1 }
 0xcbf   : > { %1155 = vrot.lane.b32.xlu1 %v1142_v33, %s9470_s11  ;;  %v7150_v34 = vpop.f32.mrb[17].mxu1  ;;  %s9502_s11 = smov 64  }
 0xd31   : > { %v1156_v39 = vpop.permute.xlu1 %1155 }
 0xd32   : > { %v1162_v40 = vsel %vm1161_vm6, %v1160_v38, %v1156_v39  ;;  %v6775_v39 = vld [vmem:[%s9455_s3 + $0x188] ss:$0 sm:$0xff] }
 0xd33   : > { %7160 = vmatmul.mubr.msk.f32.vlgmr.msra.gmra.mrb[18].mxu1 %vm372_vm1, %v1162_v40 }
 0xd34   : > { %7189 = vmatprep.mubr.msk.f32.mxu1 %vm8064_vm2, %v8065_v54  ;;  %7670 = vmatpush3.bf16.msra.mxu1 %v7669_v13 }
 0xd35   : > { %7671 = vmatprep.subr.bf16.mxu1 %v8063_v3 }
 0xd38   : > { %7673 = vmatpush3.bf16.msra.mxu1 %v7672_v18 }
 0xd39   : > { %7674 = vmatprep.subr.bf16.mxu1 %v8063_v3 }
 0xd3c   : > { %7676 = vmatpush3.bf16.msra.mxu1 %v7675_v21 }
 0xd3d   : > { %7677 = vmatprep.subr.bf16.mxu1 %v8063_v3 }
 0xd40   : > { %7679 = vmatpush3.bf16.msra.mxu1 %v7678_v24 }
 0xd41   : > { %7203 = vmatprep.subr.mxu1 %v8065_v54 }
 0xe06   : > { %v1236_v43 = vpop.f32.mrb[18].mxu1 }
 0xe07   : > { %v1237_v44 = vadd.f32 %v6770_v42, %v1236_v43  ;;  %v7161_v45 = vpop.f32.mrb[19].mxu1 }
 0xe09   : > { %v8423_v46 = vadd.f32 %v1237_v44, %v8264_v41  ;;  %v1265_v41 = vld [vmem:[%s9455_s3 + $0x128] sm:$0xff] }
 0xe0a   : > { %v7663_v53 = vpack.c.bf16 %v1265_v41, %v1264_v52  ;;  %v1469_v52 = vld [vmem:[%s9455_s3 + $0x1a0] sm:$0xff]  ;;  %v1470_v41 = vld [vmem:[%s9455_s3 + $0x1a8] sm:$0xff] }
 0xe0b   : > { %v1241_v31 = vsel %vm372_vm1, %v8423_v46, 0.0 }
 0xe0c   : > { %1242 = vadd.xlane.f32.xlu0 %v1241_v31  ;;  %7664 = vmatpush3.bf16.msra.mxu0 %v7663_v53  ;;  %v7684_v53 = vpack.c.bf16 %v1470_v41, %v1469_v52 }
 0xe0d   : > { %7665 = vmatprep.subr.bf16.mxu0 %v8063_v3 }
 0xe10   : > { %7667 = vmatpush3.bf16.msra.mxu0 %v7666_v57 }
 0xe11   : > { %7680 = vmatprep.subr.bf16.mxu0 %v8063_v3 }
 0xe99   : > { %v1243_v47 = vpop.xlane.xlu0 %1242 }
 0xe9a   : > { %v1244_v48 = vmul.f32 0.03125, %v1243_v47 }
 0xe9c   : > { %v1245_v49 = vsub.f32 %v8423_v46, %v1244_v48 }
 0xe9e   : > { %v1246_v50 = vmul.f32 %v1245_v49, %v1245_v49 }
 0xea0   : > { %v1247_v51 = vsel %vm372_vm1, %v1246_v50, 0.0  ;;  %v1467_v50 = vld [vmem:[%s9455_s3 + $0x190] sm:$0xff] }
 0xea1   : > { %1248 = vadd.xlane.f32.xlu1 %v1247_v51 }
 0xf2e   : > { %v1249_v58 = vpop.xlane.xlu1 %1248 }
 0xf2f   : > { %v1250_v59 = vmul.f32 0.03125, %v1249_v58  ;;  %v8517_v58 = vld [vmem:[%s9455_s3 + $0x1e0] sm:$0xf] }
 0xf31   : > { %v1251_v0 = vadd.f32 1e-05, %v1250_v59  ;;  %v1460_v59 = vrot.slane %v8517_v58, %v8291_v61 }
 0xf33   : > { %7885 = vrsqrt.f32 %v1251_v0 }
 0xf3d   : > { %v7886_v5 = vpop.eup %7885 }
 0xf3e   : > { %v1253_v6 = vmul.f32 %v7886_v5, %v1245_v49  ;;  %v1465_v5 = vrot.slane %v8517_v58, %v8299_v63 }
 0xf40   : > { %v1258_v8 = vmul.f32 %v1257_v4, %v1253_v6 }
 0xf42   : > { %v1263_v10 = vadd.f32 %v1262_v7, %v1258_v8  ;;  %v6776_v8 = vld [vmem:[%s9455_s3 + $0x1b0] ss:$0 sm:$0xff] }
 0xf44   : > { %7171 = vmatmul.mubr.msk.f32.vlgmr.msra.gmra.mrb[2].mxu0 %vm372_vm1, %v1263_v10 }
 0xf45   : > { %7200 = vmatprep.mubr.msk.f32.mxu0 %vm8064_vm2, %v8065_v54 }
0x1017   : > { %v1342_v25 = vpop.f32.mrb[2].mxu0 }
0x1018   : > { %v1343_v26 = vadd.f32 %v6772_v9, %v1342_v25  ;;  %v7172_v27 = vpop.f32.mrb[3].mxu0 }
0x101a   : > { %v1346_v28 = vmul.f32 %v1343_v26, %v1343_v26 }
0x101c   : > { %v1347_v29 = vmul.f32 %v1346_v28, %v1343_v26 }
0x101e   : > { %v1348_v30 = vmul.f32 0.044715, %v1347_v29 }
0x1020   : > { %v1349_v32 = vadd.f32 %v1348_v30, %v1343_v26 }
0x1022   : > { %v1350_v33 = vmul.f32 0.7978846, %v1349_v32 }
0x1024   : > { %7887 = vtanh.f32 %v1350_v33 }
0x102e   : > { %v7888_v34 = vpop.eup %7887 }
0x102f   : > { %v1352_v35 = vadd.f32 1.0, %v7888_v34 }
0x1031   : > { %v1353_v36 = vmul.f32 0.5, %v1352_v35 }
0x1033   : > { %v1354_v37 = vmul.f32 %v1353_v36, %v1343_v26 }
0x1035   : > { %7190 = vmatmul.mubr.msk.f32.vlgmr.msra.gmra.mrb[20].mxu1 %vm293_vm0, %v1354_v37 }
0x1036   : > { %7205 = vmatprep.mubr.msk.f32.mxu1 %vm8064_vm2, %v8065_v54 }
0x1108   : > { %v1432_v38 = vpop.f32.mrb[20].mxu1 }
0x1109   : > { %v1436_v40 = vadd.f32 %v1432_v38, %v8423_v46  ;;  %v7191_v42 = vpop.f32.mrb[21].mxu1  ;;  %v1468_v46 = vld [vmem:[%s9455_s3 + $0x198] sm:$0xff] }
0x110a   : > { %v7681_v51 = vpack.c.bf16 %v1468_v46, %v1467_v50 }
0x110b   : > { %v8494_v43 = vadd.f32 %v6775_v39, %v1436_v40 }
0x110c   : > { %7682 = vmatpush3.bf16.msra.mxu0 %v7681_v51 }
0x110d   : > { %v1444_v44 = vsel %vm372_vm1, %v8494_v43, 0.0  ;;  %7683 = vmatprep.subr.bf16.mxu0 %v8063_v3 }
0x110e   : > { %1445 = vadd.xlane.f32.xlu0 %v1444_v44 }
0x1110   : > { %7685 = vmatpush3.bf16.msra.mxu0 %v7684_v53 }
0x1111   : > { %7213 = vmatprep.subr.mxu0 %v8065_v54 }
0x119b   : > { %v1446_v45 = vpop.xlane.xlu0 %1445 }
0x119c   : > { %v1447_v31 = vmul.f32 0.03125, %v1446_v45 }
0x119e   : > { %v1448_v47 = vsub.f32 %v8494_v43, %v1447_v31 }
0x11a0   : > { %v1449_v48 = vmul.f32 %v1448_v47, %v1448_v47 }
0x11a2   : > { %v1450_v49 = vsel %vm372_vm1, %v1449_v48, 0.0 }
0x11a3   : > { %1451 = vadd.xlane.f32.xlu0 %v1450_v49 }
0x1230   : > { %v1452_v55 = vpop.xlane.xlu0 %1451 }
0x1231   : > { %v1453_v56 = vmul.f32 0.03125, %v1452_v55 }
0x1233   : > { %v1454_v57 = vadd.f32 1e-05, %v1453_v56 }
0x1235   : > { %7889 = vrsqrt.f32 %v1454_v57 }
0x123f   : > { %v7890_v0 = vpop.eup %7889 }
0x1240   : > { %v1456_v4 = vmul.f32 %v7890_v0, %v1448_v47 }
0x1242   : > { %v1461_v6 = vmul.f32 %v1460_v59, %v1456_v4 }
0x1244   : > { %v1466_v7 = vadd.f32 %v1465_v5, %v1461_v6 }
0x1246   : > { %7201 = vmatmul.mubr.msk.f32.vlgmr.msra.gmra.mrb[4].mxu0 %vm372_vm1, %v1466_v7 }
0x1247   : > { %7215 = vmatprep.mubr.msk.f32.mxu0 %vm8064_vm2, %v8065_v54 }
0x1319   : > { %v1545_v10 = vpop.f32.mrb[4].mxu0 }
0x131a   : > { %v8529_v11 = vadd.f32 %v6776_v8, %v1545_v10  ;;  %v7202_v12 = vpop.f32.mrb[5].mxu0 }
0x131c   : > { %1556 = vrot.lane.b32.xlu0 %v8529_v11, %s9482_s15  ;;  %v1554_v13 = vmul.f32 0.35355338, %v8529_v11  ;;  %s9514_s15 = smov 104  }
0x131e   : > { %1720 = vrot.lane.b32.xlu1 %v1554_v13, %s9478_s30  ;;  %s9512_s30 = smov 112  }
0x1320   : > { %1722 = vrot.lane.b32.xlu0 %v8529_v11, %s9484_s16  ;;  %s9515_s16 = smov 80  }
0x1324   : > { %1887 = vrot.lane.b32.xlu0 %v8529_v11, %s9474_s23 }
0x1328   : > { %2052 = vrot.lane.b32.xlu0 %v8529_v11, %s9472_s6  ;;  %s9517_s6 = sshll.u32 %s8178_s13, 3 }
0x132c   : > { %1885 = vrot.lane.b32.xlu0 %v1554_v13, %s9480_s25  ;;  %s9486_s25 = sshll.u32 %s8178_s13, 3 }
0x132d   : > { %s258_s23 = scalar_lea.vmem %s9509_s1, %s9486_s25  ;;  %s9516_s25 = smov 72  }
0x132e   : > { %s6625_s1 = scalar_lea.sflag [#allocation3], %s242_s20 }
0x1330   : > { %2050 = vrot.lane.b32.xlu0 %v1554_v13, %s9476_s7  ;;  %s9510_s7 = smov 88  }
0x138e   : > { %v1557_v62 = vpop.permute.xlu0 %1556 }
0x138f   : > { %7204 = vmatpush3.xpose.msk.msra.mxu1 %vm488_vm3, %v1557_v62 }
0x1390   : > { %7208 = vmatprep.subr.mxu1 %v8065_v54  ;;  %v1721_v18 = vpop.permute.xlu1 %1720 }
0x1392   : > { %v1723_v17 = vpop.permute.xlu0 %1722  ;;  %7206 = vmatmul.mubr.msk.f32.vlgmr.msra.gmra.mrb[22].mxu1 %vm488_vm3, %v1554_v13 }
0x1393   : > { %7214 = vmatpush3.xpose.msk.msra.mxu0 %vm488_vm3, %v1723_v17  ;;  %7210 = vmatprep.mubr.msk.f32.mxu1 %vm8064_vm2, %v8065_v54 }
0x1394   : > { %7223 = vmatprep.subr.mxu0 %v8065_v54 }
0x1396   : > { %v1888_v19 = vpop.permute.xlu0 %1887  ;;  %7216 = vmatmul.mubr.msk.f32.vlgmr.msra.gmra.mrb[6].mxu0 %vm488_vm3, %v1721_v18 }
0x1397   : > { %7224 = vmatpush3.xpose.msk.msra.mxu0 %vm488_vm3, %v1888_v19  ;;  %7225 = vmatprep.mubr.msk.f32.mxu0 %vm8064_vm2, %v8065_v54 }
0x1398   : > { %7233 = vmatprep.subr.mxu0 %v8065_v54 }
0x139a   : > { %v2053_v20 = vpop.permute.xlu0 %2052 }
0x139e   : > { %v1886_v21 = vpop.permute.xlu0 %1885 }
0x139f   : > { %7226 = vmatmul.mubr.msk.f32.vlgmr.msra.gmra.mrb[8].mxu0 %vm488_vm3, %v1886_v21 }
0x13a0   : > { %7234 = vmatpush3.xpose.msk.msra.mxu0 %vm488_vm3, %v2053_v20  ;;  %7235 = vmatprep.mubr.msk.f32.mxu0 %vm8064_vm2, %v8065_v54 }
0x13a1   : > { %7686 = vmatprep.subr.bf16.mxu0 %v8063_v3 }
0x13a2   : > { %v2051_v22 = vpop.permute.xlu0 %2050 }
0x13a3   : > { %7236 = vmatmul.mubr.msk.f32.vlgmr.msra.gmra.mrb[10].mxu0 %vm488_vm3, %v2051_v22 }
0x13a4   : > { %7251 = vmatprep.mubr.msk.f32.mxu0 %vm8064_vm2, %v8065_v54 }
0x1465   : > { %v1629_v23 = vpop.f32.mrb[22].mxu1 }
0x1466   : > { %v1630_v24 = vadd.f32 %v1629_v23, %v8333_v16  ;;  %v7207_v9 = vpop.f32.mrb[23].mxu1  ;;  %v1549_v23 = vld [vmem:[%s9455_s3 + $0x1b8] sm:$0xff] }
0x1468   : > { %v1633_v25 = vsel %vm488_vm3, %v1630_v24, -inf }
0x1469   : > { %v1794_v26 = vpop.f32.mrb[6].mxu0  ;;  %1634 = vmax.xlane.f32.xlu1 %v1633_v25 }
0x146a   : > { %v1795_v27 = vadd.f32 %v1794_v26, %v8333_v16  ;;  %v7217_v28 = vpop.f32.mrb[7].mxu0 }
0x146b   : > { %v1552_v28 = vld [vmem:[%s9455_s3 + $0x1d0] sm:$0xff] }
0x146c   : > { %v1798_v29 = vsel %vm488_vm3, %v1795_v27, -inf }
0x146d   : > { %1799 = vmax.xlane.f32.xlu0 %v1798_v29 }
0x1472   : > { %v1959_v30 = vpop.f32.mrb[8].mxu0 }
0x1473   : > { %v1960_v32 = vadd.f32 %v1959_v30, %v8333_v16  ;;  %v7227_v33 = vpop.f32.mrb[9].mxu0 }
0x1475   : > { %v1963_v34 = vsel %vm488_vm3, %v1960_v32, -inf }
0x1476   : > { %1964 = vmax.xlane.f32.xlu0 %v1963_v34  ;;  %v2124_v35 = vpop.f32.mrb[10].mxu0 }
0x1477   : > { %v2125_v36 = vadd.f32 %v2124_v35, %v8333_v16  ;;  %v7237_v37 = vpop.f32.mrb[11].mxu0 }
0x1479   : > { %v2128_v38 = vsel %vm488_vm3, %v2125_v36, -inf }
0x147a   : > { %2129 = vmax.xlane.f32.xlu0 %v2128_v38  ;;  %1644 = vrot.lane.b32.xlu1 %v8529_v11, %s9502_s11 }
0x14f6   : > { %v1635_v39 = vpop.xlane.xlu1 %1634 }
0x14f7   : > { %v1636_v40 = vsub.f32 %v1630_v24, %v1635_v39  ;;  %v1550_v24 = vld [vmem:[%s9455_s3 + $0x1c0] sm:$0xff] }
0x14f8   : > { %v7687_v9 = vpack.c.bf16 %v1550_v24, %v1549_v23  ;;  %v2428_v24 = vld [vmem:[%s9455_s3 + $0x240] sm:$0xff] }
0x14f9   : > { %v1637_v42 = vmul.f32 1.442695, %v1636_v40 }
0x14fa   : > { %v1800_v44 = vpop.xlane.xlu0 %1799  ;;  %v1645_v45 = vpop.permute.xlu1 %1644  ;;  %7688 = vmatpush3.bf16.msra.mxu0 %v7687_v9  ;;  %v2429_v9 = vld [vmem:[%s9455_s3 + $0x248] sm:$0xff] }
0x14fb   : > { %7891 = vpow2.f32 %v1637_v42  ;;  %v1801_v31 = vsub.f32 %v1795_v27, %v1800_v44  ;;  %7209 = vmatpush3.msra.mxu1 %v1645_v45  ;;  %7689 = vmatprep.subr.bf16.mxu0 %v8063_v3  ;;  %v1551_v27 = vld [vmem:[%s9455_s3 + $0x1c8] sm:$0xff]  ;;  %v6790_v45 = vld [vmem:[%s9455_s3 + $0x1d8] ss:$0 sm:$0xff] }
0x14fc   : > { %7218 = vmatprep.subr.mxu1 %v8065_v54  ;;  %v7690_v29 = vpack.c.bf16 %v1552_v28, %v1551_v27 }
0x14fd   : > { %v1802_v47 = vmul.f32 1.442695, %v1801_v31 }
0x14fe   : > { %7691 = vmatpush3.bf16.msra.mxu0 %v7690_v29 }
0x14ff   : > { %7893 = vpow2.f32 %v1802_v47  ;;  %7698 = vmatprep.subr.bf16.mxu0 %v8063_v3 }
0x1503   : > { %v1965_v48 = vpop.xlane.xlu0 %1964 }
0x1504   : > { %v1966_v49 = vsub.f32 %v1960_v32, %v1965_v48 }
0x1505   : > { %v7892_v50 = vpop.eup %7891 }
0x1506   : > { %v1967_v46 = vmul.f32 1.442695, %v1966_v49  ;;  %v1639_v51 = vsel %vm488_vm3, %v7892_v50, 0.0 }
0x1507   : > { %v2130_v52 = vpop.xlane.xlu0 %2129  ;;  %1640 = vadd.xlane.f32.xlu1 %v1639_v51 }
0x1508   : > { %7895 = vpow2.f32 %v1967_v46  ;;  %v2131_v41 = vsub.f32 %v2125_v36, %v2130_v52 }
0x1509   : > { %v7894_v53 = vpop.eup %7893 }
0x150a   : > { %v2132_v55 = vmul.f32 1.442695, %v2131_v41  ;;  %v1804_v56 = vsel %vm488_vm3, %v7894_v53, 0.0 }
0x150b   : > { %1805 = vadd.xlane.f32.xlu0 %v1804_v56 }
0x150c   : > { %7897 = vpow2.f32 %v2132_v55  ;;  %v2331_v55 = vld [vmem:[%s9455_s3 + $0x1e8] sm:$0xff] }
0x1512   : > { %v7896_v57 = vpop.eup %7895 }
0x1513   : > { %v1969_v59 = vsel %vm488_vm3, %v7896_v57, 0.0 }
0x1514   : > { %1970 = vadd.xlane.f32.xlu1 %v1969_v59  ;;  %v2334_v59 = vld [vmem:[%s9455_s3 + $0x200] sm:$0xff] }
0x1516   : > { %v7898_v0 = vpop.eup %7897 }
0x1517   : > { %v2134_v4 = vsel %vm488_vm3, %v7898_v0, 0.0 }
0x1518   : > { %2135 = vadd.xlane.f32.xlu0 %v2134_v4 }
0x1525   : > { %1974 = vrot.lane.b32.xlu1 %v8529_v11, %s9503_s26 }
0x1529   : > { %2139 = vrot.lane.b32.xlu1 %v8529_v11, %s9504_s8 }
0x152e   : > { %1809 = vrot.lane.b32.xlu0 %v8529_v11, %s9505_s9 }
0x1594   : > { %v1641_v5 = vpop.xlane.xlu1 %1640 }
0x1595   : > { %7899 = vrcp.f32 %v1641_v5 }
0x1598   : > { %v1806_v6 = vpop.xlane.xlu0 %1805 }
0x1599   : > { %7901 = vrcp.f32 %v1806_v6 }
0x159f   : > { %v7900_v7 = vpop.eup %7899 }
0x15a0   : > { %v1643_v8 = vmul.f32 %v7900_v7, %v7892_v50  ;;  %v2324_v7 = vrot.slane %v8517_v58, %v8444_v1 }
0x15a1   : > { %v1971_v10 = vpop.xlane.xlu1 %1970 }
0x15a2   : > { %7903 = vrcp.f32 %v1971_v10  ;;  %7211 = vmatmul.mubr.msk.f32.vlgmr.msra.gmra.mrb[24].mxu1 %vm488_vm3, %v1643_v8 }
0x15a3   : > { %7220 = vmatprep.mubr.msk.f32.mxu1 %vm8064_vm2, %v8065_v54  ;;  %v7902_v13 = vpop.eup %7901 }
0x15a4   : > { %v1808_v18 = vmul.f32 %v7902_v13, %v7894_v53 }
0x15a5   : > { %v2136_v12 = vpop.xlane.xlu0 %2135  ;;  %v1975_v62 = vpop.permute.xlu1 %1974 }
0x15a6   : > { %7905 = vrcp.f32 %v2136_v12  ;;  %v2329_v12 = vrot.slane %v8517_v58, %v8447_v2  ;;  %v2424_v58 = vld [vmem:[%s9455_s3 + $0x220] sm:$0xff] }
0x15a9   : > { %v1810_v17 = vpop.permute.xlu0 %1809  ;;  %v2140_v20 = vpop.permute.xlu1 %2139 }
0x15aa   : > { %7219 = vmatpush3.msra.mxu1 %v1810_v17  ;;  %v2422_v17 = vld [vmem:[%s9455_s3 + $0x210] sm:$0xff] }
0x15ab   : > { %7221 = vmatmul.mubr.msk.f32.vlgmr.msra.gmra.mrb[26].mxu1 %vm488_vm3, %v1808_v18  ;;  %7228 = vmatprep.subr.mxu1 %v8065_v54  ;;  %v2423_v18 = vld [vmem:[%s9455_s3 + $0x218] sm:$0xff] }
0x15ac   : > { %v7904_v11 = vpop.eup %7903  ;;  %7229 = vmatpush3.msra.mxu1 %v1975_v62  ;;  %7230 = vmatprep.mubr.msk.f32.mxu1 %vm8064_vm2, %v8065_v54 }
0x15ad   : > { %7238 = vmatprep.subr.mxu1 %v8065_v54  ;;  %v1973_v19 = vmul.f32 %v7904_v11, %v7896_v57  ;;  %v2333_v57 = vld [vmem:[%s9455_s3 + $0x1f8] sm:$0xff]  ;;  %v7699_v11 = vpack.c.bf16 %v2423_v18, %v2422_v17 }
0x15ae   : > { %v2510_v18 = vld [vmem:[%s9455_s3 + $0x258] sm:$0x3] }
0x15af   : > { %7231 = vmatmul.mubr.msk.f32.vlgmr.msra.gmra.mrb[28].mxu1 %vm488_vm3, %v1973_v19  ;;  %v2425_v19 = vld [vmem:[%s9455_s3 + $0x228] sm:$0xff] }
0x15b0   : > { %v7906_v21 = vpop.eup %7905  ;;  %7239 = vmatpush3.msra.mxu1 %v2140_v20  ;;  %7240 = vmatprep.mubr.msk.f32.mxu1 %vm8064_vm2, %v8065_v54  ;;  %v7702_v20 = vpack.c.bf16 %v2425_v19, %v2424_v58 }
0x15b1   : > { %v2138_v22 = vmul.f32 %v7906_v21, %v7898_v0  ;;  %7692 = vmatprep.subr.bf16.mxu1 %v8063_v3  ;;  %v7696_v0 = vpack.c.bf16 %v2334_v59, %v2333_v57  ;;  %v2426_v21 = vld [vmem:[%s9455_s3 + $0x230] sm:$0xff]  ;;  %v2534_v59 = vld [vmem:[%s9455_s3 + $0x268] sm:$0xff] }
0x15b3   : > { %7241 = vmatmul.mubr.msk.f32.vlgmr.msra.gmra.mrb[30].mxu1 %vm488_vm3, %v2138_v22  ;;  %v2427_v22 = vld [vmem:[%s9455_s3 + $0x238] sm:$0xff] }
0x15b4   : > { %7262 = vmatprep.mubr.msk.f32.mxu1 %vm8064_vm2, %v8065_v54  ;;  %v7705_v23 = vpack.c.bf16 %v2427_v22, %v2426_v21  ;;  %v2646_v21 = vld [vmem:[%s9455_s3 + $0x290] sm:$0xff]  ;;  %v2647_v22 = vld [vmem:[%s9455_s3 + $0x298] sm:$0xff] }
0x1675   : > { %v1716_v25 = vpop.f32.mrb[24].mxu1 }
0x1676   : > { %v7212_v26 = vpop.f32.mrb[25].mxu1 }
0x1677   : > { %v6792_v26 = vld [vmem:[%s9455_s3 + $0x208] ss:$0 sm:$0xff] }
0x167e   : > { %v1881_v30 = vpop.f32.mrb[26].mxu1 }
0x167f   : > { %2216 = vrot.lane.b32.xlu1 %v1881_v30, %s9506_s10  ;;  %v7222_v32 = vpop.f32.mrb[27].mxu1 }
0x1682   : > { %v2046_v33 = vpop.f32.mrb[28].mxu1 }
0x1683   : > { %2220 = vrot.lane.b32.xlu0 %v2046_v33, %s9507_s12  ;;  %v7232_v34 = vpop.f32.mrb[29].mxu1 }
0x1686   : > { %v2211_v35 = vpop.f32.mrb[30].mxu1 }
0x1687   : > { %2224 = vrot.lane.b32.xlu1 %v2211_v35, %s9508_s14  ;;  %v7242_v36 = vpop.f32.mrb[31].mxu1 }
0x16f1   : > { %v2217_v37 = vpop.permute.xlu1 %2216 }
0x16f2   : > { %v2227_v39 = vsel %vm488_vm3, %v1716_v25, %v2217_v37  ;;  %v7708_v25 = vpack.c.bf16 %v2429_v9, %v2428_v24 }
0x16f5   : > { %v2221_v38 = vpop.permute.xlu0 %2220 }
0x16f6   : > { %v2228_v40 = vsel %vm1159_vm5, %v2227_v39, %v2221_v38 }
0x16f9   : > { %v2225_v42 = vpop.permute.xlu1 %2224 }
0x16fa   : > { %v2229_v44 = vsel %vm1161_vm6, %v2228_v40, %v2225_v42  ;;  %v6795_v42 = vld [vmem:[%s9455_s3 + $0x250] ss:$0 sm:$0xff] }
0x16fb   : > { %7252 = vmatmul.mubr.msk.f32.vlgmr.msra.gmra.mrb[12].mxu0 %vm372_vm1, %v2229_v44 }
0x16fc   : > { %7281 = vmatprep.mubr.msk.f32.mxu0 %vm8064_vm2, %v8065_v54  ;;  %7700 = vmatpush3.bf16.msra.mxu0 %v7699_v11  ;;  %v2527_v11 = vrot.slane %v2510_v18, %v8291_v61 }
0x16fd   : > { %7701 = vmatprep.subr.bf16.mxu0 %v8063_v3 }
0x1700   : > { %7703 = vmatpush3.bf16.msra.mxu0 %v7702_v20  ;;  %v2532_v20 = vrot.slane %v2510_v18, %v8299_v63 }
0x1701   : > { %7704 = vmatprep.subr.bf16.mxu0 %v8063_v3 }
0x1704   : > { %7706 = vmatpush3.bf16.msra.mxu0 %v7705_v23  ;;  %v2616_v23 = vld [vmem:[%s9455_s3 + $0x260] sm:$0x3] }
0x1705   : > { %7707 = vmatprep.subr.bf16.mxu0 %v8063_v3 }
0x1708   : > { %7709 = vmatpush3.bf16.msra.mxu0 %v7708_v25  ;;  %v7717_v25 = vpack.c.bf16 %v2647_v22, %v2646_v21 }
0x1709   : > { %7306 = vmatprep.subr.mxu0 %v8065_v54 }
0x17ce   : > { %v2303_v31 = vpop.f32.mrb[12].mxu0 }
0x17cf   : > { %v2304_v47 = vadd.f32 %v6790_v45, %v2303_v31  ;;  %v7253_v48 = vpop.f32.mrb[13].mxu0 }
0x17d1   : > { %v8626_v49 = vadd.f32 %v2304_v47, %v8494_v43  ;;  %v2332_v43 = vld [vmem:[%s9455_s3 + $0x1f0] sm:$0xff]  ;;  %v2617_v47 = vld [vmem:[%s258_s23] sm:$0xff]  ;;  %s9513_s23 = smov 120  }
0x17d2   : > { %v7693_v56 = vpack.c.bf16 %v2332_v43, %v2331_v55 }
0x17d3   : > { %v2308_v50 = vsel %vm372_vm1, %v8626_v49, 0.0 }
0x17d4   : > { %2309 = vadd.xlane.f32.xlu0 %v2308_v50  ;;  %7694 = vmatpush3.bf16.msra.mxu1 %v7693_v56  ;;  %v2618_v50 = vsel %vm372_vm1, %v2617_v47, 0.0 }
0x17d5   : > { %7695 = vmatprep.subr.bf16.mxu1 %v8063_v3 }
0x17d8   : > { %7697 = vmatpush3.bf16.msra.mxu1 %v7696_v0  ;;  %v2535_v0 = vld [vmem:[%s9455_s3 + $0x270] sm:$0xff] }
0x17d9   : > { %7710 = vmatprep.subr.bf16.mxu1 %v8063_v3 }
0x1861   : > { %v2310_v46 = vpop.xlane.xlu0 %2309 }
0x1862   : > { %v2311_v51 = vmul.f32 0.03125, %v2310_v46 }
0x1864   : > { %v2312_v52 = vsub.f32 %v8626_v49, %v2311_v51 }
0x1866   : > { %v2313_v41 = vmul.f32 %v2312_v52, %v2312_v52 }
0x1868   : > { %v2314_v53 = vsel %vm372_vm1, %v2313_v41, 0.0 }
0x1869   : > { %2315 = vadd.xlane.f32.xlu1 %v2314_v53 }
0x18f6   : > { %v2316_v4 = vpop.xlane.xlu1 %2315 }
0x18f7   : > { %v2317_v5 = vmul.f32 0.03125, %v2316_v4  ;;  %v7711_v4 = vpack.c.bf16 %v2535_v0, %v2534_v59 }
0x18f9   : > { %v2318_v6 = vadd.f32 1e-05, %v2317_v5  ;;  %v2536_v5 = vld [vmem:[%s9455_s3 + $0x278] sm:$0xff] }
0x18fb   : > { %7907 = vrsqrt.f32 %v2318_v6  ;;  %v2537_v6 = vld [vmem:[%s9455_s3 + $0x280] sm:$0xff] }
0x1905   : > { %v7908_v8 = vpop.eup %7907 }
0x1906   : > { %v2320_v10 = vmul.f32 %v7908_v8, %v2312_v52 }
0x1908   : > { %v2325_v13 = vmul.f32 %v2324_v7, %v2320_v10  ;;  %v7714_v7 = vpack.c.bf16 %v2537_v6, %v2536_v5 }
0x190a   : > { %v2330_v62 = vadd.f32 %v2329_v12, %v2325_v13 }
0x190c   : > { %7263 = vmatmul.mubr.msk.f32.vlgmr.msra.gmra.mrb[32].mxu1 %vm372_vm1, %v2330_v62 }
0x190d   : > { %7292 = vmatprep.mubr.msk.f32.mxu1 %vm8064_vm2, %v8065_v54  ;;  %7712 = vmatpush3.bf16.msra.mxu1 %v7711_v4 }
0x190e   : > { %7713 = vmatprep.subr.bf16.mxu1 %v8063_v3 }
0x1911   : > { %7715 = vmatpush3.bf16.msra.mxu1 %v7714_v7 }
0x1912   : > { %7716 = vmatprep.subr.bf16.mxu1 %v8063_v3 }
0x19df   : > { %v2409_v27 = vpop.f32.mrb[32].mxu1 }
0x19e0   : > { %v2410_v28 = vadd.f32 %v6792_v26, %v2409_v27  ;;  %v7264_v29 = vpop.f32.mrb[33].mxu1 }
0x19e1   : > { %v2649_v29 = vld [vmem:[%s9455_s3 + $0x2a8] sm:$0xff] }
0x19e2   : > { %v2413_v30 = vmul.f32 %v2410_v28, %v2410_v28 }
0x19e4   : > { %v2414_v32 = vmul.f32 %v2413_v30, %v2410_v28  ;;  %v2634_v30 = vrot.slane %v2616_v23, %v8291_v61 }
0x19e6   : > { %v2415_v33 = vmul.f32 0.044715, %v2414_v32 }
0x19e8   : > { %v2416_v34 = vadd.f32 %v2415_v33, %v2410_v28 }
0x19ea   : > { %v2417_v35 = vmul.f32 0.7978846, %v2416_v34  ;;  %v2639_v34 = vrot.slane %v2616_v23, %v8299_v63 }
0x19ec   : > { %7909 = vtanh.f32 %v2417_v35 }
0x19f6   : > { %v7910_v36 = vpop.eup %7909 }
0x19f7   : > { %v2419_v37 = vadd.f32 1.0, %v7910_v36 }
0x19f9   : > { %v2420_v38 = vmul.f32 0.5, %v2419_v37 }
0x19fb   : > { %v2421_v39 = vmul.f32 %v2420_v38, %v2410_v28  ;;  %v2648_v28 = vld [vmem:[%s9455_s3 + $0x2a0] sm:$0xff]  ;;  %v6798_v38 = vld [vmem:[%s9455_s3 + $0x2b0] ss:$0 sm:$0xff] }
0x19fc   : > { %v7720_v32 = vpack.c.bf16 %v2649_v29, %v2648_v28 }
0x19fd   : > { %7282 = vmatmul.mubr.msk.f32.vlgmr.msra.gmra.mrb[14].mxu0 %vm293_vm0, %v2421_v39 }
0x19fe   : > { %7308 = vmatprep.mubr.msk.f32.mxu0 %vm8064_vm2, %v8065_v54 }
0x1ad0   : > { %v2499_v40 = vpop.f32.mrb[14].mxu0 }
0x1ad1   : > { %v2503_v44 = vadd.f32 %v2499_v40, %v8626_v49  ;;  %v7283_v45 = vpop.f32.mrb[15].mxu0 }
0x1ad3   : > { %v2509_v31 = vadd.f32 %v6795_v42, %v2503_v44 }
0x1ad5   : > { %v2511_v48 = vsel %vm372_vm1, %v2509_v31, 0.0 }
0x1ad6   : > { %2512 = vadd.xlane.f32.xlu0 %v2511_v48 }
0x1ada   : > { %2619 = vadd.xlane.f32.xlu0 %v2618_v50 }
0x1b63   : > { %v2513_v46 = vpop.xlane.xlu0 %2512 }
0x1b64   : > { %v2514_v51 = vmul.f32 0.03125, %v2513_v46 }
0x1b66   : > { %v2515_v52 = vsub.f32 %v2509_v31, %v2514_v51 }
0x1b67   : > { %v2620_v41 = vpop.xlane.xlu0 %2619 }
0x1b68   : > { %v2621_v53 = vmul.f32 0.03125, %v2620_v41  ;;  %v2516_v49 = vmul.f32 %v2515_v52, %v2515_v52 }
0x1b6a   : > { %v2622_v55 = vsub.f32 %v2617_v47, %v2621_v53  ;;  %v2517_v43 = vsel %vm372_vm1, %v2516_v49, 0.0 }
0x1b6b   : > { %2518 = vadd.xlane.f32.xlu0 %v2517_v43 }
0x1b6c   : > { %v2623_v56 = vmul.f32 %v2622_v55, %v2622_v55 }
0x1b6e   : > { %v2624_v57 = vsel %vm372_vm1, %v2623_v56, 0.0 }
0x1b6f   : > { %2625 = vadd.xlane.f32.xlu1 %v2624_v57 }
0x1bf8   : > { %v2519_v8 = vpop.xlane.xlu0 %2518 }
0x1bf9   : > { %v2520_v10 = vmul.f32 0.03125, %v2519_v8 }
0x1bfb   : > { %v2521_v12 = vadd.f32 1e-05, %v2520_v10 }
0x1bfc   : > { %v2626_v13 = vpop.xlane.xlu1 %2625 }
0x1bfd   : > { %7911 = vrsqrt.f32 %v2521_v12  ;;  %v2627_v62 = vmul.f32 0.03125, %v2626_v13 }
0x1bff   : > { %v2628_v17 = vadd.f32 1e-05, %v2627_v62 }
0x1c01   : > { %7913 = vrsqrt.f32 %v2628_v17 }
0x1c07   : > { %v7912_v58 = vpop.eup %7911 }
0x1c08   : > { %v2523_v19 = vmul.f32 %v7912_v58, %v2515_v52  ;;  %v8790_v52 = vsel %vm2643_vm7, 0.0, %v8069_v15 }
0x1c0a   : > { %v2528_v24 = vmul.f32 %v2527_v11, %v2523_v19 }
0x1c0b   : > { %v7914_v9 = vpop.eup %7913 }
0x1c0c   : > { %v2630_v26 = vmul.f32 %v7914_v9, %v2622_v55  ;;  %v2533_v27 = vadd.f32 %v2532_v20, %v2528_v24 }
0x1c0e   : > { %7293 = vmatmul.mubr.msk.f32.vlgmr.msra.gmra.mrb[34].mxu1 %vm372_vm1, %v2533_v27  ;;  %v2635_v33 = vmul.f32 %v2634_v30, %v2630_v26 }
0x1c0f   : > { %7718 = vmatpush3.bf16.msra.mxu1 %v7717_v25  ;;  %7303 = vmatprep.mubr.msk.f32.mxu1 %vm8064_vm2, %v8065_v54 }
0x1c10   : > { %7719 = vmatprep.subr.bf16.mxu1 %v8063_v3  ;;  %v8741_v35 = vadd.f32 %v2639_v34, %v2635_v33 }
0x1c13   : > { %7721 = vmatpush3.bf16.msra.mxu1 %v7720_v32 }
0x1c14   : > { %7311 = vmatprep.subr.mxu1 %v8065_v54 }
0x1c16   : > { %7304 = vmatmul.mubr.msk.f32.vlgmr.msra.gmra.mrb[36].mxu1 %vm372_vm1, %v8741_v35 }
0x1c17   : > { %7313 = vmatprep.mubr.msk.f32.mxu1 %vm8064_vm2, %v8065_v54 }
0x1ce1   : > { %v8748_v36 = vpop.f32.mrb[34].mxu1 }
0x1ce2   : > { %v7294_v37 = vpop.f32.mrb[35].mxu1 }
0x1ce9   : > { %v2724_v39 = vpop.f32.mrb[36].mxu1 }
0x1cea   : > { %v8753_v40 = vadd.f32 %v6798_v38, %v2724_v39  ;;  %v7305_v42 = vpop.f32.mrb[37].mxu1 }
0x1cec   : > { %2901 = vrot.lane.b32.xlu1 %v8753_v40, %s9510_s7  ;;  %2735 = vrot.lane.b32.xlu0 %v8753_v40, %s9511_s17  ;;  %v2733_v44 = vmul.f32 0.35355338, %v8753_v40 }
0x1cf0   : > { %3064 = vrot.lane.b32.xlu0 %v2733_v44, %s9512_s30  ;;  %2899 = vrot.lane.b32.xlu1 %v2733_v44, %s9513_s23 }
0x1cf4   : > { %3229 = vrot.lane.b32.xlu0 %v2733_v44, %s9514_s15  ;;  %3066 = vrot.lane.b32.xlu1 %v8753_v40, %s9515_s16 }
0x1cf8   : > { %3231 = vrot.lane.b32.xlu1 %v8753_v40, %s9516_s25 }
0x1d5e   : > { %v2902_v45 = vpop.permute.xlu1 %2901  ;;  %v2736_v31 = vpop.permute.xlu0 %2735 }
0x1d5f   : > { %7307 = vmatpush3.xpose.msk.msra.mxu0 %vm488_vm3, %v2736_v31 }
0x1d60   : > { %7316 = vmatprep.subr.mxu0 %v8065_v54 }
0x1d62   : > { %v2900_v47 = vpop.permute.xlu1 %2899  ;;  %7309 = vmatmul.mubr.msk.f32.vlgmr.msra.gmra.mrb[16].mxu0 %vm488_vm3, %v2733_v44  ;;  %v3065_v50 = vpop.permute.xlu0 %3064 }
0x1d63   : > { %7317 = vmatpush3.xpose.msk.msra.mxu0 %vm488_vm3, %v2902_v45  ;;  %7318 = vmatprep.mubr.msk.f32.mxu0 %vm8064_vm2, %v8065_v54 }
0x1d64   : > { %7326 = vmatprep.subr.mxu0 %v8065_v54 }
0x1d66   : > { %v3067_v48 = vpop.permute.xlu1 %3066  ;;  %7319 = vmatmul.mubr.msk.f32.vlgmr.msra.gmra.mrb[18].mxu0 %vm488_vm3, %v2900_v47  ;;  %v3230_v51 = vpop.permute.xlu0 %3229 }
0x1d67   : > { %7327 = vmatpush3.xpose.msk.msra.mxu0 %vm488_vm3, %v3067_v48  ;;  %7328 = vmatprep.mubr.msk.f32.mxu0 %vm8064_vm2, %v8065_v54 }
0x1d68   : > { %7336 = vmatprep.subr.mxu0 %v8065_v54 }
0x1d6a   : > { %v3232_v46 = vpop.permute.xlu1 %3231  ;;  %7329 = vmatmul.mubr.msk.f32.vlgmr.msra.gmra.mrb[20].mxu0 %vm488_vm3, %v3065_v50 }
0x1d6b   : > { %7337 = vmatpush3.xpose.msk.msra.mxu0 %vm488_vm3, %v3232_v46  ;;  %7338 = vmatprep.mubr.msk.f32.mxu0 %vm8064_vm2, %v8065_v54 }
0x1d6c   : > { %7722 = vmatprep.subr.bf16.mxu0 %v8063_v3 }
0x1d6e   : > { %7339 = vmatmul.mubr.msk.f32.vlgmr.msra.gmra.mrb[22].mxu0 %vm488_vm3, %v3230_v51 }
0x1d6f   : > { %7354 = vmatprep.mubr.msk.f32.mxu0 %vm8064_vm2, %v8065_v54 }
0x1e35   : > { %v2808_v41 = vpop.f32.mrb[16].mxu0 }
0x1e36   : > { %v2809_v53 = vadd.f32 %v2808_v41, %v8790_v52  ;;  %v7310_v49 = vpop.f32.mrb[17].mxu0  ;;  %v2728_v41 = vld [vmem:[%s9455_s3 + $0x2b8] sm:$0xff] }
0x1e38   : > { %v2812_v55 = vsel %vm488_vm3, %v2809_v53, -inf }
0x1e39   : > { %2813 = vmax.xlane.f32.xlu1 %v2812_v55  ;;  %v2973_v43 = vpop.f32.mrb[18].mxu0  ;;  %v2730_v55 = vld [vmem:[%s9455_s3 + $0x2c8] sm:$0xff] }
0x1e3a   : > { %v2974_v56 = vadd.f32 %v2973_v43, %v8790_v52  ;;  %v7320_v57 = vpop.f32.mrb[19].mxu0  ;;  %v2731_v43 = vld [vmem:[%s9455_s3 + $0x2d0] sm:$0xff] }
0x1e3c   : > { %v2977_v59 = vsel %vm488_vm3, %v2974_v56, -inf }
0x1e3d   : > { %2978 = vmax.xlane.f32.xlu0 %v2977_v59  ;;  %v3138_v0 = vpop.f32.mrb[20].mxu0 }
0x1e3e   : > { %v3139_v4 = vadd.f32 %v3138_v0, %v8790_v52  ;;  %v7330_v5 = vpop.f32.mrb[21].mxu0 }
0x1e40   : > { %v3142_v15 = vsel %vm488_vm3, %v3139_v4, -inf }
0x1e41   : > { %3143 = vmax.xlane.f32.xlu0 %v3142_v15  ;;  %v3303_v6 = vpop.f32.mrb[22].mxu0 }
0x1e42   : > { %v3304_v7 = vadd.f32 %v3303_v6, %v8790_v52  ;;  %v7340_v8 = vpop.f32.mrb[23].mxu0 }
0x1e44   : > { %v3307_v10 = vsel %vm488_vm3, %v3304_v7, -inf }
0x1e45   : > { %3308 = vmax.xlane.f32.xlu0 %v3307_v10 }
0x1e4a   : > { %2823 = vrot.lane.b32.xlu1 %v8753_v40, %s9502_s11 }
0x1ec6   : > { %v2814_v12 = vpop.xlane.xlu1 %2813 }
0x1ec7   : > { %v2815_v13 = vsub.f32 %v2809_v53, %v2814_v12  ;;  %v2729_v53 = vld [vmem:[%s9455_s3 + $0x2c0] sm:$0xff]  ;;  %v6796_v12 = vld [vmem:[%s9455_s3 + $0x288] ss:$0 sm:$0xff] }
0x1ec8   : > { %v7723_v49 = vpack.c.bf16 %v2729_v53, %v2728_v41 }
0x1ec9   : > { %v2816_v62 = vmul.f32 1.442695, %v2815_v13 }
0x1eca   : > { %v2824_v17 = vpop.permute.xlu1 %2823  ;;  %v2979_v18 = vpop.xlane.xlu0 %2978  ;;  %7724 = vmatpush3.bf16.msra.mxu0 %v7723_v49 }
0x1ecb   : > { %7915 = vpow2.f32 %v2816_v62  ;;  %v2980_v11 = vsub.f32 %v2974_v56, %v2979_v18  ;;  %7312 = vmatpush3.msra.mxu1 %v2824_v17  ;;  %7725 = vmatprep.subr.bf16.mxu0 %v8063_v3  ;;  %v7726_v56 = vpack.c.bf16 %v2731_v43, %v2730_v55  ;;  %v8851_v18 = vadd.f32 %v6796_v12, %v8748_v36 }
0x1ecc   : > { %7321 = vmatprep.subr.mxu1 %v8065_v54 }
0x1ecd   : > { %v2981_v58 = vmul.f32 1.442695, %v2980_v11 }
0x1ece   : > { %v3144_v19 = vpop.xlane.xlu0 %3143  ;;  %7727 = vmatpush3.bf16.msra.mxu0 %v7726_v56 }
0x1ecf   : > { %7917 = vpow2.f32 %v2981_v58  ;;  %v3145_v20 = vsub.f32 %v3139_v4, %v3144_v19  ;;  %7368 = vmatprep.subr.mxu0 %v8065_v54  ;;  %v6812_v58 = vld [vmem:[%s9455_s3 + $0x2d8] ss:$0 sm:$0xff] }
0x1ed1   : > { %v3146_v21 = vmul.f32 1.442695, %v3145_v20 }
0x1ed2   : > { %v3309_v22 = vpop.xlane.xlu0 %3308 }
0x1ed3   : > { %7919 = vpow2.f32 %v3146_v21  ;;  %v3310_v23 = vsub.f32 %v3304_v7, %v3309_v22 }
0x1ed5   : > { %v7916_v24 = vpop.eup %7915  ;;  %v3311_v9 = vmul.f32 1.442695, %v3310_v23 }
0x1ed6   : > { %v2818_v25 = vsel %vm488_vm3, %v7916_v24, 0.0 }
0x1ed7   : > { %7921 = vpow2.f32 %v3311_v9  ;;  %2819 = vadd.xlane.f32.xlu1 %v2818_v25 }
0x1ed9   : > { %v7918_v26 = vpop.eup %7917 }
0x1eda   : > { %v2983_v27 = vsel %vm488_vm3, %v7918_v26, 0.0 }
0x1edb   : > { %2984 = vadd.xlane.f32.xlu0 %v2983_v27  ;;  %v3511_v27 = vld [vmem:[%s9455_s3 + $0x2e8] sm:$0xff] }
0x1edd   : > { %v7920_v28 = vpop.eup %7919 }
0x1ede   : > { %v3148_v29 = vsel %vm488_vm3, %v7920_v28, 0.0 }
0x1edf   : > { %3149 = vadd.xlane.f32.xlu1 %v3148_v29  ;;  %v3512_v29 = vld [vmem:[%s9455_s3 + $0x2f0] sm:$0xff] }
0x1ee1   : > { %v7922_v30 = vpop.eup %7921 }
0x1ee2   : > { %v3313_v32 = vsel %vm488_vm3, %v7922_v30, 0.0 }
0x1ee3   : > { %3314 = vadd.xlane.f32.xlu0 %v3313_v32 }
0x1ef0   : > { %3153 = vrot.lane.b32.xlu1 %v8753_v40, %s9503_s26 }
0x1ef4   : > { %3318 = vrot.lane.b32.xlu1 %v8753_v40, %s9504_s8 }
0x1ef9   : > { %2988 = vrot.lane.b32.xlu0 %v8753_v40, %s9505_s9 }
0x1f64   : > { %v2820_v33 = vpop.xlane.xlu1 %2819 }
0x1f65   : > { %7923 = vrcp.f32 %v2820_v33 }
0x1f68   : > { %v2985_v34 = vpop.xlane.xlu0 %2984 }
0x1f69   : > { %7925 = vrcp.f32 %v2985_v34 }
0x1f6c   : > { %v3150_v37 = vpop.xlane.xlu1 %3149 }
0x1f6d   : > { %7927 = vrcp.f32 %v3150_v37 }
0x1f6f   : > { %v7924_v38 = vpop.eup %7923 }
0x1f70   : > { %v2822_v39 = vmul.f32 %v7924_v38, %v7916_v24  ;;  %v3315_v42 = vpop.xlane.xlu0 %3314  ;;  %v3154_v31 = vpop.permute.xlu1 %3153  ;;  %v8889_v38 = vld [vmem:[%s9455_s3 + $0x330] sm:$0x3f] }
0x1f71   : > { %7929 = vrcp.f32 %v3315_v42 }
0x1f72   : > { %7314 = vmatmul.mubr.msk.f32.vlgmr.msra.gmra.mrb[38].mxu1 %vm488_vm3, %v2822_v39  ;;  %v3503_v39 = vrot.slane %v8889_v38, %v8291_v61 }
0x1f73   : > { %v7926_v44 = vpop.eup %7925  ;;  %7323 = vmatprep.mubr.msk.f32.mxu1 %vm8064_vm2, %v8065_v54 }
0x1f74   : > { %v2987_v45 = vmul.f32 %v7926_v44, %v7918_v26  ;;  %v2989_v47 = vpop.permute.xlu0 %2988  ;;  %v3319_v50 = vpop.permute.xlu1 %3318 }
0x1f75   : > { %7322 = vmatpush3.msra.mxu1 %v2989_v47 }
0x1f76   : > { %7324 = vmatmul.mubr.msk.f32.vlgmr.msra.gmra.mrb[40].mxu1 %vm488_vm3, %v2987_v45  ;;  %7331 = vmatprep.subr.mxu1 %v8065_v54  ;;  %v3508_v45 = vrot.slane %v8889_v38, %v8299_v63 }
0x1f77   : > { %v7928_v40 = vpop.eup %7927  ;;  %7332 = vmatpush3.msra.mxu1 %v3154_v31  ;;  %7333 = vmatprep.mubr.msk.f32.mxu1 %vm8064_vm2, %v8065_v54 }
0x1f78   : > { %v3152_v48 = vmul.f32 %v7928_v40, %v7920_v28  ;;  %7341 = vmatprep.subr.mxu1 %v8065_v54  ;;  %v6814_v40 = vld [vmem:[%s9455_s3 + $0x300] ss:$0 sm:$0xff] }
0x1f7a   : > { %7334 = vmatmul.mubr.msk.f32.vlgmr.msra.gmra.mrb[42].mxu1 %vm488_vm3, %v3152_v48 }
0x1f7b   : > { %v7930_v46 = vpop.eup %7929  ;;  %7342 = vmatpush3.msra.mxu1 %v3319_v50  ;;  %7343 = vmatprep.mubr.msk.f32.mxu1 %vm8064_vm2, %v8065_v54 }
0x1f7c   : > { %v3317_v51 = vmul.f32 %v7930_v46, %v7922_v30  ;;  %7728 = vmatprep.subr.bf16.mxu1 %v8063_v3  ;;  %v3513_v30 = vld [vmem:[%s9455_s3 + $0x2f8] sm:$0xff] }
0x1f7d   : > { %v7732_v32 = vpack.c.bf16 %v3513_v30, %v3512_v29 }
0x1f7e   : > { %7344 = vmatmul.mubr.msk.f32.vlgmr.msra.gmra.mrb[44].mxu1 %vm488_vm3, %v3317_v51 }
0x1f7f   : > { %7365 = vmatprep.mubr.msk.f32.mxu1 %vm8064_vm2, %v8065_v54 }
0x2045   : > { %v2895_v57 = vpop.f32.mrb[38].mxu1 }
0x2046   : > { %v7315_v59 = vpop.f32.mrb[39].mxu1 }
0x2049   : > { %v3060_v0 = vpop.f32.mrb[40].mxu1 }
0x204a   : > { %3395 = vrot.lane.b32.xlu1 %v3060_v0, %s9506_s10  ;;  %v7325_v4 = vpop.f32.mrb[41].mxu1 }
0x204d   : > { %v3225_v5 = vpop.f32.mrb[42].mxu1 }
0x204e   : > { %3399 = vrot.lane.b32.xlu0 %v3225_v5, %s9507_s12  ;;  %v7335_v15 = vpop.f32.mrb[43].mxu1 }
0x2051   : > { %v3390_v6 = vpop.f32.mrb[44].mxu1 }
0x2052   : > { %3403 = vrot.lane.b32.xlu1 %v3390_v6, %s9508_s14  ;;  %v7345_v7 = vpop.f32.mrb[45].mxu1 }
0x20bc   : > { %v3396_v8 = vpop.permute.xlu1 %3395 }
0x20bd   : > { %v3406_v13 = vsel %vm488_vm3, %v2895_v57, %v3396_v8 }
0x20c0   : > { %v3400_v10 = vpop.permute.xlu0 %3399 }
0x20c1   : > { %v3407_v62 = vsel %vm1159_vm5, %v3406_v13, %v3400_v10 }
0x20c4   : > { %v3404_v17 = vpop.permute.xlu1 %3403 }
0x20c5   : > { %v3408_v11 = vsel %vm1161_vm6, %v3407_v62, %v3404_v17 }
0x20c6   : > { %7355 = vmatmul.mubr.msk.f32.vlgmr.msra.gmra.mrb[24].mxu0 %vm372_vm1, %v3408_v11 }
0x20c7   : > { %7369 = vmatpush3.xpose.msk.msra.mxu0 %vm488_vm3, %v8851_v18  ;;  %7370 = vmatprep.mubr.msk.f32.mxu0 %vm8064_vm2, %v8065_v54 }
0x20c8   : > { %7378 = vmatprep.subr.mxu0 %v8065_v54 }
0x2199   : > { %v3482_v19 = vpop.f32.mrb[24].mxu0 }
0x219a   : > { %v3483_v20 = vadd.f32 %v6812_v58, %v3482_v19  ;;  %v7356_v36 = vpop.f32.mrb[25].mxu0 }
0x219c   : > { %v3486_v21 = vadd.f32 %v3483_v20, %v8741_v35  ;;  %v3510_v35 = vld [vmem:[%s9455_s3 + $0x2e0] sm:$0xff] }
0x219d   : > { %v7729_v28 = vpack.c.bf16 %v3511_v27, %v3510_v35 }
0x219e   : > { %v3487_v22 = vsel %vm372_vm1, %v3486_v21, 0.0 }
0x219f   : > { %3488 = vadd.xlane.f32.xlu0 %v3487_v22  ;;  %7730 = vmatpush3.bf16.msra.mxu1 %v7729_v28 }
0x21a0   : > { %7731 = vmatprep.subr.bf16.mxu1 %v8063_v3 }
0x21a3   : > { %7733 = vmatpush3.bf16.msra.mxu1 %v7732_v32 }
0x21a4   : > { %7373 = vmatprep.subr.mxu1 %v8065_v54 }
0x21b5   : > { %3763 = vrot.lane.b32.xlu0 %v8851_v18, %s9513_s23 }
0x21b9   : > { %3928 = vrot.lane.b32.xlu0 %v8851_v18, %s9512_s30 }
0x21bd   : > { %4093 = vrot.lane.b32.xlu0 %v8851_v18, %s9514_s15 }
0x222c   : > { %v3489_v23 = vpop.xlane.xlu0 %3488 }
0x222d   : > { %v3490_v24 = vmul.f32 0.03125, %v3489_v23 }
0x222f   : > { %v3491_v9 = vsub.f32 %v3486_v21, %v3490_v24 }
0x2230   : > { %v3764_v41 = vpop.permute.xlu0 %3763 }
0x2231   : > { %v3492_v25 = vmul.f32 %v3491_v9, %v3491_v9 }
0x2233   : > { %v3493_v26 = vsel %vm372_vm1, %v3492_v25, 0.0 }
0x2234   : > { %3494 = vadd.xlane.f32.xlu1 %v3493_v26  ;;  %v3929_v53 = vpop.permute.xlu0 %3928 }
0x2238   : > { %v4094_v43 = vpop.permute.xlu0 %4093 }
0x22c1   : > { %v3495_v33 = vpop.xlane.xlu1 %3494 }
0x22c2   : > { %v3496_v34 = vmul.f32 0.03125, %v3495_v33 }
0x22c4   : > { %v3497_v37 = vadd.f32 1e-05, %v3496_v34 }
0x22c6   : > { %7931 = vrsqrt.f32 %v3497_v37 }
0x22d0   : > { %v7932_v42 = vpop.eup %7931 }
0x22d1   : > { %v3499_v44 = vmul.f32 %v7932_v42, %v3491_v9 }
0x22d3   : > { %v3504_v31 = vmul.f32 %v3503_v39, %v3499_v44 }
0x22d5   : > { %v8895_v47 = vadd.f32 %v3508_v45, %v3504_v31 }
0x22d7   : > { %7366 = vmatmul.mubr.msk.f32.vlgmr.msra.gmra.mrb[46].mxu1 %vm372_vm1, %v8895_v47 }
0x22d8   : > { %7375 = vmatprep.mubr.msk.f32.mxu1 %vm8064_vm2, %v8065_v54 }
0x23aa   : > { %v3588_v48 = vpop.f32.mrb[46].mxu1 }
0x23ab   : > { %v3589_v50 = vadd.f32 %v6814_v40, %v3588_v48  ;;  %v7367_v46 = vpop.f32.mrb[47].mxu1 }
0x23ad   : > { %v3597_v51 = vmul.f32 0.35355338, %v3589_v50 }
0x23af   : > { %3761 = vrot.lane.b32.xlu1 %v3597_v51, %s9513_s23  ;;  %7371 = vmatmul.mubr.msk.f32.vlgmr.msra.gmra.mrb[26].mxu0 %vm488_vm3, %v3597_v51 }
0x23b0   : > { %7379 = vmatpush3.xpose.msk.msra.mxu0 %vm488_vm3, %v3764_v41  ;;  %7380 = vmatprep.mubr.msk.f32.mxu0 %vm8064_vm2, %v8065_v54 }
0x23b1   : > { %7388 = vmatprep.subr.mxu0 %v8065_v54 }
0x23b3   : > { %3926 = vrot.lane.b32.xlu1 %v3597_v51, %s9512_s30 }
0x23b7   : > { %4091 = vrot.lane.b32.xlu1 %v3597_v51, %s9514_s15 }
0x2421   : > { %v3762_v49 = vpop.permute.xlu1 %3761 }
0x2422   : > { %7381 = vmatmul.mubr.msk.f32.vlgmr.msra.gmra.mrb[28].mxu0 %vm488_vm3, %v3762_v49 }
0x2423   : > { %7389 = vmatpush3.xpose.msk.msra.mxu0 %vm488_vm3, %v3929_v53  ;;  %7390 = vmatprep.mubr.msk.f32.mxu0 %vm8064_vm2, %v8065_v54 }
0x2424   : > { %7398 = vmatprep.subr.mxu0 %v8065_v54 }
0x2425   : > { %v3927_v55 = vpop.permute.xlu1 %3926 }
0x2426   : > { %7391 = vmatmul.mubr.msk.f32.vlgmr.msra.gmra.mrb[30].mxu0 %vm488_vm3, %v3927_v55 }
0x2427   : > { %7399 = vmatpush3.xpose.msk.msra.mxu0 %vm488_vm3, %v4094_v43  ;;  %7400 = vmatprep.mubr.msk.f32.mxu0 %vm8064_vm2, %v8065_v54 }
0x2428   : > { %7734 = vmatprep.subr.bf16.mxu0 %v8063_v3 }
0x2429   : > { %v4092_v56 = vpop.permute.xlu1 %4091 }
0x242a   : > { %7401 = vmatmul.mubr.msk.f32.vlgmr.msra.gmra.mrb[32].mxu0 %vm488_vm3, %v4092_v56 }
0x242b   : > { %7416 = vmatprep.mubr.msk.f32.mxu0 %vm8064_vm2, %v8065_v54 }
0x2482   : > { %v3670_v57 = vpop.f32.mrb[26].mxu0 }
0x2483   : > { %v3671_v59 = vadd.f32 %v3670_v57, %v8333_v16  ;;  %v7372_v0 = vpop.f32.mrb[27].mxu0 }
0x2484   : > { %v3593_v0 = vld [vmem:[%s9455_s3 + $0x310] sm:$0xff] }
0x2485   : > { %v3674_v4 = vsel %vm488_vm3, %v3671_v59, -inf }
0x2486   : > { %3675 = vmax.xlane.f32.xlu0 %v3674_v4  ;;  %v3594_v4 = vld [vmem:[%s9455_s3 + $0x318] sm:$0xff] }
0x24f5   : > { %v3835_v5 = vpop.f32.mrb[28].mxu0 }
0x24f6   : > { %v3836_v15 = vadd.f32 %v3835_v5, %v8333_v16  ;;  %v7382_v6 = vpop.f32.mrb[29].mxu0 }
0x24f8   : > { %v3839_v7 = vsel %vm488_vm3, %v3836_v15, -inf }
0x24f9   : > { %3840 = vmax.xlane.f32.xlu1 %v3839_v7  ;;  %v4000_v8 = vpop.f32.mrb[30].mxu0 }
0x24fa   : > { %v4001_v10 = vadd.f32 %v4000_v8, %v8333_v16  ;;  %v7392_v12 = vpop.f32.mrb[31].mxu0 }
0x24fc   : > { %v4004_v13 = vsel %vm488_vm3, %v4001_v10, -inf }
0x24fd   : > { %4005 = vmax.xlane.f32.xlu0 %v4004_v13  ;;  %v4165_v62 = vpop.f32.mrb[32].mxu0 }
0x24fe   : > { %v4166_v17 = vadd.f32 %v4165_v62, %v8333_v16  ;;  %v7402_v11 = vpop.f32.mrb[33].mxu0 }
0x2500   : > { %v4169_v58 = vsel %vm488_vm3, %v4166_v17, -inf }
0x2501   : > { %4170 = vmax.xlane.f32.xlu0 %v4169_v58 }
0x2513   : > { %v3676_v19 = vpop.xlane.xlu0 %3675 }
0x2514   : > { %v3677_v20 = vsub.f32 %v3671_v59, %v3676_v19  ;;  %v3592_v59 = vld [vmem:[%s9455_s3 + $0x308] sm:$0xff] }
0x2515   : > { %v7735_v5 = vpack.c.bf16 %v3593_v0, %v3592_v59  ;;  %v4467_v59 = vld [vmem:[%s9455_s3 + $0x380] sm:$0xff]  ;;  %v4468_v0 = vld [vmem:[%s9455_s3 + $0x388] sm:$0xff] }
0x2516   : > { %v3678_v36 = vmul.f32 1.442695, %v3677_v20 }
0x2517   : > { %7736 = vmatpush3.bf16.msra.mxu0 %v7735_v5  ;;  %v4469_v5 = vld [vmem:[%s9455_s3 + $0x390] sm:$0xff] }
0x2518   : > { %7933 = vpow2.f32 %v3678_v36  ;;  %7737 = vmatprep.subr.bf16.mxu0 %v8063_v3 }
0x2522   : > { %v7934_v21 = vpop.eup %7933 }
0x2523   : > { %v3680_v22 = vsel %vm488_vm3, %v7934_v21, 0.0 }
0x2524   : > { %3681 = vadd.xlane.f32.xlu0 %v3680_v22 }
0x2586   : > { %v3841_v23 = vpop.xlane.xlu1 %3840 }
0x2587   : > { %v3842_v24 = vsub.f32 %v3836_v15, %v3841_v23  ;;  %v3595_v15 = vld [vmem:[%s9455_s3 + $0x320] sm:$0xff]  ;;  %v6828_v23 = vld [vmem:[%s9455_s3 + $0x328] ss:$0 sm:$0xff] }
0x2588   : > { %v7738_v6 = vpack.c.bf16 %v3595_v15, %v3594_v4  ;;  %v7753_v4 = vpack.c.bf16 %v4468_v0, %v4467_v59  ;;  %v4470_v15 = vld [vmem:[%s9455_s3 + $0x398] sm:$0xff] }
0x2589   : > { %v3843_v9 = vmul.f32 1.442695, %v3842_v24 }
0x258a   : > { %v4006_v25 = vpop.xlane.xlu0 %4005  ;;  %7739 = vmatpush3.bf16.msra.mxu0 %v7738_v6  ;;  %v7756_v6 = vpack.c.bf16 %v4470_v15, %v4469_v5 }
0x258b   : > { %7935 = vpow2.f32 %v3843_v9  ;;  %v4007_v26 = vsub.f32 %v4001_v10, %v4006_v25  ;;  %7746 = vmatprep.subr.bf16.mxu0 %v8063_v3 }
0x258d   : > { %v4008_v35 = vmul.f32 1.442695, %v4007_v26 }
0x258e   : > { %v4171_v32 = vpop.xlane.xlu0 %4170 }
0x258f   : > { %7937 = vpow2.f32 %v4008_v35  ;;  %v4172_v33 = vsub.f32 %v4166_v17, %v4171_v32 }
0x2591   : > { %v4173_v34 = vmul.f32 1.442695, %v4172_v33  ;;  %v4372_v33 = vld [vmem:[%s9455_s3 + $0x338] sm:$0xff] }
0x2593   : > { %7939 = vpow2.f32 %v4173_v34  ;;  %v4373_v34 = vld [vmem:[%s9455_s3 + $0x340] sm:$0xff] }
0x2595   : > { %v7936_v27 = vpop.eup %7935 }
0x2596   : > { %v3845_v28 = vsel %vm488_vm3, %v7936_v27, 0.0 }
0x2597   : > { %3846 = vadd.xlane.f32.xlu1 %v3845_v28 }
0x2599   : > { %v7938_v29 = vpop.eup %7937 }
0x259a   : > { %v4010_v30 = vsel %vm488_vm3, %v7938_v29, 0.0 }
0x259b   : > { %4011 = vadd.xlane.f32.xlu0 %v4010_v30 }
0x259d   : > { %v7940_v37 = vpop.eup %7939 }
0x259e   : > { %v4175_v39 = vsel %vm488_vm3, %v7940_v37, 0.0 }
0x25a8   : > { %3850 = vrot.lane.b32.xlu1 %v8851_v18, %s9510_s7 }
0x25ac   : > { %4015 = vrot.lane.b32.xlu1 %v8851_v18, %s9515_s16 }
0x25b1   : > { %3685 = vrot.lane.b32.xlu0 %v8851_v18, %s9511_s17  ;;  %v3682_v42 = vpop.xlane.xlu0 %3681 }
0x25b2   : > { %7941 = vrcp.f32 %v3682_v42 }
0x25bc   : > { %v7942_v31 = vpop.eup %7941 }
0x25bd   : > { %v3684_v40 = vmul.f32 %v7942_v31, %v7934_v21 }
0x25d0   : > { %4176 = vadd.xlane.f32.xlu1 %v4175_v39  ;;  %v4375_v39 = vld [vmem:[%s9455_s3 + $0x350] sm:$0xff] }
0x25e1   : > { %4180 = vrot.lane.b32.xlu1 %v8851_v18, %s9516_s25 }
0x2624   : > { %v3847_v44 = vpop.xlane.xlu1 %3846 }
0x2625   : > { %7943 = vrcp.f32 %v3847_v44 }
0x2628   : > { %v4012_v45 = vpop.xlane.xlu0 %4011  ;;  %v3851_v48 = vpop.permute.xlu1 %3850 }
0x2629   : > { %7945 = vrcp.f32 %v4012_v45 }
0x262c   : > { %v3686_v50 = vpop.permute.xlu0 %3685  ;;  %v4016_v41 = vpop.permute.xlu1 %4015 }
0x262d   : > { %7374 = vmatpush3.msra.mxu1 %v3686_v50 }
0x262e   : > { %7376 = vmatmul.mubr.msk.f32.vlgmr.msra.gmra.mrb[48].mxu1 %vm488_vm3, %v3684_v40  ;;  %7383 = vmatprep.subr.mxu1 %v8065_v54  ;;  %v4365_v40 = vrot.slane %v8889_v38, %v8444_v1 }
0x262f   : > { %v7944_v46 = vpop.eup %7943  ;;  %7384 = vmatpush3.msra.mxu1 %v3851_v48  ;;  %7385 = vmatprep.mubr.msk.f32.mxu1 %vm8064_vm2, %v8065_v54 }
0x2630   : > { %v3849_v51 = vmul.f32 %v7944_v46, %v7936_v27  ;;  %7393 = vmatprep.subr.mxu1 %v8065_v54  ;;  %v4370_v46 = vrot.slane %v8889_v38, %v8447_v2 }
0x2632   : > { %7386 = vmatmul.mubr.msk.f32.vlgmr.msra.gmra.mrb[50].mxu1 %vm488_vm3, %v3849_v51 }
0x2633   : > { %v7946_v53 = vpop.eup %7945  ;;  %7394 = vmatpush3.msra.mxu1 %v4016_v41  ;;  %7395 = vmatprep.mubr.msk.f32.mxu1 %vm8064_vm2, %v8065_v54 }
0x2634   : > { %v4014_v49 = vmul.f32 %v7946_v53, %v7938_v29  ;;  %7403 = vmatprep.subr.mxu1 %v8065_v54  ;;  %v4463_v53 = vld [vmem:[%s9455_s3 + $0x360] sm:$0xff] }
0x2636   : > { %7396 = vmatmul.mubr.msk.f32.vlgmr.msra.gmra.mrb[52].mxu1 %vm488_vm3, %v4014_v49  ;;  %v4464_v49 = vld [vmem:[%s9455_s3 + $0x368] sm:$0xff] }
0x2637   : > { %7405 = vmatprep.mubr.msk.f32.mxu1 %vm8064_vm2, %v8065_v54 }
0x265d   : > { %v4177_v55 = vpop.xlane.xlu1 %4176 }
0x265e   : > { %7947 = vrcp.f32 %v4177_v55  ;;  %v7747_v55 = vpack.c.bf16 %v4464_v49, %v4463_v53  ;;  %v6834_v49 = vld [vmem:[%s9455_s3 + $0x3c8] ss:$0 sm:$0xff] }
0x2661   : > { %v4181_v43 = vpop.permute.xlu1 %4180 }
0x2662   : > { %7404 = vmatpush3.msra.mxu1 %v4181_v43  ;;  %v4465_v43 = vld [vmem:[%s9455_s3 + $0x370] sm:$0xff] }
0x2663   : > { %7740 = vmatprep.subr.bf16.mxu1 %v8063_v3 }
0x2668   : > { %v7948_v56 = vpop.eup %7947 }
0x2669   : > { %v4179_v57 = vmul.f32 %v7948_v56, %v7940_v37  ;;  %v7741_v37 = vpack.c.bf16 %v4373_v34, %v4372_v33  ;;  %v4466_v56 = vld [vmem:[%s9455_s3 + $0x378] sm:$0xff]  ;;  %v4575_v33 = vld [vmem:[%s9455_s3 + $0x3b0] sm:$0xff] }
0x266b   : > { %7406 = vmatmul.mubr.msk.f32.vlgmr.msra.gmra.mrb[54].mxu1 %vm488_vm3, %v4179_v57  ;;  %v7750_v57 = vpack.c.bf16 %v4466_v56, %v4465_v43 }
0x266c   : > { %7427 = vmatprep.mubr.msk.f32.mxu1 %vm8064_vm2, %v8065_v54  ;;  %7742 = vmatpush3.bf16.msra.mxu1 %v7741_v37  ;;  %v4576_v37 = vld [vmem:[%s9455_s3 + $0x3b8] sm:$0xff] }
0x266d   : > { %7743 = vmatprep.subr.bf16.mxu1 %v8063_v3 }
0x2701   : > { %v3757_v7 = vpop.f32.mrb[48].mxu1 }
0x2702   : > { %v7377_v8 = vpop.f32.mrb[49].mxu1 }
0x2705   : > { %v3922_v10 = vpop.f32.mrb[50].mxu1 }
0x2706   : > { %4257 = vrot.lane.b32.xlu0 %v3922_v10, %s9506_s10  ;;  %v7387_v12 = vpop.f32.mrb[51].mxu1 }
0x2709   : > { %v4087_v13 = vpop.f32.mrb[52].mxu1 }
0x270a   : > { %4261 = vrot.lane.b32.xlu1 %v4087_v13, %s9507_s12  ;;  %v7397_v62 = vpop.f32.mrb[53].mxu1 }
0x273e   : > { %v4252_v17 = vpop.f32.mrb[54].mxu1 }
0x273f   : > { %4265 = vrot.lane.b32.xlu0 %v4252_v17, %s9508_s14  ;;  %v7407_v11 = vpop.f32.mrb[55].mxu1 }
0x2778   : > { %v4258_v58 = vpop.permute.xlu0 %4257 }
0x2779   : > { %v4268_v20 = vsel %vm488_vm3, %v3757_v7, %v4258_v58  ;;  %v6830_v7 = vld [vmem:[%s9455_s3 + $0x358] ss:$0 sm:$0xff] }
0x277c   : > { %v4262_v19 = vpop.permute.xlu1 %4261 }
0x277d   : > { %v4269_v36 = vsel %vm1159_vm5, %v4268_v20, %v4262_v19 }
0x27b1   : > { %v4266_v21 = vpop.permute.xlu0 %4265 }
0x27b2   : > { %v4270_v22 = vsel %vm1161_vm6, %v4269_v36, %v4266_v21 }
0x27b3   : > { %7417 = vmatmul.mubr.msk.f32.vlgmr.msra.gmra.mrb[34].mxu0 %vm372_vm1, %v4270_v22  ;;  %v6832_v22 = vld [vmem:[%s9455_s3 + $0x3a0] ss:$0 sm:$0xff] }
0x27b4   : > { %7446 = vmatprep.mubr.msk.f32.mxu0 %vm8064_vm2, %v8065_v54  ;;  %7748 = vmatpush3.bf16.msra.mxu0 %v7747_v55 }
0x27b5   : > { %7749 = vmatprep.subr.bf16.mxu0 %v8063_v3 }
0x27b8   : > { %7751 = vmatpush3.bf16.msra.mxu0 %v7750_v57 }
0x27b9   : > { %7752 = vmatprep.subr.bf16.mxu0 %v8063_v3 }
0x27bc   : > { %7754 = vmatpush3.bf16.msra.mxu0 %v7753_v4 }
0x27bd   : > { %7755 = vmatprep.subr.bf16.mxu0 %v8063_v3 }
0x27c0   : > { %7757 = vmatpush3.bf16.msra.mxu0 %v7756_v6 }
0x27c1   : > { %7470 = vmatprep.subr.mxu0 %v8065_v54 }
0x2886   : > { %v4344_v24 = vpop.f32.mrb[34].mxu0 }
0x2887   : > { %v4345_v9 = vadd.f32 %v6828_v23, %v4344_v24  ;;  %v7418_v25 = vpop.f32.mrb[35].mxu0 }
0x2889   : > { %v4348_v26 = vadd.f32 %v4345_v9, %v8895_v47  ;;  %v4374_v47 = vld [vmem:[%s9455_s3 + $0x348] sm:$0xff] }
0x288a   : > { %v7744_v42 = vpack.c.bf16 %v4375_v39, %v4374_v47  ;;  %v4577_v47 = vld [vmem:[%s9455_s3 + $0x3c0] sm:$0xff] }
0x288b   : > { %v4349_v35 = vsel %vm372_vm1, %v4348_v26, 0.0  ;;  %v7762_v39 = vpack.c.bf16 %v4577_v47, %v4576_v37 }
0x288c   : > { %4350 = vadd.xlane.f32.xlu1 %v4349_v35  ;;  %7745 = vmatpush3.bf16.msra.mxu1 %v7744_v42 }
0x288d   : > { %7758 = vmatprep.subr.bf16.mxu1 %v8063_v3 }
0x2919   : > { %v4351_v27 = vpop.xlane.xlu1 %4350 }
0x291a   : > { %v4352_v28 = vmul.f32 0.03125, %v4351_v27 }
0x291c   : > { %v4353_v29 = vsub.f32 %v4348_v26, %v4352_v28 }
0x291e   : > { %v4354_v30 = vmul.f32 %v4353_v29, %v4353_v29 }
0x2920   : > { %v4355_v32 = vsel %vm372_vm1, %v4354_v30, 0.0 }
0x2921   : > { %4356 = vadd.xlane.f32.xlu0 %v4355_v32  ;;  %v4574_v32 = vld [vmem:[%s9455_s3 + $0x3a8] sm:$0xff] }
0x2922   : > { %v7759_v34 = vpack.c.bf16 %v4575_v33, %v4574_v32 }
0x29ae   : > { %v4357_v44 = vpop.xlane.xlu0 %4356 }
0x29af   : > { %v4358_v45 = vmul.f32 0.03125, %v4357_v44 }
0x29b1   : > { %v4359_v31 = vadd.f32 1e-05, %v4358_v45 }
0x29b3   : > { %7949 = vrsqrt.f32 %v4359_v31  ;;  %v4565_v31 = vsub.s32 4, %v8288_v60 }
0x29bd   : > { %v7950_v48 = vpop.eup %7949 }
0x29be   : > { %v4361_v50 = vmul.f32 %v7950_v48, %v4353_v29  ;;  %v4566_v48 = vrot.slane %v8889_v38, %v4565_v31 }
0x29c0   : > { %v4366_v51 = vmul.f32 %v4365_v40, %v4361_v50  ;;  %v4570_v40 = vsub.s32 5, %v8288_v60  ;;  %v6870_v60 = vld [vmem:[%s9455_s3 + $0x4e0] ss:$0 sm:$0xff] }
0x29c2   : > { %v4371_v41 = vadd.f32 %v4370_v46, %v4366_v51  ;;  %v4571_v51 = vrot.slane %v8889_v38, %v4570_v40 }
0x29c4   : > { %7428 = vmatmul.mubr.msk.f32.vlgmr.msra.gmra.mrb[56].mxu1 %vm372_vm1, %v4371_v41 }
0x29c5   : > { %7457 = vmatprep.mubr.msk.f32.mxu1 %vm8064_vm2, %v8065_v54  ;;  %7760 = vmatpush3.bf16.msra.mxu1 %v7759_v34 }
0x29c6   : > { %7761 = vmatprep.subr.bf16.mxu1 %v8063_v3 }
0x29c9   : > { %7763 = vmatpush3.bf16.msra.mxu1 %v7762_v39 }
0x29ca   : > { %7460 = vmatprep.subr.mxu1 %v8065_v54 }
0x2a97   : > { %v4450_v8 = vpop.f32.mrb[56].mxu1 }
0x2a98   : > { %v4451_v10 = vadd.f32 %v6830_v7, %v4450_v8  ;;  %v7429_v12 = vpop.f32.mrb[57].mxu1 }
0x2a9a   : > { %v4454_v13 = vmul.f32 %v4451_v10, %v4451_v10 }
0x2a9c   : > { %v4455_v62 = vmul.f32 %v4454_v13, %v4451_v10 }
0x2a9e   : > { %v4456_v17 = vmul.f32 0.044715, %v4455_v62 }
0x2aa0   : > { %v4457_v11 = vadd.f32 %v4456_v17, %v4451_v10 }
0x2aa2   : > { %v4458_v58 = vmul.f32 0.7978846, %v4457_v11 }
0x2aa4   : > { %7951 = vtanh.f32 %v4458_v58 }
0x2aae   : > { %v7952_v19 = vpop.eup %7951 }
0x2aaf   : > { %v4460_v20 = vadd.f32 1.0, %v7952_v19 }
0x2ab1   : > { %v4461_v36 = vmul.f32 0.5, %v4460_v20 }
0x2ab3   : > { %v4462_v21 = vmul.f32 %v4461_v36, %v4451_v10 }
0x2ab5   : > { %7447 = vmatmul.mubr.msk.f32.vlgmr.msra.gmra.mrb[36].mxu0 %vm293_vm0, %v4462_v21 }
0x2ab6   : > { %7472 = vmatprep.mubr.msk.f32.mxu0 %vm8064_vm2, %v8065_v54 }
0x2b88   : > { %v4545_v23 = vpop.f32.mrb[36].mxu0 }
0x2b89   : > { %v4546_v24 = vadd.f32 %v6832_v22, %v4545_v23  ;;  %v7448_v9 = vpop.f32.mrb[37].mxu0 }
0x2b8b   : > { %v4549_v25 = vadd.f32 %v4546_v24, %v4371_v41 }
0x2b8d   : > { %v4550_v26 = vsel %vm372_vm1, %v4549_v25, 0.0 }
0x2b8e   : > { %4551 = vadd.xlane.f32.xlu0 %v4550_v26 }
0x2c1b   : > { %v4552_v35 = vpop.xlane.xlu0 %4551 }
0x2c1c   : > { %v4553_v27 = vmul.f32 0.03125, %v4552_v35 }
0x2c1e   : > { %v4554_v28 = vsub.f32 %v4549_v25, %v4553_v27 }
0x2c20   : > { %v4555_v29 = vmul.f32 %v4554_v28, %v4554_v28 }
0x2c22   : > { %v4556_v30 = vsel %vm372_vm1, %v4555_v29, 0.0 }
0x2c23   : > { %4557 = vadd.xlane.f32.xlu0 %v4556_v30 }
0x2cb0   : > { %v4558_v42 = vpop.xlane.xlu0 %4557 }
0x2cb1   : > { %v4559_v44 = vmul.f32 0.03125, %v4558_v42 }
0x2cb3   : > { %v4560_v45 = vadd.f32 1e-05, %v4559_v44 }
0x2cb5   : > { %7953 = vrsqrt.f32 %v4560_v45 }
0x2cbf   : > { %v7954_v50 = vpop.eup %7953 }
0x2cc0   : > { %v4562_v46 = vmul.f32 %v7954_v50, %v4554_v28 }
0x2cc2   : > { %v4567_v41 = vmul.f32 %v4566_v48, %v4562_v46 }
0x2cc4   : > { %v9072_v53 = vadd.f32 %v4571_v51, %v4567_v41 }
0x2cc6   : > { %7458 = vmatmul.mubr.msk.f32.vlgmr.msra.gmra.mrb[58].mxu1 %vm372_vm1, %v9072_v53 }
0x2cc7   : > { %7462 = vmatprep.mubr.msk.f32.mxu1 %vm8064_vm2, %v8065_v54 }
0x2d99   : > { %v4652_v55 = vpop.f32.mrb[58].mxu1 }
0x2d9a   : > { %v9081_v43 = vadd.f32 %v6834_v49, %v4652_v55  ;;  %v7459_v56 = vpop.f32.mrb[59].mxu1 }
0x2d9c   : > { %4829 = vrot.lane.b32.xlu0 %v9081_v43, %s9510_s7  ;;  %4663 = vrot.lane.b32.xlu1 %v9081_v43, %s9511_s17  ;;  %v4661_v38 = vmul.f32 0.35355338, %v9081_v43  ;;  %s6874_s7 = sshll.u32 %s8135_s22, 7  ;;  %s6641_s17 = sshll.u32 %s244_s0, 4  ;;  %s6642_s17 = int_to_ptr.vmem [resolvable:$true] %s6641_s17 }
0x2da0   : > { %5159 = vrot.lane.b32.xlu0 %v9081_v43, %s9516_s25  ;;  %4994 = vrot.lane.b32.xlu1 %v9081_v43, %s9515_s16  ;;  %s9410_s25 = scalar_lea.hbm %s9456_s4, %s6874_s7 }
0x2da4   : > { %4827 = vrot.lane.b32.xlu1 %v4661_v38, %s9513_s23 }
0x2da8   : > { %4992 = vrot.lane.b32.xlu1 %v4661_v38, %s9512_s30 }
0x2dac   : > { %5157 = vrot.lane.b32.xlu1 %v4661_v38, %s9514_s15 }
0x2e0e   : > { %v4830_v57 = vpop.permute.xlu0 %4829  ;;  %v4664_v59 = vpop.permute.xlu1 %4663 }
0x2e0f   : > { %7461 = vmatpush3.xpose.msk.msra.mxu1 %vm488_vm3, %v4664_v59  ;;  %7471 = vmatpush3.xpose.msk.msra.mxu0 %vm488_vm3, %v4830_v57 }
0x2e10   : > { %7480 = vmatprep.subr.mxu0 %v8065_v54  ;;  %7465 = vmatprep.subr.mxu1 %v8065_v54 }
0x2e12   : > { %v4995_v0 = vpop.permute.xlu1 %4994  ;;  %7463 = vmatmul.mubr.msk.f32.vlgmr.msra.gmra.mrb[60].mxu1 %vm488_vm3, %v4661_v38  ;;  %v5160_v15 = vpop.permute.xlu0 %5159 }
0x2e13   : > { %7467 = vmatprep.mubr.msk.f32.mxu1 %vm8064_vm2, %v8065_v54 }
0x2e16   : > { %v4828_v4 = vpop.permute.xlu1 %4827 }
0x2e17   : > { %7473 = vmatmul.mubr.msk.f32.vlgmr.msra.gmra.mrb[38].mxu0 %vm488_vm3, %v4828_v4 }
0x2e18   : > { %7481 = vmatpush3.xpose.msk.msra.mxu0 %vm488_vm3, %v4995_v0  ;;  %7482 = vmatprep.mubr.msk.f32.mxu0 %vm8064_vm2, %v8065_v54 }
0x2e19   : > { %7490 = vmatprep.subr.mxu0 %v8065_v54 }
0x2e1a   : > { %v4993_v5 = vpop.permute.xlu1 %4992 }
0x2e1b   : > { %7483 = vmatmul.mubr.msk.f32.vlgmr.msra.gmra.mrb[40].mxu0 %vm488_vm3, %v4993_v5 }
0x2e1c   : > { %7491 = vmatpush3.xpose.msk.msra.mxu0 %vm488_vm3, %v5160_v15  ;;  %7492 = vmatprep.mubr.msk.f32.mxu0 %vm8064_vm2, %v8065_v54 }
0x2e1d   : > { %7764 = vmatprep.subr.bf16.mxu0 %v8063_v3 }
0x2e1e   : > { %v5158_v6 = vpop.permute.xlu1 %5157 }
0x2e1f   : > { %7493 = vmatmul.mubr.msk.f32.vlgmr.msra.gmra.mrb[42].mxu0 %vm488_vm3, %v5158_v6 }
0x2e20   : > { %7508 = vmatprep.mubr.msk.f32.mxu0 %vm8064_vm2, %v8065_v54 }
0x2ee5   : > { %v4736_v7 = vpop.f32.mrb[60].mxu1 }
0x2ee6   : > { %v4737_v8 = vadd.f32 %v4736_v7, %v8790_v52  ;;  %v7464_v10 = vpop.f32.mrb[61].mxu1 }
0x2ee7   : > { %v4657_v10 = vld [vmem:[%s9455_s3 + $0x3d8] sm:$0xff] }
0x2ee8   : > { %v4740_v12 = vsel %vm488_vm3, %v4737_v8, -inf }
0x2ee9   : > { %4741 = vmax.xlane.f32.xlu0 %v4740_v12  ;;  %v4658_v12 = vld [vmem:[%s9455_s3 + $0x3e0] sm:$0xff] }
0x2eea   : > { %v4901_v13 = vpop.f32.mrb[38].mxu0 }
0x2eeb   : > { %v4902_v62 = vadd.f32 %v4901_v13, %v8790_v52  ;;  %v7474_v17 = vpop.f32.mrb[39].mxu0 }
0x2eed   : > { %v4905_v11 = vsel %vm488_vm3, %v4902_v62, -inf }
0x2eee   : > { %4906 = vmax.xlane.f32.xlu1 %v4905_v11  ;;  %v5066_v58 = vpop.f32.mrb[40].mxu0 }
0x2eef   : > { %v5067_v19 = vadd.f32 %v5066_v58, %v8790_v52  ;;  %v7484_v20 = vpop.f32.mrb[41].mxu0 }
0x2ef1   : > { %v5070_v36 = vsel %vm488_vm3, %v5067_v19, -inf }
0x2ef2   : > { %v5231_v21 = vpop.f32.mrb[42].mxu0  ;;  %5071 = vmax.xlane.f32.xlu0 %v5070_v36 }
0x2ef3   : > { %v5232_v22 = vadd.f32 %v5231_v21, %v8790_v52  ;;  %v7494_v23 = vpop.f32.mrb[43].mxu0 }
0x2ef5   : > { %v5235_v24 = vsel %vm488_vm3, %v5232_v22, -inf }
0x2ef6   : > { %5236 = vmax.xlane.f32.xlu0 %v5235_v24 }
0x2f76   : > { %v4742_v9 = vpop.xlane.xlu0 %4741 }
0x2f77   : > { %v4743_v25 = vsub.f32 %v4737_v8, %v4742_v9  ;;  %v4656_v8 = vld [vmem:[%s9455_s3 + $0x3d0] sm:$0xff] }
0x2f78   : > { %v7765_v13 = vpack.c.bf16 %v4657_v10, %v4656_v8 }
0x2f79   : > { %v4744_v26 = vmul.f32 1.442695, %v4743_v25 }
0x2f7a   : > { %7766 = vmatpush3.bf16.msra.mxu0 %v7765_v13 }
0x2f7b   : > { %7955 = vpow2.f32 %v4744_v26  ;;  %v4907_v35 = vpop.xlane.xlu1 %4906  ;;  %7767 = vmatprep.subr.bf16.mxu0 %v8063_v3 }
0x2f7c   : > { %v4908_v27 = vsub.f32 %v4902_v62, %v4907_v35  ;;  %v4659_v62 = vld [vmem:[%s9455_s3 + $0x3e8] sm:$0xff] }
0x2f7d   : > { %v7768_v17 = vpack.c.bf16 %v4659_v62, %v4658_v12 }
0x2f7e   : > { %v4909_v28 = vmul.f32 1.442695, %v4908_v27 }
0x2f7f   : > { %v5072_v29 = vpop.xlane.xlu0 %5071  ;;  %7769 = vmatpush3.bf16.msra.mxu0 %v7768_v17 }
0x2f80   : > { %7957 = vpow2.f32 %v4909_v28  ;;  %v5073_v30 = vsub.f32 %v5067_v19, %v5072_v29  ;;  %7522 = vmatprep.subr.mxu0 %v8065_v54  ;;  %v6848_v28 = vld [vmem:[%s9455_s3 + $0x3f0] ss:$0 sm:$0xff] }
0x2f82   : > { %v5074_v32 = vmul.f32 1.442695, %v5073_v30 }
0x2f83   : > { %v5237_v42 = vpop.xlane.xlu0 %5236 }
0x2f84   : > { %7959 = vpow2.f32 %v5074_v32  ;;  %v5238_v44 = vsub.f32 %v5232_v22, %v5237_v42 }
0x2f85   : > { %v7956_v33 = vpop.eup %7955 }
0x2f86   : > { %v4746_v34 = vsel %vm488_vm3, %v7956_v33, 0.0  ;;  %v5239_v45 = vmul.f32 1.442695, %v5238_v44  ;;  %v5439_v44 = vld [vmem:[%s9455_s3 + $0x400] sm:$0xff] }
0x2f87   : > { %4747 = vadd.xlane.f32.xlu0 %v4746_v34 }
0x2f88   : > { %7961 = vpow2.f32 %v5239_v45 }
0x2f8a   : > { %v7958_v52 = vpop.eup %7957 }
0x2f8b   : > { %v4911_v37 = vsel %vm488_vm3, %v7958_v52, 0.0 }
0x2f8c   : > { %4912 = vadd.xlane.f32.xlu1 %v4911_v37 }
0x2f8e   : > { %v7960_v47 = vpop.eup %7959 }
0x2f8f   : > { %v5076_v39 = vsel %vm488_vm3, %v7960_v47, 0.0 }
0x2f90   : > { %5077 = vadd.xlane.f32.xlu0 %v5076_v39 }
0x2f92   : > { %v7962_v48 = vpop.eup %7961 }
0x2f93   : > { %v5241_v50 = vsel %vm488_vm3, %v7962_v48, 0.0 }
0x2f9d   : > { %4916 = vrot.lane.b32.xlu1 %v9081_v43, %s9505_s9 }
0x2fa1   : > { %5081 = vrot.lane.b32.xlu1 %v9081_v43, %s9503_s26 }
0x2fa6   : > { %4751 = vrot.lane.b32.xlu0 %v9081_v43, %s9502_s11 }
0x2fc5   : > { %5242 = vadd.xlane.f32.xlu1 %v5241_v50  ;;  %v5441_v50 = vld [vmem:[%s9455_s3 + $0x410] sm:$0xff] }
0x2fd6   : > { %5246 = vrot.lane.b32.xlu1 %v9081_v43, %s9504_s8 }
0x3014   : > { %v4748_v46 = vpop.xlane.xlu0 %4747 }
0x3015   : > { %7963 = vrcp.f32 %v4748_v46 }
0x3019   : > { %v4913_v51 = vpop.xlane.xlu1 %4912 }
0x301a   : > { %7965 = vrcp.f32 %v4913_v51 }
0x301d   : > { %v5078_v41 = vpop.xlane.xlu0 %5077  ;;  %v4917_v56 = vpop.permute.xlu1 %4916 }
0x301e   : > { %7967 = vrcp.f32 %v5078_v41 }
0x301f   : > { %v7964_v49 = vpop.eup %7963 }
0x3020   : > { %v4750_v55 = vmul.f32 %v7964_v49, %v7956_v33 }
0x3021   : > { %v4752_v38 = vpop.permute.xlu0 %4751  ;;  %v5082_v59 = vpop.permute.xlu1 %5081 }
0x3022   : > { %7466 = vmatpush3.msra.mxu1 %v4752_v38 }
0x3023   : > { %7468 = vmatmul.mubr.msk.f32.vlgmr.msra.gmra.mrb[62].mxu1 %vm488_vm3, %v4750_v55  ;;  %7475 = vmatprep.subr.mxu1 %v8065_v54 }
0x3024   : > { %v7966_v57 = vpop.eup %7965  ;;  %7476 = vmatpush3.msra.mxu1 %v4917_v56  ;;  %7477 = vmatprep.mubr.msk.f32.mxu1 %vm8064_vm2, %v8065_v54  ;;  %v9207_v56 = vld [vmem:[%s9455_s3 + $0x448] sm:$0x3f] }
0x3025   : > { %v4915_v43 = vmul.f32 %v7966_v57, %v7958_v52  ;;  %7485 = vmatprep.subr.mxu1 %v8065_v54  ;;  %v5431_v38 = vrot.slane %v9207_v56, %v8291_v61 }
0x3027   : > { %7478 = vmatmul.mubr.msk.f32.vlgmr.msra.gmra.mrb[64].mxu1 %vm488_vm3, %v4915_v43 }
0x3028   : > { %v7968_v0 = vpop.eup %7967  ;;  %7486 = vmatpush3.msra.mxu1 %v5082_v59  ;;  %7487 = vmatprep.mubr.msk.f32.mxu1 %vm8064_vm2, %v8065_v54  ;;  %v5436_v59 = vrot.slane %v9207_v56, %v8299_v63 }
0x3029   : > { %v5080_v4 = vmul.f32 %v7968_v0, %v7960_v47  ;;  %7495 = vmatprep.subr.mxu1 %v8065_v54 }
0x302b   : > { %7488 = vmatmul.mubr.msk.f32.vlgmr.msra.gmra.mrb[66].mxu1 %vm488_vm3, %v5080_v4 }
0x302c   : > { %7497 = vmatprep.mubr.msk.f32.mxu1 %vm8064_vm2, %v8065_v54 }
0x3052   : > { %v5243_v5 = vpop.xlane.xlu1 %5242 }
0x3053   : > { %7969 = vrcp.f32 %v5243_v5  ;;  %v6850_v5 = vld [vmem:[%s9455_s3 + $0x418] ss:$0 sm:$0xff] }
0x3056   : > { %v5247_v15 = vpop.permute.xlu1 %5246 }
0x3057   : > { %7496 = vmatpush3.msra.mxu1 %v5247_v15 }
0x3058   : > { %7770 = vmatprep.subr.bf16.mxu1 %v8063_v3 }
0x305d   : > { %v7970_v6 = vpop.eup %7969 }
0x305e   : > { %v5245_v7 = vmul.f32 %v7970_v6, %v7962_v48  ;;  %v5440_v48 = vld [vmem:[%s9455_s3 + $0x408] sm:$0xff] }
0x305f   : > { %v7774_v46 = vpack.c.bf16 %v5441_v50, %v5440_v48 }
0x3060   : > { %7498 = vmatmul.mubr.msk.f32.vlgmr.msra.gmra.mrb[68].mxu1 %vm488_vm3, %v5245_v7 }
0x3061   : > { %7519 = vmatprep.mubr.msk.f32.mxu1 %vm8064_vm2, %v8065_v54 }
0x30f6   : > { %v4823_v11 = vpop.f32.mrb[62].mxu1 }
0x30f7   : > { %v7469_v58 = vpop.f32.mrb[63].mxu1 }
0x30fa   : > { %v4988_v19 = vpop.f32.mrb[64].mxu1 }
0x30fb   : > { %5323 = vrot.lane.b32.xlu0 %v4988_v19, %s9506_s10  ;;  %v7479_v20 = vpop.f32.mrb[65].mxu1 }
0x30fe   : > { %v5153_v36 = vpop.f32.mrb[66].mxu1 }
0x30ff   : > { %5327 = vrot.lane.b32.xlu1 %v5153_v36, %s9507_s12  ;;  %v7489_v21 = vpop.f32.mrb[67].mxu1 }
0x3133   : > { %v5318_v22 = vpop.f32.mrb[68].mxu1 }
0x3134   : > { %5331 = vrot.lane.b32.xlu0 %v5318_v22, %s9508_s14  ;;  %v7499_v23 = vpop.f32.mrb[69].mxu1 }
0x316d   : > { %v5324_v24 = vpop.permute.xlu0 %5323 }
0x316e   : > { %v5334_v25 = vsel %vm488_vm3, %v4823_v11, %v5324_v24 }
0x3171   : > { %v5328_v9 = vpop.permute.xlu1 %5327 }
0x3172   : > { %v5335_v26 = vsel %vm1159_vm5, %v5334_v25, %v5328_v9 }
0x31a6   : > { %v5332_v35 = vpop.permute.xlu0 %5331 }
0x31a7   : > { %v5336_v27 = vsel %vm1161_vm6, %v5335_v26, %v5332_v35 }
0x31a8   : > { %7509 = vmatmul.mubr.msk.f32.vlgmr.msra.gmra.mrb[44].mxu0 %vm372_vm1, %v5336_v27 }
0x31a9   : > { %7524 = vmatprep.mubr.msk.f32.mxu0 %vm8064_vm2, %v8065_v54 }
0x327b   : > { %v5410_v29 = vpop.f32.mrb[44].mxu0 }
0x327c   : > { %v5411_v30 = vadd.f32 %v6848_v28, %v5410_v29  ;;  %v7510_v32 = vpop.f32.mrb[45].mxu0 }
0x327e   : > { %v5414_v33 = vadd.f32 %v5411_v30, %v9072_v53  ;;  %v5438_v53 = vld [vmem:[%s9455_s3 + $0x3f8] sm:$0xff] }
0x327f   : > { %v7771_v45 = vpack.c.bf16 %v5439_v44, %v5438_v53 }
0x3280   : > { %v5415_v34 = vsel %vm372_vm1, %v5414_v33, 0.0 }
0x3281   : > { %5416 = vadd.xlane.f32.xlu1 %v5415_v34  ;;  %7772 = vmatpush3.bf16.msra.mxu1 %v7771_v45 }
0x3282   : > { %7773 = vmatprep.subr.bf16.mxu1 %v8063_v3 }
0x3285   : > { %7775 = vmatpush3.bf16.msra.mxu1 %v7774_v46 }
0x3286   : > { %7527 = vmatprep.subr.mxu1 %v8065_v54 }
0x3292   : > { %5692 = vrot.lane.b32.xlu1 %v8851_v18, %s9505_s9 }
0x330e   : > { %v5417_v52 = vpop.xlane.xlu1 %5416 }
0x330f   : > { %v5418_v37 = vmul.f32 0.03125, %v5417_v52 }
0x3311   : > { %v5419_v47 = vsub.f32 %v5414_v33, %v5418_v37 }
0x3312   : > { %v5693_v8 = vpop.permute.xlu1 %5692 }
0x3313   : > { %v5420_v39 = vmul.f32 %v5419_v47, %v5419_v47 }
0x3315   : > { %v5421_v42 = vsel %vm372_vm1, %v5420_v39, 0.0 }
0x3316   : > { %5422 = vadd.xlane.f32.xlu0 %v5421_v42 }
0x332c   : > { %5526 = vrot.lane.b32.xlu0 %v8851_v18, %s9502_s11  ;;  %s7999_s11 = scalar_lea.vmem %s6642_s17, 128 }
0x332d   : > { %p8000_p11 = scmp.ne.s32.totalorder %s6642_s17, %s7999_s11 }
0x332f   : > { %p8001_p12 = pnand %p8000_p11, %p8152_p5 }
0x3330   : > { %5857 = vrot.lane.b32.xlu0 %v8851_v18, %s9503_s26  ;;  %s8083_s26 = smov [#allocation2]  }
0x3331   : > { %p8002_p13 = pneg %p8001_p12 }
0x3334   : > { %6022 = vrot.lane.b32.xlu0 %v8851_v18, %s9504_s8  ;;  %s8003_s8 = sshll.u32 %s8083_s26, 4  ;;  %s8004_s8 = int_to_ptr.vmem [resolvable:$false] %s8003_s8 }
0x3335   : > { %s8005_s22 = scalar_lea.vmem %s8004_s8, 256  ;;  %p8006_p0 = scmp.lt.s32.totalorder %s6642_s17, %s8004_s8 }
0x3336   : > { %p8007_p1 = scmp.lt.s32.totalorder %s8005_s22, %s7999_s11 }
0x3338   : > { %p8008_p2 = por %p8007_p1, %p8006_p0 }
0x333a   : > { %p8009_p3 = pnand %p8008_p2, %p8002_p13 }
0x33a3   : > { %v5423_v51 = vpop.xlane.xlu0 %5422 }
0x33a4   : > { %v5424_v41 = vmul.f32 0.03125, %v5423_v51 }
0x33a6   : > { %v5425_v49 = vadd.f32 1e-05, %v5424_v41 }
0x33a7   : > { %v5527_v55 = vpop.permute.xlu0 %5526 }
0x33a8   : > { %7971 = vrsqrt.f32 %v5425_v49  ;;  %7523 = vmatpush3.xpose.msk.msra.mxu0 %vm488_vm3, %v5527_v55 }
0x33a9   : > { %7532 = vmatprep.subr.mxu0 %v8065_v54 }
0x33ab   : > { %v5858_v63 = vpop.permute.xlu0 %5857 }
0x33af   : > { %v6023_v13 = vpop.permute.xlu0 %6022 }
0x33b2   : > { %v7972_v57 = vpop.eup %7971 }
0x33b3   : > { %v5427_v43 = vmul.f32 %v7972_v57, %v5419_v47 }
0x33b5   : > { %v5432_v0 = vmul.f32 %v5431_v38, %v5427_v43 }
0x33b7   : > { %v9213_v4 = vadd.f32 %v5436_v59, %v5432_v0 }
0x33b9   : > { %7520 = vmatmul.mubr.msk.f32.vlgmr.msra.gmra.mrb[70].mxu1 %vm372_vm1, %v9213_v4 }
0x33ba   : > { %7529 = vmatprep.mubr.msk.f32.mxu1 %vm8064_vm2, %v8065_v54 }
0x348c   : > { %v5516_v15 = vpop.f32.mrb[70].mxu1 }
0x348d   : > { %v5517_v61 = vadd.f32 %v6850_v5, %v5516_v15  ;;  %v7521_v6 = vpop.f32.mrb[71].mxu1 }
0x348f   : > { %v5525_v7 = vmul.f32 0.35355338, %v5517_v61 }
0x3491   : > { %5690 = vrot.lane.b32.xlu1 %v5525_v7, %s9513_s23  ;;  %7525 = vmatmul.mubr.msk.f32.vlgmr.msra.gmra.mrb[46].mxu0 %vm488_vm3, %v5525_v7 }
0x3492   : > { %7533 = vmatpush3.xpose.msk.msra.mxu0 %vm488_vm3, %v5693_v8  ;;  %7534 = vmatprep.mubr.msk.f32.mxu0 %vm8064_vm2, %v8065_v54 }
0x3493   : > { %7542 = vmatprep.subr.mxu0 %v8065_v54 }
0x3495   : > { %5855 = vrot.lane.b32.xlu1 %v5525_v7, %s9512_s30  ;;  %s8081_s30 = smov 32  }
0x3499   : > { %6020 = vrot.lane.b32.xlu1 %v5525_v7, %s9514_s15 }
0x3503   : > { %v5691_v10 = vpop.permute.xlu1 %5690 }
0x3504   : > { %7535 = vmatmul.mubr.msk.f32.vlgmr.msra.gmra.mrb[48].mxu0 %vm488_vm3, %v5691_v10 }
0x3505   : > { %7543 = vmatpush3.xpose.msk.msra.mxu0 %vm488_vm3, %v5858_v63  ;;  %7544 = vmatprep.mubr.msk.f32.mxu0 %vm8064_vm2, %v8065_v54 }
0x3506   : > { %7552 = vmatprep.subr.mxu0 %v8065_v54 }
0x3507   : > { %v5856_v12 = vpop.permute.xlu1 %5855 }
0x3508   : > { %7545 = vmatmul.mubr.msk.f32.vlgmr.msra.gmra.mrb[50].mxu0 %vm488_vm3, %v5856_v12 }
0x3509   : > { %7553 = vmatpush3.xpose.msk.msra.mxu0 %vm488_vm3, %v6023_v13  ;;  %7554 = vmatprep.mubr.msk.f32.mxu0 %vm8064_vm2, %v8065_v54  ;;  %v5520_v13 = vld [vmem:[%s9455_s3 + $0x420] sm:$0xff] }
0x350a   : > { %7776 = vmatprep.subr.bf16.mxu0 %v8063_v3 }
0x350b   : > { %v6021_v62 = vpop.permute.xlu1 %6020 }
0x350c   : > { %7555 = vmatmul.mubr.msk.f32.vlgmr.msra.gmra.mrb[52].mxu0 %vm488_vm3, %v6021_v62  ;;  %v5521_v62 = vld [vmem:[%s9455_s3 + $0x428] sm:$0xff] }
0x350d   : > { %7570 = vmatprep.mubr.msk.f32.mxu0 %vm8064_vm2, %v8065_v54 }
0x3564   : > { %v5599_v17 = vpop.f32.mrb[46].mxu0 }
0x3565   : > { %v5600_v11 = vadd.f32 %v5599_v17, %v8333_v16  ;;  %v7526_v58 = vpop.f32.mrb[47].mxu0  ;;  %v5522_v17 = vld [vmem:[%s9455_s3 + $0x430] sm:$0xff] }
0x3566   : > { %v5523_v58 = vld [vmem:[%s9455_s3 + $0x438] sm:$0xff] }
0x3567   : > { %v5603_v19 = vsel %vm488_vm3, %v5600_v11, -inf }
0x3568   : > { %5604 = vmax.xlane.f32.xlu0 %v5603_v19  ;;  %v7780_v19 = vpack.c.bf16 %v5523_v58, %v5522_v17 }
0x35d7   : > { %v5764_v20 = vpop.f32.mrb[48].mxu0 }
0x35d8   : > { %v5765_v36 = vadd.f32 %v5764_v20, %v8333_v16  ;;  %v7536_v21 = vpop.f32.mrb[49].mxu0 }
0x35da   : > { %v5768_v22 = vsel %vm488_vm3, %v5765_v36, -inf }
0x35db   : > { %5769 = vmax.xlane.f32.xlu1 %v5768_v22  ;;  %v5929_v23 = vpop.f32.mrb[50].mxu0 }
0x35dc   : > { %v5930_v24 = vadd.f32 %v5929_v23, %v8333_v16  ;;  %v7546_v9 = vpop.f32.mrb[51].mxu0 }
0x35de   : > { %v5933_v25 = vsel %vm488_vm3, %v5930_v24, -inf }
0x35df   : > { %5934 = vmax.xlane.f32.xlu0 %v5933_v25  ;;  %v6094_v26 = vpop.f32.mrb[52].mxu0 }
0x35e0   : > { %v6095_v35 = vadd.f32 %v6094_v26, %v8333_v16  ;;  %v7556_v27 = vpop.f32.mrb[53].mxu0 }
0x35e2   : > { %v6098_v28 = vsel %vm488_vm3, %v6095_v35, -inf }
0x35e3   : > { %6099 = vmax.xlane.f32.xlu0 %v6098_v28 }
0x35f5   : > { %v5605_v29 = vpop.xlane.xlu0 %5604 }
0x35f6   : > { %v5606_v30 = vsub.f32 %v5600_v11, %v5605_v29  ;;  %v7777_v11 = vpack.c.bf16 %v5521_v62, %v5520_v13  ;;  %v6866_v62 = vld [vmem:[%s9455_s3 + $0x470] ss:$0 sm:$0xff] }
0x35f8   : > { %v5607_v32 = vmul.f32 1.442695, %v5606_v30  ;;  %7778 = vmatpush3.bf16.msra.mxu0 %v7777_v11 }
0x35f9   : > { %7779 = vmatprep.subr.bf16.mxu0 %v8063_v3 }
0x35fa   : > { %7973 = vpow2.f32 %v5607_v32  ;;  %v6864_v32 = vld [vmem:[%s9455_s3 + $0x440] ss:$0 sm:$0xff] }
0x35fc   : > { %7781 = vmatpush3.bf16.msra.mxu0 %v7780_v19 }
0x35fd   : > { %7788 = vmatprep.subr.bf16.mxu0 %v8063_v3 }
0x3604   : > { %v7974_v33 = vpop.eup %7973 }
0x3605   : > { %v5609_v34 = vsel %vm488_vm3, %v7974_v33, 0.0 }
0x3606   : > { %5610 = vadd.xlane.f32.xlu0 %v5609_v34 }
0x3668   : > { %v5770_v52 = vpop.xlane.xlu1 %5769 }
0x3669   : > { %v5771_v37 = vsub.f32 %v5765_v36, %v5770_v52 }
0x366b   : > { %v5772_v47 = vmul.f32 1.442695, %v5771_v37 }
0x366c   : > { %v5935_v39 = vpop.xlane.xlu0 %5934 }
0x366d   : > { %7975 = vpow2.f32 %v5772_v47  ;;  %v5936_v42 = vsub.f32 %v5930_v24, %v5935_v39 }
0x366f   : > { %v5937_v53 = vmul.f32 1.442695, %v5936_v42 }
0x3670   : > { %v6100_v50 = vpop.xlane.xlu0 %6099 }
0x3671   : > { %7977 = vpow2.f32 %v5937_v53  ;;  %v6101_v46 = vsub.f32 %v6095_v35, %v6100_v50 }
0x3673   : > { %v6102_v51 = vmul.f32 1.442695, %v6101_v46  ;;  %v6304_v46 = vld [vmem:[%s9455_s3 + $0x468] sm:$0xff] }
0x3675   : > { %7979 = vpow2.f32 %v6102_v51 }
0x3677   : > { %v7976_v16 = vpop.eup %7975 }
0x3678   : > { %v5774_v44 = vsel %vm488_vm3, %v7976_v16, 0.0 }
0x3679   : > { %5775 = vadd.xlane.f32.xlu1 %v5774_v44 }
0x367b   : > { %v7978_v45 = vpop.eup %7977 }
0x367c   : > { %v5939_v48 = vsel %vm488_vm3, %v7978_v45, 0.0 }
0x367d   : > { %5940 = vadd.xlane.f32.xlu0 %v5939_v48  ;;  %v6302_v48 = vld [vmem:[%s9455_s3 + $0x458] sm:$0xff] }
0x367f   : > { %v7980_v41 = vpop.eup %7979 }
0x3680   : > { %v6104_v49 = vsel %vm488_vm3, %v7980_v41, 0.0 }
0x368a   : > { %5779 = vrot.lane.b32.xlu1 %v8851_v18, %s9508_s14 }
0x368e   : > { %5944 = vrot.lane.b32.xlu1 %v8851_v18, %s9507_s12 }
0x3693   : > { %5614 = vrot.lane.b32.xlu0 %v8851_v18, %s8081_s30  ;;  %v5611_v55 = vpop.xlane.xlu0 %5610 }
0x3694   : > { %7981 = vrcp.f32 %v5611_v55 }
0x369e   : > { %v7982_v43 = vpop.eup %7981 }
0x369f   : > { %v5613_v59 = vmul.f32 %v7982_v43, %v7974_v33 }
0x36b2   : > { %6105 = vadd.xlane.f32.xlu1 %v6104_v49 }
0x36c3   : > { %6109 = vrot.lane.b32.xlu1 %v8851_v18, %s9506_s10 }
0x3706   : > { %v5776_v38 = vpop.xlane.xlu1 %5775 }
0x3707   : > { %7983 = vrcp.f32 %v5776_v38  ;;  %v6294_v38 = vrot.slane %v9207_v56, %v8444_v1  ;;  %v6393_v1 = vld [vmem:[%s9455_s3 + $0x480] sm:$0xff] }
0x370a   : > { %v5941_v57 = vpop.xlane.xlu0 %5940  ;;  %v5780_v0 = vpop.permute.xlu1 %5779 }
0x370b   : > { %7985 = vrcp.f32 %v5941_v57 }
0x370e   : > { %v5615_v5 = vpop.permute.xlu0 %5614  ;;  %v5945_v61 = vpop.permute.xlu1 %5944 }
0x370f   : > { %7528 = vmatpush3.msra.mxu1 %v5615_v5 }
0x3710   : > { %7530 = vmatmul.mubr.msk.f32.vlgmr.msra.gmra.mrb[72].mxu1 %vm488_vm3, %v5613_v59  ;;  %7537 = vmatprep.subr.mxu1 %v8065_v54  ;;  %v6299_v59 = vrot.slane %v9207_v56, %v8447_v2  ;;  %v6394_v2 = vld [vmem:[%s9455_s3 + $0x488] sm:$0xff] }
0x3711   : > { %v7984_v15 = vpop.eup %7983  ;;  %7538 = vmatpush3.msra.mxu1 %v5780_v0  ;;  %7539 = vmatprep.mubr.msk.f32.mxu1 %vm8064_vm2, %v8065_v54 }
0x3712   : > { %v5778_v18 = vmul.f32 %v7984_v15, %v7976_v16  ;;  %7547 = vmatprep.subr.mxu1 %v8065_v54  ;;  %v6392_v15 = vld [vmem:[%s9455_s3 + $0x478] sm:$0xff] }
0x3714   : > { %7540 = vmatmul.mubr.msk.f32.vlgmr.msra.gmra.mrb[74].mxu1 %vm488_vm3, %v5778_v18  ;;  %v7789_v18 = vpack.c.bf16 %v6393_v1, %v6392_v15 }
0x3715   : > { %v7986_v6 = vpop.eup %7985  ;;  %7548 = vmatpush3.msra.mxu1 %v5945_v61  ;;  %7549 = vmatprep.mubr.msk.f32.mxu1 %vm8064_vm2, %v8065_v54  ;;  %v6395_v61 = vld [vmem:[%s9455_s3 + $0x490] sm:$0xff] }
0x3716   : > { %v5943_v7 = vmul.f32 %v7986_v6, %v7978_v45  ;;  %7557 = vmatprep.subr.mxu1 %v8065_v54  ;;  %v6301_v45 = vld [vmem:[%s9455_s3 + $0x450] sm:$0xff]  ;;  %v7792_v6 = vpack.c.bf16 %v6395_v61, %v6394_v2 }
0x3717   : > { %v7783_v50 = vpack.c.bf16 %v6302_v48, %v6301_v45 }
0x3718   : > { %7550 = vmatmul.mubr.msk.f32.vlgmr.msra.gmra.mrb[76].mxu1 %vm488_vm3, %v5943_v7  ;;  %v6396_v7 = vld [vmem:[%s9455_s3 + $0x498] sm:$0xff] }
0x3719   : > { %7559 = vmatprep.mubr.msk.f32.mxu1 %vm8064_vm2, %v8065_v54 }
0x373f   : > { %v6106_v8 = vpop.xlane.xlu1 %6105 }
0x3740   : > { %7987 = vrcp.f32 %v6106_v8  ;;  %v6397_v8 = vld [vmem:[%s9455_s3 + $0x4a0] sm:$0xff] }
0x3743   : > { %v6110_v63 = vpop.permute.xlu1 %6109 }
0x3744   : > { %7558 = vmatpush3.msra.mxu1 %v6110_v63  ;;  %v7795_v63 = vpack.c.bf16 %v6397_v8, %v6396_v7 }
0x3745   : > { %7782 = vmatprep.subr.bf16.mxu1 %v8063_v3 }
0x374a   : > { %v7988_v10 = vpop.eup %7987 }
0x374b   : > { %v6108_v12 = vmul.f32 %v7988_v10, %v7980_v41  ;;  %v6398_v10 = vld [vmem:[%s9455_s3 + $0x4a8] sm:$0xff] }
0x374d   : > { %7560 = vmatmul.mubr.msk.f32.vlgmr.msra.gmra.mrb[78].mxu1 %vm488_vm3, %v6108_v12  ;;  %v6399_v12 = vld [vmem:[%s9455_s3 + $0x4b0] sm:$0xff] }
0x374e   : > { %7581 = vmatprep.mubr.msk.f32.mxu1 %vm8064_vm2, %v8065_v54  ;;  %7784 = vmatpush3.bf16.msra.mxu1 %v7783_v50  ;;  %v7798_v13 = vpack.c.bf16 %v6399_v12, %v6398_v10 }
0x374f   : > { %7785 = vmatprep.subr.bf16.mxu1 %v8063_v3 }
0x37e3   : > { %v5686_v20 = vpop.f32.mrb[72].mxu1 }
0x37e4   : > { %v7531_v36 = vpop.f32.mrb[73].mxu1 }
0x37e7   : > { %v5851_v21 = vpop.f32.mrb[74].mxu1 }
0x37e8   : > { %6186 = vrot.lane.b32.xlu0 %v5851_v21, %s9506_s10  ;;  %v7541_v22 = vpop.f32.mrb[75].mxu1 }
0x37eb   : > { %v6016_v23 = vpop.f32.mrb[76].mxu1 }
0x37ec   : > { %6190 = vrot.lane.b32.xlu1 %v6016_v23, %s9507_s12  ;;  %v7551_v24 = vpop.f32.mrb[77].mxu1 }
0x3820   : > { %v6181_v9 = vpop.f32.mrb[78].mxu1 }
0x3821   : > { %6194 = vrot.lane.b32.xlu0 %v6181_v9, %s9508_s14  ;;  %v7561_v25 = vpop.f32.mrb[79].mxu1  ;;  %s262_s14 = scalar_lea.vmem %s9454_s2, %s9517_s6 }
0x385a   : > { %v6187_v26 = vpop.permute.xlu0 %6186 }
0x385b   : > { %v6197_v27 = vsel %vm488_vm3, %v5686_v20, %v6187_v26  ;;  %v6868_v26 = vld [vmem:[%s9455_s3 + $0x4b8] ss:$0 sm:$0xff] }
0x385e   : > { %v6191_v35 = vpop.permute.xlu1 %6190 }
0x385f   : > { %v6198_v28 = vsel %vm1159_vm5, %v6197_v27, %v6191_v35 }
0x3893   : > { %v6195_v29 = vpop.permute.xlu0 %6194 }
0x3894   : > { %v6199_v30 = vsel %vm1161_vm6, %v6198_v28, %v6195_v29 }
0x3895   : > { %7571 = vmatmul.mubr.msk.f32.vlgmr.msra.gmra.mrb[54].mxu0 %vm372_vm1, %v6199_v30 }
0x3896   : > { %7600 = vmatprep.mubr.msk.f32.mxu0 %vm8064_vm2, %v8065_v54  ;;  %7790 = vmatpush3.bf16.msra.mxu0 %v7789_v18 }
0x3897   : > { %7791 = vmatprep.subr.bf16.mxu0 %v8063_v3 }
0x389a   : > { %7793 = vmatpush3.bf16.msra.mxu0 %v7792_v6 }
0x389b   : > { %7794 = vmatprep.subr.bf16.mxu0 %v8063_v3 }
0x389e   : > { %7796 = vmatpush3.bf16.msra.mxu0 %v7795_v63 }
0x389f   : > { %7797 = vmatprep.subr.bf16.mxu0 %v8063_v3 }
0x38a2   : > { %7799 = vmatpush3.bf16.msra.mxu0 %v7798_v13 }
0x3968   : > { %v6273_v33 = vpop.f32.mrb[54].mxu0 }
0x3969   : > { %v6274_v34 = vadd.f32 %v6864_v32, %v6273_v33  ;;  %v7572_v52 = vpop.f32.mrb[55].mxu0 }
0x396b   : > { %v6277_v37 = vadd.f32 %v6274_v34, %v9213_v4  ;;  %v6303_v4 = vld [vmem:[%s9455_s3 + $0x460] sm:$0xff] }
0x396c   : > { %v7786_v51 = vpack.c.bf16 %v6304_v46, %v6303_v4  ;;  %v6495_v4 = vrot.slane %v9207_v56, %v4565_v31 }
0x396d   : > { %v6278_v47 = vsel %vm372_vm1, %v6277_v37, 0.0 }
0x396e   : > { %6279 = vadd.xlane.f32.xlu1 %v6278_v47  ;;  %7787 = vmatpush3.bf16.msra.mxu1 %v7786_v51  ;;  %v6502_v47 = vld [vmem:[%s9455_s3 + $0x4c0] sm:$0xff] }
0x396f   : > { %7800 = vmatprep.subr.bf16.mxu1 %v8063_v3 }
0x39fb   : > { %v6280_v39 = vpop.xlane.xlu1 %6279 }
0x39fc   : > { %v6281_v42 = vmul.f32 0.03125, %v6280_v39  ;;  %v6503_v39 = vld [vmem:[%s9455_s3 + $0x4c8] sm:$0xff] }
0x39fe   : > { %v6282_v53 = vsub.f32 %v6277_v37, %v6281_v42  ;;  %v7801_v42 = vpack.c.bf16 %v6503_v39, %v6502_v47 }
0x3a00   : > { %v6283_v16 = vmul.f32 %v6282_v53, %v6282_v53 }
0x3a02   : > { %v6284_v44 = vsel %vm372_vm1, %v6283_v16, 0.0  ;;  %v6505_v16 = vld [vmem:[%s9455_s3 + $0x4d8] sm:$0xff] }
0x3a03   : > { %6285 = vadd.xlane.f32.xlu0 %v6284_v44 }
0x3a90   : > { %v6286_v41 = vpop.xlane.xlu0 %6285 }
0x3a91   : > { %v6287_v49 = vmul.f32 0.03125, %v6286_v41  ;;  %v6500_v41 = vrot.slane %v9207_v56, %v4570_v40 }
0x3a93   : > { %v6288_v55 = vadd.f32 1e-05, %v6287_v49 }
0x3a95   : > { %7989 = vrsqrt.f32 %v6288_v55  ;;  %v8082_v55 = vmov 0  }
0x3a96   : > { %7865 = vset.pattern.permute.xlu1 %v8082_v55  ;;  %7866 = vset.pattern.permute.xlu0 %v8082_v55 }
0x3a9f   : > { %v7990_v57 = vpop.eup %7989 }
0x3aa0   : > { %v6290_v43 = vmul.f32 %v7990_v57, %v6282_v53  ;;  %v6504_v53 = vld [vmem:[%s9455_s3 + $0x4d0] sm:$0xff] }
0x3aa1   : > { %v7804_v44 = vpack.c.bf16 %v6505_v16, %v6504_v53 }
0x3aa2   : > { %v6295_v0 = vmul.f32 %v6294_v38, %v6290_v43  ;;  %v6595_v38 = vld [vmem:[%s262_s14] sm:$0xff] }
0x3aa3   : > { %vm6596_vm8 = vcmp.ne.s32.totalorder %v6595_v38, 4294967196 }
0x3aa4   : > { %v6300_v5 = vadd.f32 %v6299_v59, %v6295_v0  ;;  %v6597_v57 = vsel %vm6596_vm8, %v6595_v38, 0  ;;  %v6872_v7 = vsel %vm6596_vm8, 1.0, %v8065_v54 }
0x3aa6   : > { %7582 = vmatmul.mubr.msk.f32.vlgmr.msra.gmra.mrb[80].mxu1 %vm372_vm1, %v6300_v5 }
0x3aa7   : > { %7611 = vmatprep.mubr.msk.f32.mxu1 %vm8064_vm2, %v8065_v54  ;;  %7802 = vmatpush3.bf16.msra.mxu1 %v7801_v42 }
0x3aa8   : > { %7803 = vmatprep.subr.bf16.mxu1 %v8063_v3 }
0x3aab   : > { %7805 = vmatpush3.bf16.msra.mxu1 %v7804_v44 }
0x3b79   : > { %v6379_v17 = vpop.f32.mrb[80].mxu1 }
0x3b7a   : > { %v6380_v11 = vadd.f32 %v6866_v62, %v6379_v17  ;;  %v7583_v58 = vpop.f32.mrb[81].mxu1 }
0x3b7c   : > { %v6383_v19 = vmul.f32 %v6380_v11, %v6380_v11 }
0x3b7e   : > { %v6384_v20 = vmul.f32 %v6383_v19, %v6380_v11 }
0x3b80   : > { %v6385_v36 = vmul.f32 0.044715, %v6384_v20 }
0x3b82   : > { %v6386_v21 = vadd.f32 %v6385_v36, %v6380_v11 }
0x3b84   : > { %v6387_v22 = vmul.f32 0.7978846, %v6386_v21 }
0x3b86   : > { %7991 = vtanh.f32 %v6387_v22 }
0x3b90   : > { %v7992_v23 = vpop.eup %7991 }
0x3b91   : > { %v6389_v24 = vadd.f32 1.0, %v7992_v23 }
0x3b93   : > { %v6390_v9 = vmul.f32 0.5, %v6389_v24 }
0x3b95   : > { %v6391_v25 = vmul.f32 %v6390_v9, %v6380_v11 }
0x3b97   : > { %7601 = vmatmul.mubr.msk.f32.vlgmr.msra.gmra.mrb[56].mxu0 %vm293_vm0, %v6391_v25 }
0x3c6a   : > { %v6474_v35 = vpop.f32.mrb[56].mxu0 }
0x3c6b   : > { %v6475_v27 = vadd.f32 %v6868_v26, %v6474_v35  ;;  %v7602_v28 = vpop.f32.mrb[57].mxu0 }
0x3c6d   : > { %v6478_v29 = vadd.f32 %v6475_v27, %v6300_v5 }
0x3c6f   : > { %v6479_v30 = vsel %vm372_vm1, %v6478_v29, 0.0 }
0x3c70   : > { %6480 = vadd.xlane.f32.xlu0 %v6479_v30 }
0x3cfd   : > { %v6481_v32 = vpop.xlane.xlu0 %6480 }
0x3cfe   : > { %v6482_v33 = vmul.f32 0.03125, %v6481_v32 }
0x3d00   : > { %v6483_v34 = vsub.f32 %v6478_v29, %v6482_v33 }
0x3d02   : > { %v6484_v52 = vmul.f32 %v6483_v34, %v6483_v34 }
0x3d04   : > { %v6485_v37 = vsel %vm372_vm1, %v6484_v52, 0.0 }
0x3d05   : > { %6486 = vadd.xlane.f32.xlu0 %v6485_v37 }
0x3d92   : > { %v6487_v45 = vpop.xlane.xlu0 %6486 }
0x3d93   : > { %v6488_v48 = vmul.f32 0.03125, %v6487_v45 }
0x3d95   : > { %v6489_v50 = vadd.f32 1e-05, %v6488_v48 }
0x3d97   : > { %7993 = vrsqrt.f32 %v6489_v50 }
0x3da1   : > { %v7994_v46 = vpop.eup %7993 }
0x3da2   : > { %v6491_v51 = vmul.f32 %v7994_v46, %v6483_v34 }
0x3da4   : > { %v6496_v3 = vmul.f32 %v6495_v4, %v6491_v51 }
0x3da6   : > { %v6501_v49 = vadd.f32 %v6500_v41, %v6496_v3 }
0x3da8   : > { %7612 = vmatmul.mubr.msk.f32.vlgmr.msra.gmra.mrb[82].mxu1 %vm372_vm1, %v6501_v49 }
0x3e7b   : > { %v6580_v31 = vpop.f32.mrb[82].mxu1 }
0x3e7c   : > { %v6581_v40 = vadd.f32 %v6870_v60, %v6580_v31  ;;  %v7613_v56 = vpop.f32.mrb[83].mxu1 }
0x3e7e   : > { %6585 = vmax.xlane.f32.xlu1 %v6581_v40  ;;  %6584 = vst [vmem:[%s244_s0] sm:$0xff] %v6581_v40 }
0x3e8f   : > { %6599 = vperm.xlu1 %7865, %v6597_v57  }
0x3f0b   : > { %v6586_v43 = vpop.xlane.xlu1 %6585 }
0x3f0c   : > { %v6587_v59 = vsub.f32 %v6581_v40, %v6586_v43 }
0x3f0e   : > { %v6588_v0 = vmul.f32 1.442695, %v6587_v59 }
0x3f0f   : > { %v6600_v5 = vpop.permute.xlu1 %6599 }
0x3f10   : > { %7995 = vpow2.f32 %v6588_v0  ;;  %vm6601_vm9 = vcmp.eq.s32.totalorder %v8329_v14, %v6600_v5 }
0x3f11   : > { %v6602_v1 = vsel %vm6601_vm9, %v6581_v40, 0.0 }
0x3f1a   : > { %v7996_v15 = vpop.eup %7995 }
0x3f1b   : > { %6590 = vadd.xlane.f32.xlu0 %v7996_v15 }
0x3f1f   : > { %6603 = vadd.xlane.f32.xlu0 %v6602_v1 }
0x3fa8   : > { %v6591_v18 = vpop.xlane.xlu0 %6590 }
0x3fa9   : > { %7997 = vlog2.f32 %v6591_v18 }
0x3fac   : > { %v6604_v8 = vpop.xlane.xlu0 %6603 }
0x3fb3   : > { %v7998_v2 = vpop.eup %7997 }
0x3fb4   : > { %v6593_v61 = vmul.f32 0.6931472, %v7998_v2 }
0x3fb6   : > { %v6594_v6 = vadd.f32 %v6593_v61, %v6586_v43 }
0x3fb8   : > { %v6605_v63 = vsub.f32 %v6594_v6, %v6604_v8 }
0x3fba   : > { %v6608_v10 = vmul.f32 %v6872_v7, %v6605_v63 }
0x3fbc   : > { %v6610_v14 = vsel %vm6609_vm10, %v6608_v10, 0.0 }
0x3fbd   : > { %v6611_v12 = vrot.slane %v6610_v14, 4 }
0x3fbf   : > { %v6612_v13 = vadd.f32 %v6611_v12, %v6610_v14 }
0x3fc1   : > { %v6613_v62 = vrot.slane %v6612_v13, 2 }
0x3fc3   : > { %v6614_v17 = vadd.f32 %v6613_v62, %v6612_v13 }
0x3fc5   : > { %v6615_v11 = vrot.slane %v6614_v17, 1 }
0x3fc7   : > { %v6616_v58 = vadd.f32 %v6615_v11, %v6614_v17 }
0x3fc9   : > { %6619 = vperm.xlu0 %7866, %v6616_v58  }
0x3fca   : > { %8012 = shalt.err (!%p8009_p3)
}
0x3fcb   : > { %s8013_s18 = scalar_lea.hbm %s9410_s25, 128  ;;  %s8017_s15 = scalar_lea.hbm %s9456_s4, 256 }
0x3fcc   : > { %p8014_p4 = scmp.ne.s32.totalorder %s9410_s25, %s8013_s18  ;;  %p8018_p9 = scmp.lt.u32.totalorder %s9410_s25, %s9456_s4 }
0x3fcd   : > { %p8019_p10 = scmp.lt.u32.totalorder %s8017_s15, %s8013_s18  ;;  %p8021_p12 = scmp.lt.u32.totalorder %s8013_s18, %s9410_s25 }
0x3fce   : > { %p8015_p7 = pnand %p8014_p4, %p8152_p5 }
0x3fcf   : > { %p8020_p11 = por %p8019_p10, %p8018_p9 }
0x3fd0   : > { %p8016_p8 = pneg %p8015_p7 }
0x3fd1   : > { %p8022_p13 = por %p8021_p12, %p8020_p11 }
0x3fd3   : > { %p8023_p0 = pnand %p8022_p13, %p8016_p8 }
0x3fd5   : > { %8026 = shalt.err (!%p8023_p0)
}
0x3fd6   : > { %7806 = dma.vmem_to_hbm [thread:$0]  (%p8152_p5), %s6642_s17, 128, %s9410_s25, %s6625_s1  }
0x3fd7   : > { %s265_s0 = scalar_lea.vmem %s9457_s5, %s8178_s13 }
0x4048   : > { %v6620_v54 = vpop.permute.xlu0 %6619 }
0x4049   : > { %6623 = vst [vmem:[%s265_s0] sm:$0x1] %v6620_v54 }
0x404a PF: > { %s9518_s6 = sld [smem:[#allocation5_spill]]  ;;  %p7812_p1 = scmp.ge.s32.totalorder %s8061_s21, 2 }
0x404c   : > { %p7809_p2 = pnand %p7812_p1, %p8156_p6 }
0x4050   : > { %s6656_s12 = sand.u32 1, %s9518_s6  }
0x4051   : > { %s6657_s14 = scalar_lea.sflag [#allocation3], %s6656_s12 }
0x4052   : > { %8044 = dma.done.wait (!%p7809_p2), %s6657_s14, 128  }
0x4053   : > { %8046 = vsyncadd (!%p7809_p2), %s6657_s14, 4294967168  ;;  %s9520_s21 = sld [smem:[#allocation7_spill]]  ;;  %s9521_s28 = sld [smem:[#allocation6_spill]] }
0x4054   : > { %s9522_s20 = sld [smem:[#allocation8_spill]]  ;;  %s9523_s18 = smov %s8053_s19 }
0x4059   : > { %p16_p5 = scmp.ge.s32.totalorder %s9520_s21, 4   ;;  %s9524_s19 = smov %s9521_s28 }
0x405b   :  { %18 = sbr.rel (!%p16_p5) target bundleno = 6 (0x6), region = 89 }
0x4062   :  { %6668 = vsyncpa [#allocation3], 1 }
0x4063   :  { %6670 = vsyncpa [#allocation3 + $0x1], 1 }

</bundles_post_ra>
